<compile_context>
chip_gen: v5e
topology: v5e:2x2
jax: 0.10.0
libtpu: 0.0.40
codegen_flags: <defaults>
</compile_context>

<pallas_src>
import functools

import jax
import jax.numpy as jnp
from jax import lax
from jax.experimental import pallas as pl
from jax.experimental.pallas import tpu as pltpu

EMBEDDING_DIM = 128
FC_HIDDEN = 64
FC_HIDDEN2 = 64
TEXT_LSTM_HIDDEN = 64

HP = 128          # lane-padded hidden size (real H = 64 lives in lanes [0:64])
GP = 4 * HP       # lane-padded gate width
NC_PAD = 128      # lane-padded output width


def text_only_kernel(T, B, x_ref, w_ih_ref, w_hh_ref, b_ref,
                     w1_ref, b1_ref, w2_ref, b2_ref, wo_ref, bo_ref,
                     out_ref):
    """x_ref: [T*B, E] pre-gathered embeddings (time-major, batch padded to 8)."""
    hp = w_hh_ref.shape[0]          # 128

    # Hoisted input projection: all timesteps in a single MXU matmul,
    # bias broadcast folded in once (not per step).
    slab = (jnp.dot(x_ref[...], w_ih_ref[...], preferred_element_type=jnp.float32)
            + b_ref[...])                                            # [T*B, 4*HP]

    w_hh = w_hh_ref[...]
    h = jnp.zeros((B, hp), jnp.float32)
    c = jnp.zeros((B, hp), jnp.float32)

    # T is small and static -> fully unrolled recurrence with static,
    # vreg-aligned slices (each gate block is a full 128-lane slice).
    for t in range(T):
        gates = slab[t * B:(t + 1) * B, :] + jnp.dot(
            h, w_hh, preferred_element_type=jnp.float32)             # [B, 4*HP]
        i_g = jax.nn.sigmoid(gates[:, 0 * hp:1 * hp])
        f_g = jax.nn.sigmoid(gates[:, 1 * hp:2 * hp])
        g_g = jnp.tanh(gates[:, 2 * hp:3 * hp])
        o_g = jax.nn.sigmoid(gates[:, 3 * hp:4 * hp])
        c = f_g * c + i_g * g_g
        h = o_g * jnp.tanh(c)
    # Padded lanes [64:128] of h stay exactly 0 (zero weight cols/rows, tanh(0)=0).

    z = jnp.maximum(jnp.dot(h, w1_ref[...], preferred_element_type=jnp.float32)
                    + b1_ref[...], 0.0)
    z = jnp.maximum(jnp.dot(z, w2_ref[...], preferred_element_type=jnp.float32)
                    + b2_ref[...], 0.0)
    # Dropout(p=0.5): identity in eval mode.
    out_ref[...] = (jnp.dot(z, wo_ref[...], preferred_element_type=jnp.float32)
                    + bo_ref[...])


def text_only_forward(text_bt, emb, padded_params, num_classes):
    """text_bt: [B, T] int32 tokens (batch-first, like PyTorch)."""
    B, T = text_bt.shape
    E = emb.shape[1]

    # Embedding lookup as a plain XLA gather; the table stays out of VMEM.
    # (emb row 0 is zero -> padding_idx=0 semantics.)
    x = jnp.take(emb, text_bt, axis=0)                 # [B, T, E]
    x = jnp.transpose(x, (1, 0, 2))                    # [T, B, E] time-major
    b_pad = max(8, ((B + 7) // 8) * 8)                 # sublane-align batch
    if b_pad != B:
        x = jnp.pad(x, ((0, 0), (0, b_pad - B), (0, 0)))
    x_flat = x.reshape(T * b_pad, E)

    vmem = pl.BlockSpec(memory_space=pltpu.MemorySpace.VMEM)
    out_padded = pl.pallas_call(
        functools.partial(text_only_kernel, T, b_pad),
        out_shape=jax.ShapeDtypeStruct((b_pad, NC_PAD), jnp.float32),
        in_specs=[vmem] * 10,
        out_specs=vmem,
    )(x_flat, *padded_params)
    return out_padded[:B, :num_classes]


def _pad_gate_cols(w, H):
    """[rows, 4H] -> [rows, 4*HP]: each gate block placed at k*HP (zeros elsewhere)."""
    rows = w.shape[0]
    out = jnp.zeros((rows, GP), jnp.float32)
    for k in range(4):
        out = out.at[:, k * HP:k * HP + H].set(w[:, k * H:(k + 1) * H])
    return out


def pad_params(params):
    """Produce kernel-ready lane-padded weights (done once, outside forward)."""
    (_, w_ih, w_hh, b, w1, b1, w2, b2, wo, bo) = params
    H = TEXT_LSTM_HIDDEN
    nc = wo.shape[1]
    w_ih_p = _pad_gate_cols(w_ih, H)                                     # [E, 4*HP]
    w_hh_p = jnp.zeros((HP, GP), jnp.float32).at[:H].set(_pad_gate_cols(w_hh, H))
    b_p = _pad_gate_cols(b, H)                                           # [1, 4*HP]
    w1_p = jnp.zeros((HP, HP), jnp.float32).at[:H, :FC_HIDDEN].set(w1)
    b1_p = jnp.zeros((1, HP), jnp.float32).at[:, :FC_HIDDEN].set(b1)
    w2_p = jnp.zeros((HP, HP), jnp.float32).at[:FC_HIDDEN, :FC_HIDDEN2].set(w2)
    b2_p = jnp.zeros((1, HP), jnp.float32).at[:, :FC_HIDDEN2].set(b2)
    wo_p = jnp.zeros((HP, NC_PAD), jnp.float32).at[:FC_HIDDEN2, :nc].set(wo)
    bo_p = jnp.zeros((1, NC_PAD), jnp.float32).at[:, :nc].set(bo)
    return (w_ih_p, w_hh_p, b_p, w1_p, b1_p, w2_p, b2_p, wo_p, bo_p)


def make_params(key, vocab_size, num_classes):
    H = TEXT_LSTM_HIDDEN
    E = EMBEDDING_DIM
    ks = jax.random.split(key, 12)
    s = 0.05
    emb = jax.random.normal(ks[0], (vocab_size, E), jnp.float32) * s
    emb = emb.at[0].set(0.0)                       # padding_idx=0
    w_ih = jax.random.normal(ks[1], (E, 4 * H), jnp.float32) * s
    w_hh = jax.random.normal(ks[2], (H, 4 * H), jnp.float32) * s
    b_ih = jax.random.normal(ks[3], (4 * H,), jnp.float32) * s
    b_hh = jax.random.normal(ks[4], (4 * H,), jnp.float32) * s
    b = (b_ih + b_hh).reshape(1, 4 * H)
    w1 = jax.random.normal(ks[5], (H, FC_HIDDEN), jnp.float32) * s
    b1 = jax.random.normal(ks[6], (1, FC_HIDDEN), jnp.float32) * s
    w2 = jax.random.normal(ks[7], (FC_HIDDEN, FC_HIDDEN2), jnp.float32) * s
    b2 = jax.random.normal(ks[8], (1, FC_HIDDEN2), jnp.float32) * s
    wo = jax.random.normal(ks[9], (FC_HIDDEN2, num_classes), jnp.float32) * s
    bo = jax.random.normal(ks[10], (1, num_classes), jnp.float32) * s
    return (emb, w_ih, w_hh, b, w1, b1, w2, b2, wo, bo)


def reference_forward(text_bt, params):
    """Pure-JAX reference matching PyTorch semantics (batch-first text [B, T])."""
    (emb, w_ih, w_hh, b, w1, b1, w2, b2, wo, bo) = params
    H = TEXT_LSTM_HIDDEN
    x = emb[text_bt]                                # [B, T, E]
    B, T, _ = x.shape

    def step(carry, x_t):
        h, c = carry
        gates = x_t @ w_ih + h @ w_hh + b           # [B, 4H]
        i_g = jax.nn.sigmoid(gates[:, 0 * H:1 * H])
        f_g = jax.nn.sigmoid(gates[:, 1 * H:2 * H])
        g_g = jnp.tanh(gates[:, 2 * H:3 * H])
        o_g = jax.nn.sigmoid(gates[:, 3 * H:4 * H])
        c = f_g * c + i_g * g_g
        h = o_g * jnp.tanh(c)
        return (h, c), None

    h0 = jnp.zeros((B, H), jnp.float32)
    (h, _), _ = lax.scan(step, (h0, h0), jnp.transpose(x, (1, 0, 2)))
    z = jnp.maximum(h @ w1 + b1, 0.0)
    z = jnp.maximum(z @ w2 + b2, 0.0)
    return z @ wo + bo


if __name__ == "__main__":
    vocab_size = 64
    num_classes = 8
    B, T = 2, 8

    key = jax.random.PRNGKey(0)
    k_tok, k_par = jax.random.split(key)
    params = make_params(k_par, vocab_size, num_classes)
    padded_params = pad_params(params)
    emb = params[0]

    # tokens in [0, vocab_size); include some padding zeros
    text_bt = jax.random.randint(k_tok, (B, T), 0, vocab_size, dtype=jnp.int32)
    text_bt = text_bt.at[:, -2:].set(0)

    out = text_only_forward(text_bt, emb, padded_params, num_classes)
    jax.block_until_ready(out)

    ref = reference_forward(text_bt, params)
    assert out.shape == (B, num_classes)
    assert jnp.allclose(out, ref, atol=1e-4, rtol=1e-4)
    print("KERNEL_OK")
</pallas_src>

<mosaic_0001>
module attributes {stable_mosaic.version = 11 : i64} {
  func.func @text_only_kernel(%arg0: memref<64x128xf32, #tpu.memory_space<vmem>>, %arg1: memref<128x512xf32, #tpu.memory_space<vmem>>, %arg2: memref<128x512xf32, #tpu.memory_space<vmem>>, %arg3: memref<1x512xf32, #tpu.memory_space<vmem>>, %arg4: memref<128x128xf32, #tpu.memory_space<vmem>>, %arg5: memref<1x128xf32, #tpu.memory_space<vmem>>, %arg6: memref<128x128xf32, #tpu.memory_space<vmem>>, %arg7: memref<1x128xf32, #tpu.memory_space<vmem>>, %arg8: memref<128x128xf32, #tpu.memory_space<vmem>>, %arg9: memref<1x128xf32, #tpu.memory_space<vmem>>, %arg10: memref<8x128xf32, #tpu.memory_space<vmem>>) attributes {dimension_semantics = [], scalar_prefetch = 0 : i64, scratch_operands = 0 : i64, tpu.core_type = #tpu.core_type<tc>} {
    %c0 = arith.constant 0 : index
    %c0_0 = arith.constant 0 : index
    %0 = vector.load %arg0[%c0, %c0_0] : memref<64x128xf32, #tpu.memory_space<vmem>>, vector<64x128xf32>
    %c0_1 = arith.constant 0 : index
    %c0_2 = arith.constant 0 : index
    %1 = vector.load %arg1[%c0_1, %c0_2] : memref<128x512xf32, #tpu.memory_space<vmem>>, vector<128x512xf32>
    %cst = arith.constant dense<0.000000e+00> : vector<64x512xf32>
    %2 = tpu.matmul %0, %1, %cst {dimension_numbers = #tpu.dot_dimension_numbers<[1], [0], [0], [1], [0, 0, 1, 1], [], []>} : vector<64x128xf32>, vector<128x512xf32>, vector<64x512xf32> -> vector<64x512xf32>
    %c0_3 = arith.constant 0 : index
    %c0_4 = arith.constant 0 : index
    %3 = vector.load %arg3[%c0_3, %c0_4] : memref<1x512xf32, #tpu.memory_space<vmem>>, vector<1x512xf32>
    %4 = vector.broadcast %3 : vector<1x512xf32> to vector<64x512xf32>
    %5 = arith.addf %2, %4 : vector<64x512xf32>
    %c0_5 = arith.constant 0 : index
    %c0_6 = arith.constant 0 : index
    %6 = vector.load %arg2[%c0_5, %c0_6] : memref<128x512xf32, #tpu.memory_space<vmem>>, vector<128x512xf32>
    %cst_7 = arith.constant 0.000000e+00 : f32
    %7 = vector.broadcast %cst_7 : f32 to vector<8x128xf32>
    %cst_8 = arith.constant 0.000000e+00 : f32
    %8 = vector.broadcast %cst_8 : f32 to vector<8x128xf32>
    %9 = vector.extract_strided_slice %5 {offsets = [0, 0], sizes = [8, 512], strides = [1, 1]} : vector<64x512xf32> to vector<8x512xf32>
    %cst_9 = arith.constant dense<0.000000e+00> : vector<8x512xf32>
    %10 = tpu.matmul %7, %6, %cst_9 {dimension_numbers = #tpu.dot_dimension_numbers<[1], [0], [0], [1], [0, 0, 1, 1], [], []>} : vector<8x128xf32>, vector<128x512xf32>, vector<8x512xf32> -> vector<8x512xf32>
    %11 = arith.addf %9, %10 : vector<8x512xf32>
    %12 = vector.extract_strided_slice %11 {offsets = [0, 0], sizes = [8, 128], strides = [1, 1]} : vector<8x512xf32> to vector<8x128xf32>
    %13 = arith.negf %12 : vector<8x128xf32>
    %14 = math.exp %13 : vector<8x128xf32>
    %cst_10 = arith.constant 1.000000e+00 : f32
    %15 = vector.broadcast %cst_10 : f32 to vector<8x128xf32>
    %16 = arith.addf %15, %14 : vector<8x128xf32>
    %17 = arith.divf %15, %16 : vector<8x128xf32>
    %18 = vector.extract_strided_slice %11 {offsets = [0, 128], sizes = [8, 128], strides = [1, 1]} : vector<8x512xf32> to vector<8x128xf32>
    %19 = arith.negf %18 : vector<8x128xf32>
    %20 = math.exp %19 : vector<8x128xf32>
    %cst_11 = arith.constant 1.000000e+00 : f32
    %21 = vector.broadcast %cst_11 : f32 to vector<8x128xf32>
    %22 = arith.addf %21, %20 : vector<8x128xf32>
    %23 = arith.divf %21, %22 : vector<8x128xf32>
    %24 = vector.extract_strided_slice %11 {offsets = [0, 256], sizes = [8, 128], strides = [1, 1]} : vector<8x512xf32> to vector<8x128xf32>
    %25 = math.tanh %24 : vector<8x128xf32>
    %26 = vector.extract_strided_slice %11 {offsets = [0, 384], sizes = [8, 128], strides = [1, 1]} : vector<8x512xf32> to vector<8x128xf32>
    %27 = arith.negf %26 : vector<8x128xf32>
    %28 = math.exp %27 : vector<8x128xf32>
    %cst_12 = arith.constant 1.000000e+00 : f32
    %29 = vector.broadcast %cst_12 : f32 to vector<8x128xf32>
    %30 = arith.addf %29, %28 : vector<8x128xf32>
    %31 = arith.divf %29, %30 : vector<8x128xf32>
    %32 = arith.mulf %23, %8 : vector<8x128xf32>
    %33 = arith.mulf %17, %25 : vector<8x128xf32>
    %34 = arith.addf %32, %33 : vector<8x128xf32>
    %35 = math.tanh %34 : vector<8x128xf32>
    %36 = arith.mulf %31, %35 : vector<8x128xf32>
    %37 = vector.extract_strided_slice %5 {offsets = [8, 0], sizes = [8, 512], strides = [1, 1]} : vector<64x512xf32> to vector<8x512xf32>
    %cst_13 = arith.constant dense<0.000000e+00> : vector<8x512xf32>
    %38 = tpu.matmul %36, %6, %cst_13 {dimension_numbers = #tpu.dot_dimension_numbers<[1], [0], [0], [1], [0, 0, 1, 1], [], []>} : vector<8x128xf32>, vector<128x512xf32>, vector<8x512xf32> -> vector<8x512xf32>
    %39 = arith.addf %37, %38 : vector<8x512xf32>
    %40 = vector.extract_strided_slice %39 {offsets = [0, 0], sizes = [8, 128], strides = [1, 1]} : vector<8x512xf32> to vector<8x128xf32>
    %41 = arith.negf %40 : vector<8x128xf32>
    %42 = math.exp %41 : vector<8x128xf32>
    %cst_14 = arith.constant 1.000000e+00 : f32
    %43 = vector.broadcast %cst_14 : f32 to vector<8x128xf32>
    %44 = arith.addf %43, %42 : vector<8x128xf32>
    %45 = arith.divf %43, %44 : vector<8x128xf32>
    %46 = vector.extract_strided_slice %39 {offsets = [0, 128], sizes = [8, 128], strides = [1, 1]} : vector<8x512xf32> to vector<8x128xf32>
    %47 = arith.negf %46 : vector<8x128xf32>
    %48 = math.exp %47 : vector<8x128xf32>
    %cst_15 = arith.constant 1.000000e+00 : f32
    %49 = vector.broadcast %cst_15 : f32 to vector<8x128xf32>
    %50 = arith.addf %49, %48 : vector<8x128xf32>
    %51 = arith.divf %49, %50 : vector<8x128xf32>
    %52 = vector.extract_strided_slice %39 {offsets = [0, 256], sizes = [8, 128], strides = [1, 1]} : vector<8x512xf32> to vector<8x128xf32>
    %53 = math.tanh %52 : vector<8x128xf32>
    %54 = vector.extract_strided_slice %39 {offsets = [0, 384], sizes = [8, 128], strides = [1, 1]} : vector<8x512xf32> to vector<8x128xf32>
    %55 = arith.negf %54 : vector<8x128xf32>
    %56 = math.exp %55 : vector<8x128xf32>
    %cst_16 = arith.constant 1.000000e+00 : f32
    %57 = vector.broadcast %cst_16 : f32 to vector<8x128xf32>
    %58 = arith.addf %57, %56 : vector<8x128xf32>
    %59 = arith.divf %57, %58 : vector<8x128xf32>
    %60 = arith.mulf %51, %34 : vector<8x128xf32>
    %61 = arith.mulf %45, %53 : vector<8x128xf32>
    %62 = arith.addf %60, %61 : vector<8x128xf32>
    %63 = math.tanh %62 : vector<8x128xf32>
    %64 = arith.mulf %59, %63 : vector<8x128xf32>
    %65 = vector.extract_strided_slice %5 {offsets = [16, 0], sizes = [8, 512], strides = [1, 1]} : vector<64x512xf32> to vector<8x512xf32>
    %cst_17 = arith.constant dense<0.000000e+00> : vector<8x512xf32>
    %66 = tpu.matmul %64, %6, %cst_17 {dimension_numbers = #tpu.dot_dimension_numbers<[1], [0], [0], [1], [0, 0, 1, 1], [], []>} : vector<8x128xf32>, vector<128x512xf32>, vector<8x512xf32> -> vector<8x512xf32>
    %67 = arith.addf %65, %66 : vector<8x512xf32>
    %68 = vector.extract_strided_slice %67 {offsets = [0, 0], sizes = [8, 128], strides = [1, 1]} : vector<8x512xf32> to vector<8x128xf32>
    %69 = arith.negf %68 : vector<8x128xf32>
    %70 = math.exp %69 : vector<8x128xf32>
    %cst_18 = arith.constant 1.000000e+00 : f32
    %71 = vector.broadcast %cst_18 : f32 to vector<8x128xf32>
    %72 = arith.addf %71, %70 : vector<8x128xf32>
    %73 = arith.divf %71, %72 : vector<8x128xf32>
    %74 = vector.extract_strided_slice %67 {offsets = [0, 128], sizes = [8, 128], strides = [1, 1]} : vector<8x512xf32> to vector<8x128xf32>
    %75 = arith.negf %74 : vector<8x128xf32>
    %76 = math.exp %75 : vector<8x128xf32>
    %cst_19 = arith.constant 1.000000e+00 : f32
    %77 = vector.broadcast %cst_19 : f32 to vector<8x128xf32>
    %78 = arith.addf %77, %76 : vector<8x128xf32>
    %79 = arith.divf %77, %78 : vector<8x128xf32>
    %80 = vector.extract_strided_slice %67 {offsets = [0, 256], sizes = [8, 128], strides = [1, 1]} : vector<8x512xf32> to vector<8x128xf32>
    %81 = math.tanh %80 : vector<8x128xf32>
    %82 = vector.extract_strided_slice %67 {offsets = [0, 384], sizes = [8, 128], strides = [1, 1]} : vector<8x512xf32> to vector<8x128xf32>
    %83 = arith.negf %82 : vector<8x128xf32>
    %84 = math.exp %83 : vector<8x128xf32>
    %cst_20 = arith.constant 1.000000e+00 : f32
    %85 = vector.broadcast %cst_20 : f32 to vector<8x128xf32>
    %86 = arith.addf %85, %84 : vector<8x128xf32>
    %87 = arith.divf %85, %86 : vector<8x128xf32>
    %88 = arith.mulf %79, %62 : vector<8x128xf32>
    %89 = arith.mulf %73, %81 : vector<8x128xf32>
    %90 = arith.addf %88, %89 : vector<8x128xf32>
    %91 = math.tanh %90 : vector<8x128xf32>
    %92 = arith.mulf %87, %91 : vector<8x128xf32>
    %93 = vector.extract_strided_slice %5 {offsets = [24, 0], sizes = [8, 512], strides = [1, 1]} : vector<64x512xf32> to vector<8x512xf32>
    %cst_21 = arith.constant dense<0.000000e+00> : vector<8x512xf32>
    %94 = tpu.matmul %92, %6, %cst_21 {dimension_numbers = #tpu.dot_dimension_numbers<[1], [0], [0], [1], [0, 0, 1, 1], [], []>} : vector<8x128xf32>, vector<128x512xf32>, vector<8x512xf32> -> vector<8x512xf32>
    %95 = arith.addf %93, %94 : vector<8x512xf32>
    %96 = vector.extract_strided_slice %95 {offsets = [0, 0], sizes = [8, 128], strides = [1, 1]} : vector<8x512xf32> to vector<8x128xf32>
    %97 = arith.negf %96 : vector<8x128xf32>
    %98 = math.exp %97 : vector<8x128xf32>
    %cst_22 = arith.constant 1.000000e+00 : f32
    %99 = vector.broadcast %cst_22 : f32 to vector<8x128xf32>
    %100 = arith.addf %99, %98 : vector<8x128xf32>
    %101 = arith.divf %99, %100 : vector<8x128xf32>
    %102 = vector.extract_strided_slice %95 {offsets = [0, 128], sizes = [8, 128], strides = [1, 1]} : vector<8x512xf32> to vector<8x128xf32>
    %103 = arith.negf %102 : vector<8x128xf32>
    %104 = math.exp %103 : vector<8x128xf32>
    %cst_23 = arith.constant 1.000000e+00 : f32
    %105 = vector.broadcast %cst_23 : f32 to vector<8x128xf32>
    %106 = arith.addf %105, %104 : vector<8x128xf32>
    %107 = arith.divf %105, %106 : vector<8x128xf32>
    %108 = vector.extract_strided_slice %95 {offsets = [0, 256], sizes = [8, 128], strides = [1, 1]} : vector<8x512xf32> to vector<8x128xf32>
    %109 = math.tanh %108 : vector<8x128xf32>
    %110 = vector.extract_strided_slice %95 {offsets = [0, 384], sizes = [8, 128], strides = [1, 1]} : vector<8x512xf32> to vector<8x128xf32>
    %111 = arith.negf %110 : vector<8x128xf32>
    %112 = math.exp %111 : vector<8x128xf32>
    %cst_24 = arith.constant 1.000000e+00 : f32
    %113 = vector.broadcast %cst_24 : f32 to vector<8x128xf32>
    %114 = arith.addf %113, %112 : vector<8x128xf32>
    %115 = arith.divf %113, %114 : vector<8x128xf32>
    %116 = arith.mulf %107, %90 : vector<8x128xf32>
    %117 = arith.mulf %101, %109 : vector<8x128xf32>
    %118 = arith.addf %116, %117 : vector<8x128xf32>
    %119 = math.tanh %118 : vector<8x128xf32>
    %120 = arith.mulf %115, %119 : vector<8x128xf32>
    %121 = vector.extract_strided_slice %5 {offsets = [32, 0], sizes = [8, 512], strides = [1, 1]} : vector<64x512xf32> to vector<8x512xf32>
    %cst_25 = arith.constant dense<0.000000e+00> : vector<8x512xf32>
    %122 = tpu.matmul %120, %6, %cst_25 {dimension_numbers = #tpu.dot_dimension_numbers<[1], [0], [0], [1], [0, 0, 1, 1], [], []>} : vector<8x128xf32>, vector<128x512xf32>, vector<8x512xf32> -> vector<8x512xf32>
    %123 = arith.addf %121, %122 : vector<8x512xf32>
    %124 = vector.extract_strided_slice %123 {offsets = [0, 0], sizes = [8, 128], strides = [1, 1]} : vector<8x512xf32> to vector<8x128xf32>
    %125 = arith.negf %124 : vector<8x128xf32>
    %126 = math.exp %125 : vector<8x128xf32>
    %cst_26 = arith.constant 1.000000e+00 : f32
    %127 = vector.broadcast %cst_26 : f32 to vector<8x128xf32>
    %128 = arith.addf %127, %126 : vector<8x128xf32>
    %129 = arith.divf %127, %128 : vector<8x128xf32>
    %130 = vector.extract_strided_slice %123 {offsets = [0, 128], sizes = [8, 128], strides = [1, 1]} : vector<8x512xf32> to vector<8x128xf32>
    %131 = arith.negf %130 : vector<8x128xf32>
    %132 = math.exp %131 : vector<8x128xf32>
    %cst_27 = arith.constant 1.000000e+00 : f32
    %133 = vector.broadcast %cst_27 : f32 to vector<8x128xf32>
    %134 = arith.addf %133, %132 : vector<8x128xf32>
    %135 = arith.divf %133, %134 : vector<8x128xf32>
    %136 = vector.extract_strided_slice %123 {offsets = [0, 256], sizes = [8, 128], strides = [1, 1]} : vector<8x512xf32> to vector<8x128xf32>
    %137 = math.tanh %136 : vector<8x128xf32>
    %138 = vector.extract_strided_slice %123 {offsets = [0, 384], sizes = [8, 128], strides = [1, 1]} : vector<8x512xf32> to vector<8x128xf32>
    %139 = arith.negf %138 : vector<8x128xf32>
    %140 = math.exp %139 : vector<8x128xf32>
    %cst_28 = arith.constant 1.000000e+00 : f32
    %141 = vector.broadcast %cst_28 : f32 to vector<8x128xf32>
    %142 = arith.addf %141, %140 : vector<8x128xf32>
    %143 = arith.divf %141, %142 : vector<8x128xf32>
    %144 = arith.mulf %135, %118 : vector<8x128xf32>
    %145 = arith.mulf %129, %137 : vector<8x128xf32>
    %146 = arith.addf %144, %145 : vector<8x128xf32>
    %147 = math.tanh %146 : vector<8x128xf32>
    %148 = arith.mulf %143, %147 : vector<8x128xf32>
    %149 = vector.extract_strided_slice %5 {offsets = [40, 0], sizes = [8, 512], strides = [1, 1]} : vector<64x512xf32> to vector<8x512xf32>
    %cst_29 = arith.constant dense<0.000000e+00> : vector<8x512xf32>
    %150 = tpu.matmul %148, %6, %cst_29 {dimension_numbers = #tpu.dot_dimension_numbers<[1], [0], [0], [1], [0, 0, 1, 1], [], []>} : vector<8x128xf32>, vector<128x512xf32>, vector<8x512xf32> -> vector<8x512xf32>
    %151 = arith.addf %149, %150 : vector<8x512xf32>
    %152 = vector.extract_strided_slice %151 {offsets = [0, 0], sizes = [8, 128], strides = [1, 1]} : vector<8x512xf32> to vector<8x128xf32>
    %153 = arith.negf %152 : vector<8x128xf32>
    %154 = math.exp %153 : vector<8x128xf32>
    %cst_30 = arith.constant 1.000000e+00 : f32
    %155 = vector.broadcast %cst_30 : f32 to vector<8x128xf32>
    %156 = arith.addf %155, %154 : vector<8x128xf32>
    %157 = arith.divf %155, %156 : vector<8x128xf32>
    %158 = vector.extract_strided_slice %151 {offsets = [0, 128], sizes = [8, 128], strides = [1, 1]} : vector<8x512xf32> to vector<8x128xf32>
    %159 = arith.negf %158 : vector<8x128xf32>
    %160 = math.exp %159 : vector<8x128xf32>
    %cst_31 = arith.constant 1.000000e+00 : f32
    %161 = vector.broadcast %cst_31 : f32 to vector<8x128xf32>
    %162 = arith.addf %161, %160 : vector<8x128xf32>
    %163 = arith.divf %161, %162 : vector<8x128xf32>
    %164 = vector.extract_strided_slice %151 {offsets = [0, 256], sizes = [8, 128], strides = [1, 1]} : vector<8x512xf32> to vector<8x128xf32>
    %165 = math.tanh %164 : vector<8x128xf32>
    %166 = vector.extract_strided_slice %151 {offsets = [0, 384], sizes = [8, 128], strides = [1, 1]} : vector<8x512xf32> to vector<8x128xf32>
    %167 = arith.negf %166 : vector<8x128xf32>
    %168 = math.exp %167 : vector<8x128xf32>
    %cst_32 = arith.constant 1.000000e+00 : f32
    %169 = vector.broadcast %cst_32 : f32 to vector<8x128xf32>
    %170 = arith.addf %169, %168 : vector<8x128xf32>
    %171 = arith.divf %169, %170 : vector<8x128xf32>
    %172 = arith.mulf %163, %146 : vector<8x128xf32>
    %173 = arith.mulf %157, %165 : vector<8x128xf32>
    %174 = arith.addf %172, %173 : vector<8x128xf32>
    %175 = math.tanh %174 : vector<8x128xf32>
    %176 = arith.mulf %171, %175 : vector<8x128xf32>
    %177 = vector.extract_strided_slice %5 {offsets = [48, 0], sizes = [8, 512], strides = [1, 1]} : vector<64x512xf32> to vector<8x512xf32>
    %cst_33 = arith.constant dense<0.000000e+00> : vector<8x512xf32>
    %178 = tpu.matmul %176, %6, %cst_33 {dimension_numbers = #tpu.dot_dimension_numbers<[1], [0], [0], [1], [0, 0, 1, 1], [], []>} : vector<8x128xf32>, vector<128x512xf32>, vector<8x512xf32> -> vector<8x512xf32>
    %179 = arith.addf %177, %178 : vector<8x512xf32>
    %180 = vector.extract_strided_slice %179 {offsets = [0, 0], sizes = [8, 128], strides = [1, 1]} : vector<8x512xf32> to vector<8x128xf32>
    %181 = arith.negf %180 : vector<8x128xf32>
    %182 = math.exp %181 : vector<8x128xf32>
    %cst_34 = arith.constant 1.000000e+00 : f32
    %183 = vector.broadcast %cst_34 : f32 to vector<8x128xf32>
    %184 = arith.addf %183, %182 : vector<8x128xf32>
    %185 = arith.divf %183, %184 : vector<8x128xf32>
    %186 = vector.extract_strided_slice %179 {offsets = [0, 128], sizes = [8, 128], strides = [1, 1]} : vector<8x512xf32> to vector<8x128xf32>
    %187 = arith.negf %186 : vector<8x128xf32>
    %188 = math.exp %187 : vector<8x128xf32>
    %cst_35 = arith.constant 1.000000e+00 : f32
    %189 = vector.broadcast %cst_35 : f32 to vector<8x128xf32>
    %190 = arith.addf %189, %188 : vector<8x128xf32>
    %191 = arith.divf %189, %190 : vector<8x128xf32>
    %192 = vector.extract_strided_slice %179 {offsets = [0, 256], sizes = [8, 128], strides = [1, 1]} : vector<8x512xf32> to vector<8x128xf32>
    %193 = math.tanh %192 : vector<8x128xf32>
    %194 = vector.extract_strided_slice %179 {offsets = [0, 384], sizes = [8, 128], strides = [1, 1]} : vector<8x512xf32> to vector<8x128xf32>
    %195 = arith.negf %194 : vector<8x128xf32>
    %196 = math.exp %195 : vector<8x128xf32>
    %cst_36 = arith.constant 1.000000e+00 : f32
    %197 = vector.broadcast %cst_36 : f32 to vector<8x128xf32>
    %198 = arith.addf %197, %196 : vector<8x128xf32>
    %199 = arith.divf %197, %198 : vector<8x128xf32>
    %200 = arith.mulf %191, %174 : vector<8x128xf32>
    %201 = arith.mulf %185, %193 : vector<8x128xf32>
    %202 = arith.addf %200, %201 : vector<8x128xf32>
    %203 = math.tanh %202 : vector<8x128xf32>
    %204 = arith.mulf %199, %203 : vector<8x128xf32>
    %205 = vector.extract_strided_slice %5 {offsets = [56, 0], sizes = [8, 512], strides = [1, 1]} : vector<64x512xf32> to vector<8x512xf32>
    %cst_37 = arith.constant dense<0.000000e+00> : vector<8x512xf32>
    %206 = tpu.matmul %204, %6, %cst_37 {dimension_numbers = #tpu.dot_dimension_numbers<[1], [0], [0], [1], [0, 0, 1, 1], [], []>} : vector<8x128xf32>, vector<128x512xf32>, vector<8x512xf32> -> vector<8x512xf32>
    %207 = arith.addf %205, %206 : vector<8x512xf32>
    %208 = vector.extract_strided_slice %207 {offsets = [0, 0], sizes = [8, 128], strides = [1, 1]} : vector<8x512xf32> to vector<8x128xf32>
    %209 = arith.negf %208 : vector<8x128xf32>
    %210 = math.exp %209 : vector<8x128xf32>
    %cst_38 = arith.constant 1.000000e+00 : f32
    %211 = vector.broadcast %cst_38 : f32 to vector<8x128xf32>
    %212 = arith.addf %211, %210 : vector<8x128xf32>
    %213 = arith.divf %211, %212 : vector<8x128xf32>
    %214 = vector.extract_strided_slice %207 {offsets = [0, 128], sizes = [8, 128], strides = [1, 1]} : vector<8x512xf32> to vector<8x128xf32>
    %215 = arith.negf %214 : vector<8x128xf32>
    %216 = math.exp %215 : vector<8x128xf32>
    %cst_39 = arith.constant 1.000000e+00 : f32
    %217 = vector.broadcast %cst_39 : f32 to vector<8x128xf32>
    %218 = arith.addf %217, %216 : vector<8x128xf32>
    %219 = arith.divf %217, %218 : vector<8x128xf32>
    %220 = vector.extract_strided_slice %207 {offsets = [0, 256], sizes = [8, 128], strides = [1, 1]} : vector<8x512xf32> to vector<8x128xf32>
    %221 = math.tanh %220 : vector<8x128xf32>
    %222 = vector.extract_strided_slice %207 {offsets = [0, 384], sizes = [8, 128], strides = [1, 1]} : vector<8x512xf32> to vector<8x128xf32>
    %223 = arith.negf %222 : vector<8x128xf32>
    %224 = math.exp %223 : vector<8x128xf32>
    %cst_40 = arith.constant 1.000000e+00 : f32
    %225 = vector.broadcast %cst_40 : f32 to vector<8x128xf32>
    %226 = arith.addf %225, %224 : vector<8x128xf32>
    %227 = arith.divf %225, %226 : vector<8x128xf32>
    %228 = arith.mulf %219, %202 : vector<8x128xf32>
    %229 = arith.mulf %213, %221 : vector<8x128xf32>
    %230 = arith.addf %228, %229 : vector<8x128xf32>
    %231 = math.tanh %230 : vector<8x128xf32>
    %232 = arith.mulf %227, %231 : vector<8x128xf32>
    %c0_41 = arith.constant 0 : index
    %c0_42 = arith.constant 0 : index
    %233 = vector.load %arg4[%c0_41, %c0_42] : memref<128x128xf32, #tpu.memory_space<vmem>>, vector<128x128xf32>
    %cst_43 = arith.constant dense<0.000000e+00> : vector<8x128xf32>
    %234 = tpu.matmul %232, %233, %cst_43 {dimension_numbers = #tpu.dot_dimension_numbers<[1], [0], [0], [1], [0, 0, 1, 1], [], []>} : vector<8x128xf32>, vector<128x128xf32>, vector<8x128xf32> -> vector<8x128xf32>
    %c0_44 = arith.constant 0 : index
    %c0_45 = arith.constant 0 : index
    %235 = vector.load %arg5[%c0_44, %c0_45] : memref<1x128xf32, #tpu.memory_space<vmem>>, vector<1x128xf32>
    %236 = vector.broadcast %235 : vector<1x128xf32> to vector<8x128xf32>
    %237 = arith.addf %234, %236 : vector<8x128xf32>
    %cst_46 = arith.constant 0.000000e+00 : f32
    %238 = vector.broadcast %cst_46 : f32 to vector<8x128xf32>
    %239 = arith.maximumf %237, %238 : vector<8x128xf32>
    %c0_47 = arith.constant 0 : index
    %c0_48 = arith.constant 0 : index
    %240 = vector.load %arg6[%c0_47, %c0_48] : memref<128x128xf32, #tpu.memory_space<vmem>>, vector<128x128xf32>
    %cst_49 = arith.constant dense<0.000000e+00> : vector<8x128xf32>
    %241 = tpu.matmul %239, %240, %cst_49 {dimension_numbers = #tpu.dot_dimension_numbers<[1], [0], [0], [1], [0, 0, 1, 1], [], []>} : vector<8x128xf32>, vector<128x128xf32>, vector<8x128xf32> -> vector<8x128xf32>
    %c0_50 = arith.constant 0 : index
    %c0_51 = arith.constant 0 : index
    %242 = vector.load %arg7[%c0_50, %c0_51] : memref<1x128xf32, #tpu.memory_space<vmem>>, vector<1x128xf32>
    %243 = vector.broadcast %242 : vector<1x128xf32> to vector<8x128xf32>
    %244 = arith.addf %241, %243 : vector<8x128xf32>
    %cst_52 = arith.constant 0.000000e+00 : f32
    %245 = vector.broadcast %cst_52 : f32 to vector<8x128xf32>
    %246 = arith.maximumf %244, %245 : vector<8x128xf32>
    %c0_53 = arith.constant 0 : index
    %c0_54 = arith.constant 0 : index
    %247 = vector.load %arg8[%c0_53, %c0_54] : memref<128x128xf32, #tpu.memory_space<vmem>>, vector<128x128xf32>
    %cst_55 = arith.constant dense<0.000000e+00> : vector<8x128xf32>
    %248 = tpu.matmul %246, %247, %cst_55 {dimension_numbers = #tpu.dot_dimension_numbers<[1], [0], [0], [1], [0, 0, 1, 1], [], []>} : vector<8x128xf32>, vector<128x128xf32>, vector<8x128xf32> -> vector<8x128xf32>
    %c0_56 = arith.constant 0 : index
    %c0_57 = arith.constant 0 : index
    %249 = vector.load %arg9[%c0_56, %c0_57] : memref<1x128xf32, #tpu.memory_space<vmem>>, vector<1x128xf32>
    %250 = vector.broadcast %249 : vector<1x128xf32> to vector<8x128xf32>
    %251 = arith.addf %248, %250 : vector<8x128xf32>
    %c0_58 = arith.constant 0 : index
    %c0_59 = arith.constant 0 : index
    %252 = vector.load %arg10[%c0_58, %c0_59] : memref<8x128xf32, #tpu.memory_space<vmem>>, vector<8x128xf32>
    tpu.vector_store %arg10[%c0_58, %c0_59], %251 {strides = array<i32>} : memref<8x128xf32, #tpu.memory_space<vmem>>, vector<8x128xf32>,
    return
  }
}

</mosaic_0001>

<bundles_post_ra>
// kernel: tpu_custom_call.1
= control target key start
LH: loop header
LB: loop body
LE: loop exit
PB: predicated region body
PF: predicated region fallthrough
CT: control target
= control target key end

     0   :  { %15 = vsyncpa [#allocation3], 0  ;;  %s3216_s0 = inlined_call_operand.hbm [shape: f32[64,128], index: 0, kind: input, shape index: {}]   ;;  %s3217_s1 = inlined_call_operand.hbm [shape: f32[128,512], index: 1, kind: input, shape index: {}]   ;;  %s3218_s2 = inlined_call_operand.hbm [shape: f32[128,512], index: 2, kind: input, shape index: {}]   ;;  %s3219_s3 = inlined_call_operand.hbm [shape: f32[1,512], index: 3, kind: input, shape index: {}]   ;;  %s3220_s4 = inlined_call_operand.hbm [shape: f32[128,128], index: 4, kind: input, shape index: {}]   ;;  %s3221_s5 = inlined_call_operand.vmem [shape: f32[1,128], index: 5, kind: input, shape index: {}]   ;;  %s3222_s6 = inlined_call_operand.hbm [shape: f32[128,128], index: 6, kind: input, shape index: {}]   ;;  %s3223_s7 = inlined_call_operand.vmem [shape: f32[1,128], index: 7, kind: input, shape index: {}]   ;;  %s3224_s8 = inlined_call_operand.hbm [shape: f32[128,128], index: 8, kind: input, shape index: {}]   ;;  %s3225_s9 = inlined_call_operand.vmem [shape: f32[1,128], index: 9, kind: input, shape index: {}]   ;;  %s3226_s10 = inlined_call_operand.hbm [shape: f32[8,128], index: 10, kind: output, shape index: {}]  }
   0x1   :  { %16 = vsyncpa [#allocation6], 0 }
   0x2   :  { %17 = vsyncpa [#allocation9], 0 }
   0x3   :  { %18 = vsyncpa [#allocation12], 0  ;;  %s37_s15 = sshll.u32 %s3217_s1, 4  ;;  %s38_s15 = int_to_ptr.hbm [resolvable:$true] %s37_s15 }
   0x4   :  { %19 = vsyncpa [#allocation4], 0  ;;  %s2206_s16 = smov [#allocation5]   ;;  %s64_s20 = sshll.u32 %s3219_s3, 4  ;;  %s65_s20 = int_to_ptr.hbm [resolvable:$true] %s64_s20 }
   0x5   :  { %s39_s17 = sshll.u32 %s2206_s16, 4  ;;  %s2207_s21 = smov 512   ;;  %s40_s17 = int_to_ptr.vmem [resolvable:$true] %s39_s17 }
   0x6   :  { %s2208_s22 = smov 32   ;;  %s2209_s23 = smov [#allocation8]  }
   0x7   :  { %45 = dma.hbm_to_vmem [thread:$0]  %s38_s15, 8192, %s40_s17, [#allocation6], %s2207_s21, %s2207_s21, %s2208_s22  }
   0x8   :  { %s66_s24 = sshll.u32 %s2209_s23, 4  ;;  %s89_s26 = sshll.u32 %s3222_s6, 4  ;;  %s67_s24 = int_to_ptr.vmem [resolvable:$true] %s66_s24  ;;  %s90_s26 = int_to_ptr.hbm [resolvable:$true] %s89_s26 }
   0x9   :  { %69 = dma.hbm_to_vmem [thread:$0]  %s65_s20, 64, %s67_s24, [#allocation9]  }
   0xa   :  { %s2210_s27 = smov [#allocation11]   ;;  %s24_s30 = sshll.u32 %s3216_s0, 4  ;;  %s25_s30 = int_to_ptr.hbm [resolvable:$true] %s24_s30 }
   0xb   :  { %s91_s28 = sshll.u32 %s2210_s27, 4  ;;  %s2211_s11 = smov 128   ;;  %s92_s28 = int_to_ptr.vmem [resolvable:$true] %s91_s28 }
   0xc   :  { %s2212_s12 = smov 8   ;;  %s2213_s13 = smov [#allocation2]  }
   0xd   :  { %97 = dma.hbm_to_vmem [thread:$0]  %s90_s26, 2048, %s92_s28, [#allocation12], %s2211_s11, %s2211_s11, %s2212_s12  }
   0xe   :  { %s26_s14 = sshll.u32 %s2213_s13, 4  ;;  %s50_s17 = sshll.u32 %s3218_s2, 4  ;;  %s27_s14 = int_to_ptr.vmem [resolvable:$true] %s26_s14  ;;  %s51_s17 = int_to_ptr.hbm [resolvable:$true] %s50_s17 }
   0xf   :  { %32 = dma.hbm_to_vmem [thread:$0]  %s25_s30, 1024, %s27_s14, [#allocation3], %s2211_s11, %s2211_s11, %s2212_s12  }
  0x10   :  { %s74_s19 = sshll.u32 %s3220_s4, 4  ;;  %s2214_s20 = smov [#allocation7]   ;;  %s75_s19 = int_to_ptr.hbm [resolvable:$true] %s74_s19 }
  0x11   :  { %s52_s23 = sshll.u32 %s2214_s20, 4  ;;  %s2215_s0 = smov [#allocation10]   ;;  %s53_s23 = int_to_ptr.vmem [resolvable:$true] %s52_s23 }
  0x12   :  { %58 = dma.hbm_to_vmem [thread:$0]  %s51_s17, 8192, %s53_s23, [#allocation6], %s2207_s21, %s2207_s21, %s2208_s22  }
  0x13   :  { %s76_s24 = sshll.u32 %s2215_s0, 4  ;;  %s104_s2 = sshll.u32 %s3224_s8, 4  ;;  %s77_s24 = int_to_ptr.vmem [resolvable:$true] %s76_s24  ;;  %s105_s2 = int_to_ptr.hbm [resolvable:$true] %s104_s2 }
  0x14   :  { %82 = dma.hbm_to_vmem [thread:$0]  %s75_s19, 2048, %s77_s24, [#allocation9], %s2211_s11, %s2211_s11, %s2212_s12  }
  0x15   :  { %s2216_s26 = smov [#allocation13]  }
  0x16   :  { %s106_s27 = sshll.u32 %s2216_s26, 4  ;;  %s107_s27 = int_to_ptr.vmem [resolvable:$true] %s106_s27 }
  0x17   :  { %112 = dma.hbm_to_vmem [thread:$0]  %s105_s2, 2048, %s107_s27, [#allocation12], %s2211_s11, %s2211_s11, %s2212_s12  }
  0x18   :  { %2196 = dma.done.wait [#allocation3], 1024  }
  0x19   :  { %2197 = vsyncadd [#allocation3], 4294966272 }
  0x1a   :  { %2198 = dma.done.wait [#allocation6], 16384  }
  0x1b   :  { %2199 = vsyncadd [#allocation6], 4294950912 }
  0x1c   :  { %2200 = dma.done.wait [#allocation9], 2112  }
  0x1d   :  { %2201 = vsyncadd [#allocation9], 4294965184 }
  0x1e   :  { %2202 = dma.done.wait [#allocation12], 4096  }
  0x1f   :  { %2203 = vsyncadd [#allocation12], 4294963200  ;;  %v211_v0 = vld [vmem:[#allocation5 + $0x1e0] sm:$0xff]  ;;  %v212_v1 = vld [vmem:[#allocation5 + $0x1e8] sm:$0xff]  ;;  %s2218_s3 = smov [#allocation14]   ;;  %s1759_s12 = sshll.u32 %s3226_s10, 4  ;;  %s1760_s12 = int_to_ptr.hbm [resolvable:$true] %s1759_s12 }
  0x20   :  { %v213_v2 = vld [vmem:[#allocation5 + $0x1f0] sm:$0xff]  ;;  %225 = vmatpush.msra.mxu0 %v211_v0  ;;  %266 = vmatpush.msra.mxu1 %v212_v1  ;;  %v214_v3 = vld [vmem:[#allocation5 + $0x1f8] sm:$0xff]  ;;  %v207_v4 = vld [vmem:[#allocation5 + $0x1c0] sm:$0xff]  ;;  %s1757_s29 = sshll.u32 %s2218_s3, 4  ;;  %s1758_s29 = int_to_ptr.vmem [resolvable:$true] %s1757_s29 }
  0x21   :  { %v208_v5 = vld [vmem:[#allocation5 + $0x1c8] sm:$0xff]  ;;  %307 = vmatpush.msra.mxu2 %v213_v2  ;;  %348 = vmatpush.msra.mxu3 %v214_v3  ;;  %v209_v6 = vld [vmem:[#allocation5 + $0x1d0] sm:$0xff]  ;;  %v210_v7 = vld [vmem:[#allocation5 + $0x1d8] sm:$0xff] }
  0x22   :  { %v203_v8 = vld [vmem:[#allocation5 + $0x1a0] sm:$0xff]  ;;  %226 = vmatpush.msra.mxu0 %v207_v4  ;;  %267 = vmatpush.msra.mxu1 %v208_v5  ;;  %v204_v9 = vld [vmem:[#allocation5 + $0x1a8] sm:$0xff]  ;;  %v205_v10 = vld [vmem:[#allocation5 + $0x1b0] sm:$0xff] }
  0x23   :  { %v206_v11 = vld [vmem:[#allocation5 + $0x1b8] sm:$0xff]  ;;  %308 = vmatpush.msra.mxu2 %v209_v6  ;;  %349 = vmatpush.msra.mxu3 %v210_v7  ;;  %v199_v12 = vld [vmem:[#allocation5 + $0x180] sm:$0xff]  ;;  %v200_v13 = vld [vmem:[#allocation5 + $0x188] sm:$0xff] }
  0x24   :  { %227 = vmatpush.msra.mxu0 %v203_v8  ;;  %268 = vmatpush.msra.mxu1 %v204_v9  ;;  %v201_v14 = vld [vmem:[#allocation5 + $0x190] sm:$0xff]  ;;  %v202_v15 = vld [vmem:[#allocation5 + $0x198] sm:$0xff]  ;;  %v195_v16 = vld [vmem:[#allocation5 + $0x160] sm:$0xff] }
  0x25   :  { %309 = vmatpush.msra.mxu2 %v205_v10  ;;  %350 = vmatpush.msra.mxu3 %v206_v11  ;;  %v196_v17 = vld [vmem:[#allocation5 + $0x168] sm:$0xff]  ;;  %v197_v18 = vld [vmem:[#allocation5 + $0x170] sm:$0xff]  ;;  %v198_v19 = vld [vmem:[#allocation5 + $0x178] sm:$0xff] }
  0x26   :  { %228 = vmatpush.msra.mxu0 %v199_v12  ;;  %269 = vmatpush.msra.mxu1 %v200_v13  ;;  %v191_v20 = vld [vmem:[#allocation5 + $0x140] sm:$0xff]  ;;  %v192_v21 = vld [vmem:[#allocation5 + $0x148] sm:$0xff]  ;;  %v193_v22 = vld [vmem:[#allocation5 + $0x150] sm:$0xff] }
  0x27   :  { %310 = vmatpush.msra.mxu2 %v201_v14  ;;  %351 = vmatpush.msra.mxu3 %v202_v15  ;;  %v194_v23 = vld [vmem:[#allocation5 + $0x158] sm:$0xff]  ;;  %v187_v24 = vld [vmem:[#allocation5 + $0x120] sm:$0xff]  ;;  %v188_v25 = vld [vmem:[#allocation5 + $0x128] sm:$0xff] }
  0x28   :  { %229 = vmatpush.msra.mxu0 %v195_v16  ;;  %270 = vmatpush.msra.mxu1 %v196_v17  ;;  %v189_v26 = vld [vmem:[#allocation5 + $0x130] sm:$0xff]  ;;  %v190_v27 = vld [vmem:[#allocation5 + $0x138] sm:$0xff]  ;;  %v183_v28 = vld [vmem:[#allocation5 + $0x100] sm:$0xff] }
  0x29   :  { %311 = vmatpush.msra.mxu2 %v197_v18  ;;  %352 = vmatpush.msra.mxu3 %v198_v19  ;;  %v184_v29 = vld [vmem:[#allocation5 + $0x108] sm:$0xff]  ;;  %v185_v30 = vld [vmem:[#allocation5 + $0x110] sm:$0xff]  ;;  %v186_v31 = vld [vmem:[#allocation5 + $0x118] sm:$0xff] }
  0x2a   :  { %230 = vmatpush.msra.mxu0 %v191_v20  ;;  %271 = vmatpush.msra.mxu1 %v192_v21  ;;  %v179_v32 = vld [vmem:[#allocation5 + $0xe0] sm:$0xff]  ;;  %v180_v33 = vld [vmem:[#allocation5 + $0xe8] sm:$0xff]  ;;  %v181_v34 = vld [vmem:[#allocation5 + $0xf0] sm:$0xff] }
  0x2b   :  { %312 = vmatpush.msra.mxu2 %v193_v22  ;;  %353 = vmatpush.msra.mxu3 %v194_v23  ;;  %v182_v35 = vld [vmem:[#allocation5 + $0xf8] sm:$0xff]  ;;  %v175_v36 = vld [vmem:[#allocation5 + $0xc0] sm:$0xff]  ;;  %v176_v37 = vld [vmem:[#allocation5 + $0xc8] sm:$0xff] }
  0x2c   :  { %231 = vmatpush.msra.mxu0 %v187_v24  ;;  %272 = vmatpush.msra.mxu1 %v188_v25  ;;  %v177_v38 = vld [vmem:[#allocation5 + $0xd0] sm:$0xff]  ;;  %v178_v39 = vld [vmem:[#allocation5 + $0xd8] sm:$0xff]  ;;  %v171_v40 = vld [vmem:[#allocation5 + $0xa0] sm:$0xff] }
  0x2d   :  { %313 = vmatpush.msra.mxu2 %v189_v26  ;;  %354 = vmatpush.msra.mxu3 %v190_v27  ;;  %v172_v41 = vld [vmem:[#allocation5 + $0xa8] sm:$0xff]  ;;  %v173_v42 = vld [vmem:[#allocation5 + $0xb0] sm:$0xff]  ;;  %v174_v43 = vld [vmem:[#allocation5 + $0xb8] sm:$0xff] }
  0x2e   :  { %232 = vmatpush.msra.mxu0 %v183_v28  ;;  %273 = vmatpush.msra.mxu1 %v184_v29  ;;  %v167_v44 = vld [vmem:[#allocation5 + $0x80] sm:$0xff]  ;;  %v168_v45 = vld [vmem:[#allocation5 + $0x88] sm:$0xff]  ;;  %v169_v46 = vld [vmem:[#allocation5 + $0x90] sm:$0xff] }
  0x2f   :  { %314 = vmatpush.msra.mxu2 %v185_v30  ;;  %355 = vmatpush.msra.mxu3 %v186_v31  ;;  %v170_v47 = vld [vmem:[#allocation5 + $0x98] sm:$0xff]  ;;  %v163_v48 = vld [vmem:[#allocation5 + $0x60] sm:$0xff]  ;;  %v164_v49 = vld [vmem:[#allocation5 + $0x68] sm:$0xff] }
  0x30   :  { %233 = vmatpush.msra.mxu0 %v179_v32  ;;  %274 = vmatpush.msra.mxu1 %v180_v33  ;;  %v165_v50 = vld [vmem:[#allocation5 + $0x70] sm:$0xff]  ;;  %v166_v51 = vld [vmem:[#allocation5 + $0x78] sm:$0xff]  ;;  %v159_v52 = vld [vmem:[#allocation5 + $0x40] sm:$0xff] }
  0x31   :  { %315 = vmatpush.msra.mxu2 %v181_v34  ;;  %356 = vmatpush.msra.mxu3 %v182_v35  ;;  %v160_v53 = vld [vmem:[#allocation5 + $0x48] sm:$0xff]  ;;  %v161_v54 = vld [vmem:[#allocation5 + $0x50] sm:$0xff]  ;;  %v162_v55 = vld [vmem:[#allocation5 + $0x58] sm:$0xff] }
  0x32   :  { %234 = vmatpush.msra.mxu0 %v175_v36  ;;  %275 = vmatpush.msra.mxu1 %v176_v37  ;;  %v155_v56 = vld [vmem:[#allocation5 + $0x20] sm:$0xff]  ;;  %v156_v57 = vld [vmem:[#allocation5 + $0x28] sm:$0xff]  ;;  %v157_v58 = vld [vmem:[#allocation5 + $0x30] sm:$0xff] }
  0x33   :  { %316 = vmatpush.msra.mxu2 %v177_v38  ;;  %357 = vmatpush.msra.mxu3 %v178_v39  ;;  %v158_v59 = vld [vmem:[#allocation5 + $0x38] sm:$0xff]  ;;  %v151_v60 = vld [vmem:[#allocation5] sm:$0xff]  ;;  %v152_v61 = vld [vmem:[#allocation5 + $0x8] sm:$0xff] }
  0x34   :  { %235 = vmatpush.msra.mxu0 %v171_v40  ;;  %276 = vmatpush.msra.mxu1 %v172_v41  ;;  %v153_v62 = vld [vmem:[#allocation5 + $0x10] sm:$0xff]  ;;  %v154_v63 = vld [vmem:[#allocation5 + $0x18] sm:$0xff]  ;;  %v143_v0 = vld [vmem:[#allocation2] sm:$0xff] }
  0x35   :  { %317 = vmatpush.msra.mxu2 %v173_v42  ;;  %358 = vmatpush.msra.mxu3 %v174_v43  ;;  %v2301_v1 = vld [vmem:[#allocation7 + $0x1e0] sm:$0xff]  ;;  %v2303_v2 = vld [vmem:[#allocation7 + $0x1e8] sm:$0xff]  ;;  %v2305_v3 = vld [vmem:[#allocation7 + $0x1f8] sm:$0xff] }
  0x36   :  { %236 = vmatpush.msra.mxu0 %v167_v44  ;;  %277 = vmatpush.msra.mxu1 %v168_v45  ;;  %v2307_v4 = vld [vmem:[#allocation7 + $0x1f0] sm:$0xff]  ;;  %v2309_v5 = vld [vmem:[#allocation7 + $0x1c0] sm:$0xff]  ;;  %v2311_v6 = vld [vmem:[#allocation7 + $0x1c8] sm:$0xff] }
  0x37   :  { %318 = vmatpush.msra.mxu2 %v169_v46  ;;  %359 = vmatpush.msra.mxu3 %v170_v47  ;;  %v2315_v7 = vld [vmem:[#allocation7 + $0x1d8] sm:$0xff]  ;;  %v2317_v8 = vld [vmem:[#allocation7 + $0x1d0] sm:$0xff]  ;;  %v2320_v9 = vld [vmem:[#allocation7 + $0x1a0] sm:$0xff] }
  0x38   :  { %237 = vmatpush.msra.mxu0 %v163_v48  ;;  %278 = vmatpush.msra.mxu1 %v164_v49  ;;  %v2322_v10 = vld [vmem:[#allocation7 + $0x1a8] sm:$0xff]  ;;  %v2327_v11 = vld [vmem:[#allocation7 + $0x1b8] sm:$0xff]  ;;  %v2329_v12 = vld [vmem:[#allocation7 + $0x1b0] sm:$0xff] }
  0x39   :  { %319 = vmatpush.msra.mxu2 %v165_v50  ;;  %360 = vmatpush.msra.mxu3 %v166_v51  ;;  %v144_v13 = vld [vmem:[#allocation2 + $0x8] sm:$0xff]  ;;  %v2335_v14 = vld [vmem:[#allocation7 + $0x180] sm:$0xff]  ;;  %v2341_v16 = vld [vmem:[#allocation7 + $0x198] sm:$0xff] }
  0x3a   :  { %238 = vmatpush.msra.mxu0 %v159_v52  ;;  %279 = vmatpush.msra.mxu1 %v160_v53  ;;  %v2337_v15 = vld [vmem:[#allocation7 + $0x188] sm:$0xff]  ;;  %v2343_v17 = vld [vmem:[#allocation7 + $0x190] sm:$0xff]  ;;  %v2345_v18 = vld [vmem:[#allocation7 + $0x160] sm:$0xff] }
  0x3b   :  { %320 = vmatpush.msra.mxu2 %v161_v54  ;;  %361 = vmatpush.msra.mxu3 %v162_v55  ;;  %v2347_v19 = vld [vmem:[#allocation7 + $0x168] sm:$0xff]  ;;  %v2351_v20 = vld [vmem:[#allocation7 + $0x178] sm:$0xff]  ;;  %v2353_v21 = vld [vmem:[#allocation7 + $0x170] sm:$0xff] }
  0x3c   :  { %239 = vmatpush.msra.mxu0 %v155_v56  ;;  %280 = vmatpush.msra.mxu1 %v156_v57  ;;  %v2356_v22 = vld [vmem:[#allocation7 + $0x140] sm:$0xff]  ;;  %v2358_v23 = vld [vmem:[#allocation7 + $0x148] sm:$0xff]  ;;  %v2363_v24 = vld [vmem:[#allocation7 + $0x158] sm:$0xff] }
  0x3d   :  { %321 = vmatpush.msra.mxu2 %v157_v58  ;;  %362 = vmatpush.msra.mxu3 %v158_v59  ;;  %v2365_v25 = vld [vmem:[#allocation7 + $0x150] sm:$0xff]  ;;  %v2371_v27 = vld [vmem:[#allocation7 + $0x120] sm:$0xff]  ;;  %v2373_v28 = vld [vmem:[#allocation7 + $0x128] sm:$0xff] }
  0x3e   :  { %240 = vmatpush.msra.mxu0 %v151_v60  ;;  %281 = vmatpush.msra.mxu1 %v152_v61  ;;  %v145_v26 = vld [vmem:[#allocation2 + $0x10] sm:$0xff]  ;;  %v2377_v29 = vld [vmem:[#allocation7 + $0x138] sm:$0xff]  ;;  %v2381_v31 = vld [vmem:[#allocation7 + $0x100] sm:$0xff] }
  0x3f   :  { %322 = vmatpush.msra.mxu2 %v153_v62  ;;  %363 = vmatpush.msra.mxu3 %v154_v63  ;;  %v2379_v30 = vld [vmem:[#allocation7 + $0x130] sm:$0xff]  ;;  %v2383_v32 = vld [vmem:[#allocation7 + $0x108] sm:$0xff]  ;;  %v2387_v33 = vld [vmem:[#allocation7 + $0x118] sm:$0xff] }
  0x40   :  { %241 = vmatmul.f32.vlgmr.msra.gmra.mxu0 %v143_v0  ;;  %282 = vmatmul.f32.vlgmr.msra.gmra.mxu1 %v143_v0  ;;  %v2389_v34 = vld [vmem:[#allocation7 + $0x110] sm:$0xff]  ;;  %v2392_v35 = vld [vmem:[#allocation7 + $0xe0] sm:$0xff]  ;;  %v2394_v36 = vld [vmem:[#allocation7 + $0xe8] sm:$0xff] }
  0x41   :  { %323 = vmatmul.f32.vlgmr.msra.gmra.mxu2 %v143_v0  ;;  %364 = vmatmul.f32.vlgmr.msra.gmra.mxu3 %v143_v0  ;;  %v2399_v37 = vld [vmem:[#allocation7 + $0xf8] sm:$0xff]  ;;  %v2401_v38 = vld [vmem:[#allocation7 + $0xf0] sm:$0xff]  ;;  %v2407_v40 = vld [vmem:[#allocation7 + $0xc0] sm:$0xff] }
  0x42   :  { %453 = vmatpush.msrb.mxu0 %v2301_v1  ;;  %473 = vmatpush.msrb.mxu1 %v2303_v2  ;;  %v146_v39 = vld [vmem:[#allocation2 + $0x18] sm:$0xff]  ;;  %v2409_v41 = vld [vmem:[#allocation7 + $0xc8] sm:$0xff]  ;;  %v2415_v43 = vld [vmem:[#allocation7 + $0xd0] sm:$0xff] }
  0x43   :  { %513 = vmatpush.msrb.mxu3 %v2305_v3  ;;  %493 = vmatpush.msrb.mxu2 %v2307_v4  ;;  %v2413_v42 = vld [vmem:[#allocation7 + $0xd8] sm:$0xff]  ;;  %3315 = vst [vmem:[#allocation21_spill] sm:$0xff] %v2415_v43  ;;  %v2417_v44 = vld [vmem:[#allocation7 + $0xa0] sm:$0xff]  ;;  %v2419_v45 = vld [vmem:[#allocation7 + $0xa8] sm:$0xff] }
  0x44   :  { %454 = vmatpush.msrb.mxu0 %v2309_v5  ;;  %474 = vmatpush.msrb.mxu1 %v2311_v6  ;;  %3314 = vst [vmem:[#allocation20_spill] sm:$0xff] %v2413_v42  ;;  %v2423_v46 = vld [vmem:[#allocation7 + $0xb8] sm:$0xff]  ;;  %v2425_v47 = vld [vmem:[#allocation7 + $0xb0] sm:$0xff]  ;;  %v2428_v48 = vld [vmem:[#allocation7 + $0x80] sm:$0xff] }
  0x45   :  { %514 = vmatpush.msrb.mxu3 %v2315_v7  ;;  %494 = vmatpush.msrb.mxu2 %v2317_v8  ;;  %3316 = vst [vmem:[#allocation22_spill] sm:$0xff] %v2417_v44  ;;  %v2430_v49 = vld [vmem:[#allocation7 + $0x88] sm:$0xff]  ;;  %v2435_v50 = vld [vmem:[#allocation7 + $0x98] sm:$0xff]  ;;  %v2437_v51 = vld [vmem:[#allocation7 + $0x90] sm:$0xff] }
  0x46   :  { %455 = vmatpush.msrb.mxu0 %v2320_v9  ;;  %475 = vmatpush.msrb.mxu1 %v2322_v10  ;;  %3317 = vst [vmem:[#allocation23_spill] sm:$0xff] %v2419_v45  ;;  %v147_v52 = vld [vmem:[#allocation2 + $0x20] sm:$0xff]  ;;  %v2445_v54 = vld [vmem:[#allocation7 + $0x68] sm:$0xff]  ;;  %v2449_v55 = vld [vmem:[#allocation7 + $0x78] sm:$0xff] }
  0x47   :  { %515 = vmatpush.msrb.mxu3 %v2327_v11  ;;  %495 = vmatpush.msrb.mxu2 %v2329_v12  ;;  %3318 = vst [vmem:[#allocation24_spill] sm:$0xff] %v2423_v46  ;;  %v2443_v53 = vld [vmem:[#allocation7 + $0x60] sm:$0xff]  ;;  %v2451_v56 = vld [vmem:[#allocation7 + $0x70] sm:$0xff]  ;;  %v2455_v58 = vld [vmem:[#allocation7 + $0x48] sm:$0xff] }
  0x48   :  { %244 = vmatmul.f32.gmra.mxu0 %v144_v13  ;;  %285 = vmatmul.f32.gmra.mxu1 %v144_v13  ;;  %3319 = vst [vmem:[#allocation25_spill] sm:$0xff] %v2425_v47  ;;  %v2453_v57 = vld [vmem:[#allocation7 + $0x40] sm:$0xff]  ;;  %v2459_v59 = vld [vmem:[#allocation7 + $0x58] sm:$0xff]  ;;  %v2461_v60 = vld [vmem:[#allocation7 + $0x50] sm:$0xff] }
  0x49   :  { %326 = vmatmul.f32.gmra.mxu2 %v144_v13  ;;  %367 = vmatmul.f32.gmra.mxu3 %v144_v13  ;;  %3320 = vst [vmem:[#allocation26_spill] sm:$0xff] %v2428_v48  ;;  %v2464_v61 = vld [vmem:[#allocation7 + $0x20] sm:$0xff]  ;;  %v2466_v62 = vld [vmem:[#allocation7 + $0x28] sm:$0xff]  ;;  %v2471_v63 = vld [vmem:[#allocation7 + $0x30] sm:$0xff] }
  0x4a   :  { %456 = vmatpush.msrb.mxu0 %v2335_v14  ;;  %476 = vmatpush.msrb.mxu1 %v2337_v15  ;;  %3321 = vst [vmem:[#allocation27_spill] sm:$0xff] %v2430_v49  ;;  %v2473_v0 = vld [vmem:[#allocation7 + $0x38] sm:$0xff]  ;;  %v148_v13 = vld [vmem:[#allocation2 + $0x28] sm:$0xff] }
  0x4b   :  { %516 = vmatpush.msrb.mxu3 %v2341_v16  ;;  %496 = vmatpush.msrb.mxu2 %v2343_v17  ;;  %3322 = vst [vmem:[#allocation28_spill] sm:$0xff] %v2435_v50 }
  0x4c   :  { %457 = vmatpush.msrb.mxu0 %v2345_v18  ;;  %477 = vmatpush.msrb.mxu1 %v2347_v19  ;;  %3323 = vst [vmem:[#allocation29_spill] sm:$0xff] %v2437_v51 }
  0x4d   :  { %517 = vmatpush.msrb.mxu3 %v2351_v20  ;;  %497 = vmatpush.msrb.mxu2 %v2353_v21  ;;  %3324 = vst [vmem:[#allocation30_spill] sm:$0xff] %v2443_v53 }
  0x4e   :  { %458 = vmatpush.msrb.mxu0 %v2356_v22  ;;  %478 = vmatpush.msrb.mxu1 %v2358_v23  ;;  %3325 = vst [vmem:[#allocation31_spill] sm:$0xff] %v2445_v54 }
  0x4f   :  { %518 = vmatpush.msrb.mxu3 %v2363_v24  ;;  %498 = vmatpush.msrb.mxu2 %v2365_v25  ;;  %3326 = vst [vmem:[#allocation32_spill] sm:$0xff] %v2449_v55 }
  0x50   :  { %247 = vmatmul.f32.gmra.mxu0 %v145_v26  ;;  %288 = vmatmul.f32.gmra.mxu1 %v145_v26  ;;  %3327 = vst [vmem:[#allocation33_spill] sm:$0xff] %v2451_v56 }
  0x51   :  { %329 = vmatmul.f32.gmra.mxu2 %v145_v26  ;;  %370 = vmatmul.f32.gmra.mxu3 %v145_v26  ;;  %3328 = vst [vmem:[#allocation34_spill] sm:$0xff] %v2453_v57  ;;  %v2479_v26 = vld [vmem:[#allocation7] sm:$0xff] }
  0x52   :  { %459 = vmatpush.msrb.mxu0 %v2371_v27  ;;  %479 = vmatpush.msrb.mxu1 %v2373_v28  ;;  %3329 = vst [vmem:[#allocation35_spill] sm:$0xff] %v2455_v58 }
  0x53   :  { %519 = vmatpush.msrb.mxu3 %v2377_v29  ;;  %499 = vmatpush.msrb.mxu2 %v2379_v30  ;;  %3330 = vst [vmem:[#allocation36_spill] sm:$0xff] %v2459_v59 }
  0x54   :  { %460 = vmatpush.msrb.mxu0 %v2381_v31  ;;  %480 = vmatpush.msrb.mxu1 %v2383_v32  ;;  %3331 = vst [vmem:[#allocation37_spill] sm:$0xff] %v2461_v60 }
  0x55   :  { %520 = vmatpush.msrb.mxu3 %v2387_v33  ;;  %500 = vmatpush.msrb.mxu2 %v2389_v34  ;;  %3332 = vst [vmem:[#allocation38_spill] sm:$0xff] %v2464_v61 }
  0x56   :  { %461 = vmatpush.msrb.mxu0 %v2392_v35  ;;  %481 = vmatpush.msrb.mxu1 %v2394_v36  ;;  %3333 = vst [vmem:[#allocation39_spill] sm:$0xff] %v2466_v62 }
  0x57   :  { %521 = vmatpush.msrb.mxu3 %v2399_v37  ;;  %501 = vmatpush.msrb.mxu2 %v2401_v38  ;;  %3334 = vst [vmem:[#allocation40_spill] sm:$0xff] %v2471_v63 }
  0x58   :  { %250 = vmatmul.f32.gmra.mxu0 %v146_v39  ;;  %291 = vmatmul.f32.gmra.mxu1 %v146_v39  ;;  %3335 = vst [vmem:[#allocation41_spill] sm:$0xff] %v2473_v0 }
  0x59   :  { %332 = vmatmul.f32.gmra.mxu2 %v146_v39  ;;  %373 = vmatmul.f32.gmra.mxu3 %v146_v39  ;;  %3336 = vst [vmem:[#allocation42_spill] sm:$0xff] %v2479_v26  ;;  %v2481_v39 = vld [vmem:[#allocation7 + $0x8] sm:$0xff] }
  0x5a   :  { %462 = vmatpush.msrb.mxu0 %v2407_v40  ;;  %482 = vmatpush.msrb.mxu1 %v2409_v41  ;;  %3337 = vst [vmem:[#allocation43_spill] sm:$0xff] %v2481_v39 }
  0x5b   :  { %522 = vmatpush.msrb.mxu3 %v2413_v42  ;;  %502 = vmatpush.msrb.mxu2 %v2415_v43 }
  0x5c   :  { %463 = vmatpush.msrb.mxu0 %v2417_v44  ;;  %483 = vmatpush.msrb.mxu1 %v2419_v45 }
  0x5d   :  { %523 = vmatpush.msrb.mxu3 %v2423_v46  ;;  %503 = vmatpush.msrb.mxu2 %v2425_v47 }
  0x5e   :  { %464 = vmatpush.msrb.mxu0 %v2428_v48  ;;  %484 = vmatpush.msrb.mxu1 %v2430_v49 }
  0x5f   :  { %524 = vmatpush.msrb.mxu3 %v2435_v50  ;;  %504 = vmatpush.msrb.mxu2 %v2437_v51 }
  0x60   :  { %253 = vmatmul.f32.gmra.mxu0 %v147_v52  ;;  %294 = vmatmul.f32.gmra.mxu1 %v147_v52 }
  0x61   :  { %335 = vmatmul.f32.gmra.mxu2 %v147_v52  ;;  %376 = vmatmul.f32.gmra.mxu3 %v147_v52  ;;  %v2485_v52 = vld [vmem:[#allocation7 + $0x10] sm:$0xff] }
  0x62   :  { %465 = vmatpush.msrb.mxu0 %v2443_v53  ;;  %485 = vmatpush.msrb.mxu1 %v2445_v54  ;;  %3338 = vst [vmem:[#allocation44_spill] sm:$0xff] %v2485_v52 }
  0x63   :  { %525 = vmatpush.msrb.mxu3 %v2449_v55  ;;  %505 = vmatpush.msrb.mxu2 %v2451_v56 }
  0x64   :  { %466 = vmatpush.msrb.mxu0 %v2453_v57  ;;  %486 = vmatpush.msrb.mxu1 %v2455_v58  ;;  %v2487_v58 = vld [vmem:[#allocation7 + $0x18] sm:$0xff] }
  0x65   :  { %526 = vmatpush.msrb.mxu3 %v2459_v59  ;;  %506 = vmatpush.msrb.mxu2 %v2461_v60  ;;  %3339 = vst [vmem:[#allocation45_spill] sm:$0xff] %v2487_v58 }
  0x66   :  { %467 = vmatpush.msrb.mxu0 %v2464_v61  ;;  %487 = vmatpush.msrb.mxu1 %v2466_v62 }
  0x67   :  { %507 = vmatpush.msrb.mxu2 %v2471_v63  ;;  %527 = vmatpush.msrb.mxu3 %v2473_v0  ;;  %v149_v0 = vld [vmem:[#allocation2 + $0x30] sm:$0xff] }
  0x68   :  { %256 = vmatmul.f32.gmra.mxu0 %v148_v13  ;;  %297 = vmatmul.f32.gmra.mxu1 %v148_v13 }
  0x69   :  { %338 = vmatmul.f32.gmra.mxu2 %v148_v13  ;;  %379 = vmatmul.f32.gmra.mxu3 %v148_v13  ;;  %v150_v13 = vld [vmem:[#allocation2 + $0x38] sm:$0xff] }
  0x6a   :  { %468 = vmatpush.msrb.mxu0 %v2479_v26  ;;  %488 = vmatpush.msrb.mxu1 %v2481_v39 }
  0x6b   :  { %508 = vmatpush.msrb.mxu2 %v2485_v52  ;;  %528 = vmatpush.msrb.mxu3 %v2487_v58 }
  0x6c   :  { %600 = vmatpush.msra.mxu0 %v2301_v1  ;;  %620 = vmatpush.msra.mxu1 %v2303_v2 }
  0x6d   :  { %640 = vmatpush.msra.mxu2 %v2307_v4  ;;  %660 = vmatpush.msra.mxu3 %v2305_v3 }
  0x6e   :  { %601 = vmatpush.msra.mxu0 %v2309_v5  ;;  %621 = vmatpush.msra.mxu1 %v2311_v6 }
  0x6f   :  { %641 = vmatpush.msra.mxu2 %v2317_v8  ;;  %661 = vmatpush.msra.mxu3 %v2315_v7 }
  0x70   :  { %259 = vmatmul.f32.gmra.mxu0 %v149_v0  ;;  %300 = vmatmul.f32.gmra.mxu1 %v149_v0 }
  0x71   :  { %341 = vmatmul.f32.gmra.mxu2 %v149_v0  ;;  %382 = vmatmul.f32.gmra.mxu3 %v149_v0  ;;  %v2217_v0 = vmov 0.0  }
  0x72   :  { %602 = vmatpush.msra.mxu0 %v2320_v9  ;;  %622 = vmatpush.msra.mxu1 %v2322_v10 }
  0x73   :  { %642 = vmatpush.msra.mxu2 %v2329_v12  ;;  %662 = vmatpush.msra.mxu3 %v2327_v11 }
  0x74   :  { %603 = vmatpush.msra.mxu0 %v2335_v14  ;;  %623 = vmatpush.msra.mxu1 %v2337_v15 }
  0x75   :  { %643 = vmatpush.msra.mxu2 %v2343_v17  ;;  %663 = vmatpush.msra.mxu3 %v2341_v16 }
  0x76   :  { %604 = vmatpush.msra.mxu0 %v2345_v18  ;;  %624 = vmatpush.msra.mxu1 %v2347_v19 }
  0x77   :  { %644 = vmatpush.msra.mxu2 %v2353_v21  ;;  %664 = vmatpush.msra.mxu3 %v2351_v20 }
  0x78   :  { %262 = vmatmul.f32.gmra.mxu0 %v150_v13  ;;  %303 = vmatmul.f32.gmra.mxu1 %v150_v13 }
  0x79   :  { %344 = vmatmul.f32.gmra.mxu2 %v150_v13  ;;  %385 = vmatmul.f32.gmra.mxu3 %v150_v13  ;;  %v3340_v13 = vld [vmem:[#allocation35_spill] sm:$0xff] }
  0x7a   :  { %605 = vmatpush.msra.mxu0 %v2356_v22  ;;  %625 = vmatpush.msra.mxu1 %v2358_v23 }
  0x7b   :  { %645 = vmatpush.msra.mxu2 %v2365_v25  ;;  %665 = vmatpush.msra.mxu3 %v2363_v24 }
  0x7c   :  { %606 = vmatpush.msra.mxu0 %v2371_v27  ;;  %626 = vmatpush.msra.mxu1 %v2373_v28 }
  0x7d   :  { %646 = vmatpush.msra.mxu2 %v2379_v30  ;;  %666 = vmatpush.msra.mxu3 %v2377_v29 }
  0x7e   :  { %607 = vmatpush.msra.mxu0 %v2381_v31  ;;  %627 = vmatpush.msra.mxu1 %v2383_v32 }
  0x7f   :  { %647 = vmatpush.msra.mxu2 %v2389_v34  ;;  %667 = vmatpush.msra.mxu3 %v2387_v33 }
  0x80   :  { %469 = vmatmul.f32.vlgmr.msrb.gmra.mxu0 %v2217_v0  ;;  %489 = vmatmul.f32.vlgmr.msrb.gmra.mxu1 %v2217_v0 }
  0x81   :  { %509 = vmatmul.f32.vlgmr.msrb.gmra.mxu2 %v2217_v0  ;;  %529 = vmatmul.f32.vlgmr.msrb.gmra.mxu3 %v2217_v0  ;;  %v3341_v0 = vld [vmem:[#allocation41_spill] sm:$0xff] }
  0x82   :  { %608 = vmatpush.msra.mxu0 %v2392_v35  ;;  %628 = vmatpush.msra.mxu1 %v2394_v36 }
  0x83   :  { %648 = vmatpush.msra.mxu2 %v2401_v38  ;;  %668 = vmatpush.msra.mxu3 %v2399_v37 }
  0x84   :  { %609 = vmatpush.msra.mxu0 %v2407_v40  ;;  %629 = vmatpush.msra.mxu1 %v2409_v41 }
  0x85   :  { %649 = vmatpush.msra.mxu2 %v2415_v43  ;;  %669 = vmatpush.msra.mxu3 %v2413_v42 }
  0x86   :  { %610 = vmatpush.msra.mxu0 %v2417_v44  ;;  %630 = vmatpush.msra.mxu1 %v2419_v45 }
  0x87   :  { %650 = vmatpush.msra.mxu2 %v2425_v47  ;;  %670 = vmatpush.msra.mxu3 %v2423_v46 }
  0x88   :  { %611 = vmatpush.msra.mxu0 %v2428_v48  ;;  %631 = vmatpush.msra.mxu1 %v2430_v49 }
  0x89   :  { %651 = vmatpush.msra.mxu2 %v2437_v51  ;;  %671 = vmatpush.msra.mxu3 %v2435_v50 }
  0x8a   :  { %612 = vmatpush.msra.mxu0 %v2443_v53  ;;  %632 = vmatpush.msra.mxu1 %v2445_v54 }
  0x8b   :  { %652 = vmatpush.msra.mxu2 %v2451_v56  ;;  %672 = vmatpush.msra.mxu3 %v2449_v55 }
  0x8c   :  { %613 = vmatpush.msra.mxu0 %v2453_v57  ;;  %633 = vmatpush.msra.mxu1 %v3340_v13 }
  0x8d   :  { %653 = vmatpush.msra.mxu2 %v2461_v60  ;;  %673 = vmatpush.msra.mxu3 %v2459_v59 }
  0x8e   :  { %614 = vmatpush.msra.mxu0 %v2464_v61  ;;  %634 = vmatpush.msra.mxu1 %v2466_v62 }
  0x8f   :  { %654 = vmatpush.msra.mxu2 %v2471_v63  ;;  %674 = vmatpush.msra.mxu3 %v3341_v0 }
  0x90   :  { %615 = vmatpush.msra.mxu0 %v2479_v26  ;;  %635 = vmatpush.msra.mxu1 %v2481_v39 }
  0x91   :  { %655 = vmatpush.msra.mxu2 %v2485_v52  ;;  %675 = vmatpush.msra.mxu3 %v2487_v58 }
  0x92   :  { %747 = vmatpush.msrb.mxu0 %v2301_v1  ;;  %767 = vmatpush.msrb.mxu1 %v2303_v2 }
  0x93   :  { %787 = vmatpush.msrb.mxu2 %v2307_v4  ;;  %807 = vmatpush.msrb.mxu3 %v2305_v3 }
  0x94   :  { %748 = vmatpush.msrb.mxu0 %v2309_v5  ;;  %768 = vmatpush.msrb.mxu1 %v2311_v6 }
  0x95   :  { %788 = vmatpush.msrb.mxu2 %v2317_v8  ;;  %808 = vmatpush.msrb.mxu3 %v2315_v7 }
  0x96   :  { %749 = vmatpush.msrb.mxu0 %v2320_v9  ;;  %769 = vmatpush.msrb.mxu1 %v2322_v10 }
  0x97   :  { %789 = vmatpush.msrb.mxu2 %v2329_v12  ;;  %809 = vmatpush.msrb.mxu3 %v2327_v11 }
  0x98   :  { %750 = vmatpush.msrb.mxu0 %v2335_v14  ;;  %770 = vmatpush.msrb.mxu1 %v2337_v15 }
  0x99   :  { %790 = vmatpush.msrb.mxu2 %v2343_v17  ;;  %810 = vmatpush.msrb.mxu3 %v2341_v16 }
  0x9a   :  { %751 = vmatpush.msrb.mxu0 %v2345_v18  ;;  %771 = vmatpush.msrb.mxu1 %v2347_v19 }
  0x9b   :  { %791 = vmatpush.msrb.mxu2 %v2353_v21  ;;  %811 = vmatpush.msrb.mxu3 %v2351_v20 }
  0x9c   :  { %752 = vmatpush.msrb.mxu0 %v2356_v22  ;;  %772 = vmatpush.msrb.mxu1 %v2358_v23 }
  0x9d   :  { %792 = vmatpush.msrb.mxu2 %v2365_v25  ;;  %812 = vmatpush.msrb.mxu3 %v2363_v24 }
  0x9e   :  { %753 = vmatpush.msrb.mxu0 %v2371_v27  ;;  %773 = vmatpush.msrb.mxu1 %v2373_v28 }
  0x9f   :  { %793 = vmatpush.msrb.mxu2 %v2379_v30  ;;  %813 = vmatpush.msrb.mxu3 %v2377_v29 }
  0xa0   :  { %754 = vmatpush.msrb.mxu0 %v2381_v31  ;;  %774 = vmatpush.msrb.mxu1 %v2383_v32 }
  0xa1   :  { %794 = vmatpush.msrb.mxu2 %v2389_v34  ;;  %814 = vmatpush.msrb.mxu3 %v2387_v33 }
  0xa2   :  { %755 = vmatpush.msrb.mxu0 %v2392_v35  ;;  %775 = vmatpush.msrb.mxu1 %v2394_v36 }
  0xa3   :  { %795 = vmatpush.msrb.mxu2 %v2401_v38  ;;  %815 = vmatpush.msrb.mxu3 %v2399_v37 }
  0xa4   :  { %756 = vmatpush.msrb.mxu0 %v2407_v40  ;;  %776 = vmatpush.msrb.mxu1 %v2409_v41 }
  0xa5   :  { %796 = vmatpush.msrb.mxu2 %v2415_v43  ;;  %816 = vmatpush.msrb.mxu3 %v2413_v42 }
  0xa6   :  { %757 = vmatpush.msrb.mxu0 %v2417_v44  ;;  %777 = vmatpush.msrb.mxu1 %v2419_v45 }
  0xa7   :  { %797 = vmatpush.msrb.mxu2 %v2425_v47  ;;  %817 = vmatpush.msrb.mxu3 %v2423_v46 }
  0xa8   :  { %758 = vmatpush.msrb.mxu0 %v2428_v48  ;;  %778 = vmatpush.msrb.mxu1 %v2430_v49 }
  0xa9   :  { %798 = vmatpush.msrb.mxu2 %v2437_v51  ;;  %818 = vmatpush.msrb.mxu3 %v2435_v50 }
  0xaa   :  { %759 = vmatpush.msrb.mxu0 %v2443_v53  ;;  %779 = vmatpush.msrb.mxu1 %v2445_v54 }
  0xab   :  { %799 = vmatpush.msrb.mxu2 %v2451_v56  ;;  %819 = vmatpush.msrb.mxu3 %v2449_v55 }
  0xac   :  { %760 = vmatpush.msrb.mxu0 %v2453_v57  ;;  %780 = vmatpush.msrb.mxu1 %v3340_v13  ;;  %v215_v57 = vld [vmem:[#allocation8] sm:$0xf] }
  0xad   :  { %800 = vmatpush.msrb.mxu2 %v2461_v60  ;;  %820 = vmatpush.msrb.mxu3 %v2459_v59  ;;  %v217_v59 = vperm.slane %v215_v57, 0  ;;  %v218_v55 = vperm.slane %v215_v57, 1 }
  0xae   :  { %761 = vmatpush.msrb.mxu0 %v2464_v61  ;;  %781 = vmatpush.msrb.mxu1 %v2466_v62 }
  0xaf   :  { %801 = vmatpush.msrb.mxu2 %v2471_v63  ;;  %821 = vmatpush.msrb.mxu3 %v3341_v0 }
  0xb0   :  { %762 = vmatpush.msrb.mxu0 %v2479_v26  ;;  %782 = vmatpush.msrb.mxu1 %v2481_v39  ;;  %v2629_v39 = vperm.slane %v215_v57, 2 }
  0xb1   :  { %802 = vmatpush.msrb.mxu2 %v2485_v52  ;;  %822 = vmatpush.msrb.mxu3 %v2487_v58  ;;  %v220_v52 = vperm.slane %v215_v57, 3 }
  0xbd   :  { %v242_v13 = vpop.f32.mrf.mxu0  ;;  %v283_v60 = vpop.f32.mrf.mxu1 }
  0xc4   :  { %v2621_v61 = vpop.f32.mrf.mxu2  ;;  %v2623_v62 = vpop.f32.mrf.mxu3 }
  0xc5   :  { %v245_v63 = vpop.f32.mrf.mxu0  ;;  %v286_v56 = vpop.f32.mrf.mxu1 }
  0xc6   :  { %v2625_v0 = vadd.f32 %v245_v63, %v217_v59  ;;  %v2627_v26 = vadd.f32 %v286_v56, %v218_v55 }
  0xc8   :  { %3342 = vst [vmem:[#allocation46_spill] sm:$0xff] %v2625_v0 }
  0xc9   :  { %3343 = vst [vmem:[#allocation47_spill] sm:$0xff] %v2627_v26 }
  0xcc   :  { %v327_v54 = vpop.f32.mrf.mxu2  ;;  %v368_v58 = vpop.f32.mrf.mxu3 }
  0xcd   :  { %v2632_v53 = vadd.f32 %v327_v54, %v2629_v39  ;;  %v2634_v50 = vadd.f32 %v368_v58, %v220_v52  ;;  %v248_v51 = vpop.f32.mrf.mxu0  ;;  %v289_v49 = vpop.f32.mrf.mxu1 }
  0xce   :  { %v2636_v48 = vadd.f32 %v248_v51, %v217_v59  ;;  %v2638_v46 = vadd.f32 %v289_v49, %v218_v55 }
  0xcf   :  { %3344 = vst [vmem:[#allocation48_spill] sm:$0xff] %v2632_v53 }
  0xd0   :  { %3345 = vst [vmem:[#allocation49_spill] sm:$0xff] %v2634_v50 }
  0xd1   :  { %3346 = vst [vmem:[#allocation50_spill] sm:$0xff] %v2636_v48 }
  0xd2   :  { %3347 = vst [vmem:[#allocation51_spill] sm:$0xff] %v2638_v46 }
  0xd4   :  { %v330_v63 = vpop.f32.mrf.mxu2  ;;  %v371_v0 = vpop.f32.mrf.mxu3 }
  0xd5   :  { %v2641_v56 = vadd.f32 %v330_v63, %v2629_v39  ;;  %v2643_v26 = vadd.f32 %v371_v0, %v220_v52  ;;  %v251_v57 = vpop.f32.mrf.mxu0  ;;  %v292_v47 = vpop.f32.mrf.mxu1 }
  0xd6   :  { %v2645_v45 = vadd.f32 %v251_v57, %v217_v59  ;;  %v2647_v54 = vadd.f32 %v292_v47, %v218_v55 }
  0xd7   :  { %3348 = vst [vmem:[#allocation52_spill] sm:$0xff] %v2641_v56 }
  0xd8   :  { %3349 = vst [vmem:[#allocation53_spill] sm:$0xff] %v2643_v26 }
  0xd9   :  { %3350 = vst [vmem:[#allocation54_spill] sm:$0xff] %v2645_v45 }
  0xda   :  { %3351 = vst [vmem:[#allocation55_spill] sm:$0xff] %v2647_v54 }
  0xdc   :  { %v333_v58 = vpop.f32.mrf.mxu2  ;;  %v374_v53 = vpop.f32.mrf.mxu3 }
  0xdd   :  { %v2650_v51 = vadd.f32 %v333_v58, %v2629_v39  ;;  %v2652_v49 = vadd.f32 %v374_v53, %v220_v52  ;;  %v254_v46 = vpop.f32.mrf.mxu0  ;;  %v295_v48 = vpop.f32.mrf.mxu1 }
  0xde   :  { %v2654_v50 = vadd.f32 %v254_v46, %v217_v59  ;;  %v2656_v63 = vadd.f32 %v295_v48, %v218_v55 }
  0xdf   :  { %3352 = vst [vmem:[#allocation56_spill] sm:$0xff] %v2650_v51 }
  0xe0   :  { %3353 = vst [vmem:[#allocation57_spill] sm:$0xff] %v2652_v49 }
  0xe1   :  { %3354 = vst [vmem:[#allocation58_spill] sm:$0xff] %v2654_v50 }
  0xe2   :  { %3355 = vst [vmem:[#allocation59_spill] sm:$0xff] %v2656_v63 }
  0xe4   :  { %v336_v0 = vpop.f32.mrf.mxu2  ;;  %v377_v56 = vpop.f32.mrf.mxu3 }
  0xe5   :  { %v2659_v57 = vadd.f32 %v336_v0, %v2629_v39  ;;  %v2661_v47 = vadd.f32 %v377_v56, %v220_v52  ;;  %v257_v54 = vpop.f32.mrf.mxu0  ;;  %v298_v45 = vpop.f32.mrf.mxu1 }
  0xe6   :  { %v2663_v26 = vadd.f32 %v257_v54, %v217_v59  ;;  %v2665_v58 = vadd.f32 %v298_v45, %v218_v55 }
  0xe7   :  { %3356 = vst [vmem:[#allocation60_spill] sm:$0xff] %v2659_v57 }
  0xe8   :  { %3357 = vst [vmem:[#allocation61_spill] sm:$0xff] %v2661_v47 }
  0xe9   :  { %3358 = vst [vmem:[#allocation62_spill] sm:$0xff] %v2663_v26 }
  0xea   :  { %3359 = vst [vmem:[#allocation63_spill] sm:$0xff] %v2665_v58 }
  0xec   :  { %v339_v53 = vpop.f32.mrf.mxu2  ;;  %v380_v51 = vpop.f32.mrf.mxu3 }
  0xed   :  { %v2668_v46 = vadd.f32 %v339_v53, %v2629_v39  ;;  %v2670_v48 = vadd.f32 %v380_v51, %v220_v52  ;;  %v260_v63 = vpop.f32.mrf.mxu0  ;;  %v301_v50 = vpop.f32.mrf.mxu1  ;;  %v243_v51 = vadd.f32 %v242_v13, %v217_v59 }
  0xee   :  { %v2672_v49 = vadd.f32 %v260_v63, %v217_v59  ;;  %v2674_v0 = vadd.f32 %v301_v50, %v218_v55 }
  0xef   :  { %3360 = vst [vmem:[#allocation64_spill] sm:$0xff] %v2668_v46  ;;  %v284_v46 = vadd.f32 %v283_v60, %v218_v55 }
  0xf0   :  { %3361 = vst [vmem:[#allocation65_spill] sm:$0xff] %v2670_v48 }
  0xf1   :  { %3362 = vst [vmem:[#allocation66_spill] sm:$0xff] %v2672_v49 }
  0xf2   :  { %3363 = vst [vmem:[#allocation67_spill] sm:$0xff] %v2674_v0 }
  0xf4   :  { %v342_v56 = vpop.f32.mrf.mxu2  ;;  %v383_v57 = vpop.f32.mrf.mxu3 }
  0xf5   :  { %v2677_v54 = vadd.f32 %v342_v56, %v2629_v39  ;;  %v2679_v45 = vadd.f32 %v383_v57, %v220_v52  ;;  %v263_v58 = vpop.f32.mrf.mxu0  ;;  %v304_v26 = vpop.f32.mrf.mxu1 }
  0xf6   :  { %v2681_v47 = vadd.f32 %v263_v58, %v217_v59  ;;  %v2683_v53 = vadd.f32 %v304_v26, %v218_v55  ;;  %v366_v58 = vadd.f32 %v2623_v62, %v220_v52 }
  0xf7   :  { %3364 = vst [vmem:[#allocation68_spill] sm:$0xff] %v2677_v54 }
  0xf8   :  { %3365 = vst [vmem:[#allocation69_spill] sm:$0xff] %v2679_v45 }
  0xf9   :  { %3366 = vst [vmem:[#allocation70_spill] sm:$0xff] %v2681_v47 }
  0xfa   :  { %3367 = vst [vmem:[#allocation71_spill] sm:$0xff] %v2683_v53 }
  0xfc   :  { %v345_v48 = vpop.f32.mrf.mxu2  ;;  %v386_v63 = vpop.f32.mrf.mxu3 }
  0xfd   :  { %v2686_v50 = vadd.f32 %v345_v48, %v2629_v39  ;;  %v2688_v0 = vadd.f32 %v386_v63, %v220_v52  ;;  %v470_v49 = vpop.f32.mrf.mxu0  ;;  %v490_v56 = vpop.f32.mrf.mxu1 }
  0xfe   :  { %v533_v54 = vadd.f32 %v470_v49, %v243_v51  ;;  %v534_v57 = vadd.f32 %v490_v56, %v284_v46  ;;  %v325_v49 = vadd.f32 %v2621_v61, %v2629_v39 }
  0xff   :  { %3368 = vst [vmem:[#allocation72_spill] sm:$0xff] %v2686_v50 }
 0x100   :  { %3369 = vst [vmem:[#allocation73_spill] sm:$0xff] %v2688_v0  ;;  %v1772_v45 = vmul.f32 -1.442695, %v533_v54  ;;  %v1773_v44 = vmul.f32 -1.442695, %v534_v57 }
 0x102   :  { %1812 = vpow2.f32 %v1772_v45 }
 0x103   :  { %1814 = vpow2.f32 %v1773_v44 }
 0x104   :  { %v530_v26 = vpop.f32.mrf.mxu3  ;;  %v510_v63 = vpop.f32.mrf.mxu2 }
 0x105   :  { %v536_v59 = vadd.f32 %v530_v26, %v366_v58  ;;  %v535_v45 = vadd.f32 %v510_v63, %v325_v49 }
 0x107   :  { %v1774_v55 = vmul.f32 -1.442695, %v536_v59 }
 0x108   :  { %v1813_v60 = vpop.eup %1812 }
 0x109   :  { %v1815_v13 = vpop.eup %1814  ;;  %v540_v53 = vadd.f32 1.0, %v1813_v60  ;;  %1816 = vpow2.f32 %v1774_v55 }
 0x10a   :  { %v559_v48 = vadd.f32 1.0, %v1815_v13 }
 0x10b   :  { %1818 = vrcp.f32 %v540_v53  ;;  %v552_v57 = vand.u32 2147483648, %v540_v53  ;;  %v550_v59 = vand.u32 2147483647, %v540_v53  ;;  %vm546_vm2 = vweird.f32 %v540_v53 }
 0x10c   :  { %1820 = vrcp.f32 %v559_v48  ;;  %v571_v58 = vand.u32 2147483648, %v559_v48  ;;  %v569_v60 = vand.u32 2147483647, %v559_v48  ;;  %vm565_vm3 = vweird.f32 %v559_v48 }
 0x10d   :  { %v553_v39 = vor.u32 1.1754944e-38, %v552_v57  ;;  %vm551_vm5 = vcmp.eq.f32.partialorder %v550_v59, 8.507059e+37 }
 0x10e   :  { %v572_v49 = vor.u32 1.1754944e-38, %v571_v58  ;;  %vm570_vm7 = vcmp.eq.f32.partialorder %v569_v60, 8.507059e+37 }
 0x10f   :  { %v1817_v50 = vpop.eup %1816 }
 0x110   :  { %v579_v46 = vadd.f32 1.0, %v1817_v50 }
 0x111   :  { %v1819_v54 = vpop.eup %1818 }
 0x112   :  { %v1821_v62 = vpop.eup %1820  ;;  %v542_v44 = vmul.f32 %v1819_v54, %v540_v53  ;;  %1822 = vrcp.f32 %v579_v46  ;;  %vm547_vm0 = vweird.f32 %v1819_v54  ;;  %vm585_vm9 = vweird.f32 %v579_v46 }
 0x113   :  { %v561_v52 = vmul.f32 %v1821_v62, %v559_v48  ;;  %1824 = vtanh.f32 %v535_v45  ;;  %vm566_vm1 = vweird.f32 %v1821_v62  ;;  %vm548_vm4 = vmor %vm546_vm2, %vm547_vm0  ;;  %v591_v48 = vand.u32 2147483648, %v579_v46 }
 0x114   :  { %v543_v51 = vsub.f32 1.0, %v542_v44  ;;  %vm567_vm6 = vmor %vm565_vm3, %vm566_vm1 }
 0x115   :  { %v562_v56 = vsub.f32 1.0, %v561_v52  ;;  %v592_v58 = vor.u32 1.1754944e-38, %v591_v48 }
 0x116   :  { %v544_v26 = vmul.f32 %v1819_v54, %v543_v51 }
 0x117   :  { %v563_v55 = vmul.f32 %v1821_v62, %v562_v56 }
 0x118   :  { %v1823_v13 = vpop.eup %1822  ;;  %v545_v61 = vadd.f32 %v1819_v54, %v544_v26 }
 0x119   :  { %v564_v50 = vadd.f32 %v1821_v62, %v563_v55  ;;  %v581_v63 = vmul.f32 %v1823_v13, %v579_v46  ;;  %v1825_v45 = vpop.eup %1824  ;;  %vm586_vm8 = vweird.f32 %v1823_v13 }
 0x11a   :  { %v549_v44 = vsel %vm548_vm4, %v1819_v54, %v545_v61  ;;  %v589_v54 = vand.u32 2147483647, %v579_v46  ;;  %vm587_vm10 = vmor %vm585_vm9, %vm586_vm8 }
 0x11b   :  { %v554_v52 = vsel %vm551_vm5, %v553_v39, %v549_v44  ;;  %v568_v51 = vsel %vm567_vm6, %v1821_v62, %v564_v50  ;;  %v582_v0 = vsub.f32 1.0, %v581_v63  ;;  %v3399_v39 = vld [vmem:[#allocation48_spill] sm:$0xff] }
 0x11c   :  { %v573_v56 = vsel %vm570_vm7, %v572_v49, %v568_v51  ;;  %v596_v47 = vmul.f32 %v1825_v45, %v554_v52  ;;  %vm590_vm11 = vcmp.eq.f32.partialorder %v589_v54, 8.507059e+37 }
 0x11d   :  { %v595_v42 = vmul.f32 0.0, %v573_v56  ;;  %v583_v43 = vmul.f32 %v1823_v13, %v582_v0 }
 0x11f   :  { %v2693_v26 = vadd.f32 %v596_v47, %v595_v42  ;;  %v584_v53 = vadd.f32 %v1823_v13, %v583_v43 }
 0x121   :  { %1826 = vtanh.f32 %v2693_v26  ;;  %v588_v57 = vsel %vm587_vm10, %v1823_v13, %v584_v53 }
 0x122   :  { %v593_v59 = vsel %vm590_vm11, %v592_v58, %v588_v57 }
 0x127   :  { %v1827_v62 = vpop.eup %1826 }
 0x128   :  { %v599_v55 = vmul.f32 %v1827_v62, %v593_v59 }
 0x12a   :  { %616 = vmatmul.f32.vlgmr.msra.gmra.mxu0 %v599_v55  ;;  %636 = vmatmul.f32.vlgmr.msra.gmra.mxu1 %v599_v55 }
 0x12b   :  { %656 = vmatmul.f32.vlgmr.msra.gmra.mxu2 %v599_v55  ;;  %676 = vmatmul.f32.vlgmr.msra.gmra.mxu3 %v599_v55 }
 0x12c   :  { %894 = vmatpush.msra.mxu0 %v2301_v1  ;;  %914 = vmatpush.msra.mxu1 %v2303_v2  ;;  %v3370_v1 = vld [vmem:[#allocation21_spill] sm:$0xff]  ;;  %v3371_v2 = vld [vmem:[#allocation20_spill] sm:$0xff] }
 0x12d   :  { %934 = vmatpush.msra.mxu2 %v2307_v4  ;;  %954 = vmatpush.msra.mxu3 %v2305_v3  ;;  %v3372_v3 = vld [vmem:[#allocation22_spill] sm:$0xff]  ;;  %v3373_v4 = vld [vmem:[#allocation23_spill] sm:$0xff] }
 0x12e   :  { %895 = vmatpush.msra.mxu0 %v2309_v5  ;;  %915 = vmatpush.msra.mxu1 %v2311_v6  ;;  %v3374_v5 = vld [vmem:[#allocation25_spill] sm:$0xff]  ;;  %v3375_v6 = vld [vmem:[#allocation24_spill] sm:$0xff] }
 0x12f   :  { %935 = vmatpush.msra.mxu2 %v2317_v8  ;;  %955 = vmatpush.msra.mxu3 %v2315_v7  ;;  %v3376_v7 = vld [vmem:[#allocation26_spill] sm:$0xff]  ;;  %v3377_v8 = vld [vmem:[#allocation27_spill] sm:$0xff] }
 0x130   :  { %896 = vmatpush.msra.mxu0 %v2320_v9  ;;  %916 = vmatpush.msra.mxu1 %v2322_v10  ;;  %v3378_v9 = vld [vmem:[#allocation29_spill] sm:$0xff]  ;;  %v3379_v10 = vld [vmem:[#allocation28_spill] sm:$0xff] }
 0x131   :  { %936 = vmatpush.msra.mxu2 %v2329_v12  ;;  %956 = vmatpush.msra.mxu3 %v2327_v11  ;;  %v3380_v11 = vld [vmem:[#allocation30_spill] sm:$0xff]  ;;  %v3381_v12 = vld [vmem:[#allocation31_spill] sm:$0xff] }
 0x132   :  { %897 = vmatpush.msra.mxu0 %v2335_v14  ;;  %917 = vmatpush.msra.mxu1 %v2337_v15  ;;  %v3382_v14 = vld [vmem:[#allocation33_spill] sm:$0xff]  ;;  %v3383_v15 = vld [vmem:[#allocation32_spill] sm:$0xff] }
 0x133   :  { %937 = vmatpush.msra.mxu2 %v2343_v17  ;;  %957 = vmatpush.msra.mxu3 %v2341_v16  ;;  %v3384_v16 = vld [vmem:[#allocation34_spill] sm:$0xff]  ;;  %v3385_v17 = vld [vmem:[#allocation35_spill] sm:$0xff] }
 0x134   :  { %898 = vmatpush.msra.mxu0 %v2345_v18  ;;  %918 = vmatpush.msra.mxu1 %v2347_v19  ;;  %v3386_v18 = vld [vmem:[#allocation37_spill] sm:$0xff]  ;;  %v3387_v19 = vld [vmem:[#allocation36_spill] sm:$0xff] }
 0x135   :  { %938 = vmatpush.msra.mxu2 %v2353_v21  ;;  %958 = vmatpush.msra.mxu3 %v2351_v20  ;;  %v3388_v20 = vld [vmem:[#allocation38_spill] sm:$0xff]  ;;  %v3389_v21 = vld [vmem:[#allocation39_spill] sm:$0xff] }
 0x136   :  { %899 = vmatpush.msra.mxu0 %v2356_v22  ;;  %919 = vmatpush.msra.mxu1 %v2358_v23  ;;  %v3390_v22 = vld [vmem:[#allocation40_spill] sm:$0xff]  ;;  %v3391_v23 = vld [vmem:[#allocation41_spill] sm:$0xff] }
 0x137   :  { %939 = vmatpush.msra.mxu2 %v2365_v25  ;;  %959 = vmatpush.msra.mxu3 %v2363_v24  ;;  %v3392_v24 = vld [vmem:[#allocation42_spill] sm:$0xff]  ;;  %v3393_v25 = vld [vmem:[#allocation43_spill] sm:$0xff] }
 0x138   :  { %900 = vmatpush.msra.mxu0 %v2371_v27  ;;  %920 = vmatpush.msra.mxu1 %v2373_v28  ;;  %v3394_v27 = vld [vmem:[#allocation44_spill] sm:$0xff]  ;;  %v3395_v28 = vld [vmem:[#allocation45_spill] sm:$0xff] }
 0x139   :  { %940 = vmatpush.msra.mxu2 %v2379_v30  ;;  %960 = vmatpush.msra.mxu3 %v2377_v29 }
 0x13a   :  { %901 = vmatpush.msra.mxu0 %v2381_v31  ;;  %921 = vmatpush.msra.mxu1 %v2383_v32  ;;  %v3396_v31 = vld [vmem:[#allocation46_spill] sm:$0xff] }
 0x13b   :  { %941 = vmatpush.msra.mxu2 %v2389_v34  ;;  %961 = vmatpush.msra.mxu3 %v2387_v33  ;;  %v3397_v33 = vld [vmem:[#allocation47_spill] sm:$0xff] }
 0x13c   :  { %902 = vmatpush.msra.mxu0 %v2392_v35  ;;  %922 = vmatpush.msra.mxu1 %v2394_v36 }
 0x13d   :  { %942 = vmatpush.msra.mxu2 %v2401_v38  ;;  %962 = vmatpush.msra.mxu3 %v2399_v37  ;;  %v3398_v38 = vld [vmem:[#allocation49_spill] sm:$0xff] }
 0x13e   :  { %903 = vmatpush.msra.mxu0 %v2407_v40  ;;  %923 = vmatpush.msra.mxu1 %v2409_v41 }
 0x13f   :  { %943 = vmatpush.msra.mxu2 %v3370_v1  ;;  %963 = vmatpush.msra.mxu3 %v3371_v2 }
 0x140   :  { %904 = vmatpush.msra.mxu0 %v3372_v3  ;;  %924 = vmatpush.msra.mxu1 %v3373_v4 }
 0x141   :  { %944 = vmatpush.msra.mxu2 %v3374_v5  ;;  %964 = vmatpush.msra.mxu3 %v3375_v6 }
 0x142   :  { %905 = vmatpush.msra.mxu0 %v3376_v7  ;;  %925 = vmatpush.msra.mxu1 %v3377_v8 }
 0x143   :  { %945 = vmatpush.msra.mxu2 %v3378_v9  ;;  %965 = vmatpush.msra.mxu3 %v3379_v10 }
 0x144   :  { %906 = vmatpush.msra.mxu0 %v3380_v11  ;;  %926 = vmatpush.msra.mxu1 %v3381_v12 }
 0x145   :  { %946 = vmatpush.msra.mxu2 %v3382_v14  ;;  %966 = vmatpush.msra.mxu3 %v3383_v15 }
 0x146   :  { %907 = vmatpush.msra.mxu0 %v3384_v16  ;;  %927 = vmatpush.msra.mxu1 %v3385_v17 }
 0x147   :  { %947 = vmatpush.msra.mxu2 %v3386_v18  ;;  %967 = vmatpush.msra.mxu3 %v3387_v19 }
 0x148   :  { %908 = vmatpush.msra.mxu0 %v3388_v20  ;;  %928 = vmatpush.msra.mxu1 %v3389_v21 }
 0x149   :  { %948 = vmatpush.msra.mxu2 %v3390_v22  ;;  %968 = vmatpush.msra.mxu3 %v3391_v23 }
 0x14a   :  { %909 = vmatpush.msra.mxu0 %v3392_v24  ;;  %929 = vmatpush.msra.mxu1 %v3393_v25 }
 0x14b   :  { %949 = vmatpush.msra.mxu2 %v3394_v27  ;;  %969 = vmatpush.msra.mxu3 %v3395_v28 }
 0x1a7   :  { %v617_v29 = vpop.f32.mrf.mxu0  ;;  %v637_v30 = vpop.f32.mrf.mxu1 }
 0x1a8   :  { %v680_v32 = vadd.f32 %v617_v29, %v3396_v31  ;;  %v681_v34 = vadd.f32 %v637_v30, %v3397_v33  ;;  %v2771_v29 = vld [vmem:[#allocation7 + $0x1e8] sm:$0xff]  ;;  %v2774_v30 = vld [vmem:[#allocation7 + $0x1f0] sm:$0xff]  ;;  %v2777_v31 = vld [vmem:[#allocation7 + $0x1f8] sm:$0xff] }
 0x1a9   :  { %v2783_v33 = vld [vmem:[#allocation7 + $0x1c8] sm:$0xff] }
 0x1aa   :  { %v1775_v35 = vmul.f32 -1.442695, %v680_v32  ;;  %v1776_v36 = vmul.f32 -1.442695, %v681_v34  ;;  %v2780_v32 = vld [vmem:[#allocation7 + $0x1c0] sm:$0xff]  ;;  %v2786_v34 = vld [vmem:[#allocation7 + $0x1d0] sm:$0xff] }
 0x1ac   :  { %1828 = vpow2.f32 %v1775_v35  ;;  %v2789_v35 = vld [vmem:[#allocation7 + $0x1d8] sm:$0xff] }
 0x1ad   :  { %1830 = vpow2.f32 %v1776_v36  ;;  %v2792_v36 = vld [vmem:[#allocation7 + $0x1a0] sm:$0xff] }
 0x1ae   :  { %v677_v37 = vpop.f32.mrf.mxu3  ;;  %v657_v46 = vpop.f32.mrf.mxu2 }
 0x1af   :  { %v683_v40 = vadd.f32 %v677_v37, %v3398_v38  ;;  %v682_v50 = vadd.f32 %v657_v46, %v3399_v39  ;;  %v2795_v37 = vld [vmem:[#allocation7 + $0x1a8] sm:$0xff]  ;;  %v2798_v38 = vld [vmem:[#allocation7 + $0x1b0] sm:$0xff] }
 0x1b0   :  { %v2819_v46 = vld [vmem:[#allocation7 + $0x168] sm:$0xff] }
 0x1b1   :  { %v1777_v41 = vmul.f32 -1.442695, %v683_v40  ;;  %v2801_v40 = vld [vmem:[#allocation7 + $0x1b8] sm:$0xff]  ;;  %v2831_v39 = vld [vmem:[#allocation7 + $0x148] sm:$0xff] }
 0x1b2   :  { %v1829_v42 = vpop.eup %1828 }
 0x1b3   :  { %v1831_v43 = vpop.eup %1830  ;;  %v687_v47 = vadd.f32 1.0, %v1829_v42  ;;  %1832 = vpow2.f32 %v1777_v41  ;;  %v2804_v41 = vld [vmem:[#allocation7 + $0x180] sm:$0xff]  ;;  %v2807_v42 = vld [vmem:[#allocation7 + $0x188] sm:$0xff] }
 0x1b4   :  { %v706_v0 = vadd.f32 1.0, %v1831_v43  ;;  %v2810_v43 = vld [vmem:[#allocation7 + $0x190] sm:$0xff] }
 0x1b5   :  { %1834 = vrcp.f32 %v687_v47  ;;  %v699_v51 = vand.u32 2147483648, %v687_v47  ;;  %v697_v48 = vand.u32 2147483647, %v687_v47  ;;  %vm693_vm14 = vweird.f32 %v687_v47 }
 0x1b6   :  { %1836 = vrcp.f32 %v706_v0  ;;  %v718_v56 = vand.u32 2147483648, %v706_v0  ;;  %v716_v57 = vand.u32 2147483647, %v706_v0  ;;  %vm712_vm15 = vweird.f32 %v706_v0 }
 0x1b7   :  { %v700_v59 = vor.u32 1.1754944e-38, %v699_v51  ;;  %vm698_vm2 = vcmp.eq.f32.partialorder %v697_v48, 8.507059e+37  ;;  %v2852_v51 = vld [vmem:[#allocation7 + $0x100] sm:$0xff]  ;;  %v2861_v48 = vld [vmem:[#allocation7 + $0x118] sm:$0xff] }
 0x1b8   :  { %v719_v2 = vor.u32 1.1754944e-38, %v718_v56  ;;  %vm717_vm3 = vcmp.eq.f32.partialorder %v716_v57, 8.507059e+37  ;;  %v2855_v56 = vld [vmem:[#allocation7 + $0x108] sm:$0xff] }
 0x1b9   :  { %v1833_v60 = vpop.eup %1832  ;;  %v2867_v57 = vld [vmem:[#allocation7 + $0xe8] sm:$0xff] }
 0x1ba   :  { %v726_v13 = vadd.f32 1.0, %v1833_v60  ;;  %v2822_v60 = vld [vmem:[#allocation7 + $0x170] sm:$0xff] }
 0x1bb   :  { %v1835_v61 = vpop.eup %1834 }
 0x1bc   :  { %v1837_v63 = vpop.eup %1836  ;;  %v689_v49 = vmul.f32 %v1835_v61, %v687_v47  ;;  %1838 = vrcp.f32 %v726_v13  ;;  %vm694_vm12 = vweird.f32 %v1835_v61  ;;  %v738_v15 = vand.u32 2147483648, %v726_v13  ;;  %v2813_v47 = vld [vmem:[#allocation7 + $0x198] sm:$0xff] }
 0x1bd   :  { %v708_v44 = vmul.f32 %v1837_v63, %v706_v0  ;;  %1840 = vtanh.f32 %v682_v50  ;;  %vm713_vm13 = vweird.f32 %v1837_v63  ;;  %vm695_vm0 = vmor %vm693_vm14, %vm694_vm12  ;;  %vm732_vm5 = vweird.f32 %v726_v13  ;;  %v2816_v0 = vld [vmem:[#allocation7 + $0x160] sm:$0xff]  ;;  %v2834_v50 = vld [vmem:[#allocation7 + $0x150] sm:$0xff] }
 0x1be   :  { %v690_v45 = vsub.f32 1.0, %v689_v49  ;;  %vm714_vm1 = vmor %vm712_vm15, %vm713_vm13  ;;  %v736_v16 = vand.u32 2147483647, %v726_v13  ;;  %v739_v18 = vor.u32 1.1754944e-38, %v738_v15  ;;  %v2840_v49 = vld [vmem:[#allocation7 + $0x120] sm:$0xff]  ;;  %v2918_v15 = vld [vmem:[#allocation7 + $0x70] sm:$0xff] }
 0x1bf   :  { %v709_v52 = vsub.f32 1.0, %v708_v44  ;;  %v2843_v44 = vld [vmem:[#allocation7 + $0x128] sm:$0xff]  ;;  %3412 = vst [vmem:[#allocation33_spill] sm:$0xff] %v2918_v15 }
 0x1c0   :  { %v691_v53 = vmul.f32 %v1835_v61, %v690_v45  ;;  %vm737_vm7 = vcmp.eq.f32.partialorder %v736_v16, 8.507059e+37  ;;  %v2846_v45 = vld [vmem:[#allocation7 + $0x130] sm:$0xff]  ;;  %v2921_v16 = vld [vmem:[#allocation7 + $0x78] sm:$0xff] }
 0x1c1   :  { %v710_v54 = vmul.f32 %v1837_v63, %v709_v52  ;;  %v2849_v52 = vld [vmem:[#allocation7 + $0x138] sm:$0xff]  ;;  %3413 = vst [vmem:[#allocation32_spill] sm:$0xff] %v2921_v16 }
 0x1c2   :  { %v1839_v58 = vpop.eup %1838  ;;  %v692_v62 = vadd.f32 %v1835_v61, %v691_v53  ;;  %v2858_v53 = vld [vmem:[#allocation7 + $0x110] sm:$0xff] }
 0x1c3   :  { %v711_v55 = vadd.f32 %v1837_v63, %v710_v54  ;;  %v728_v1 = vmul.f32 %v1839_v58, %v726_v13  ;;  %v1841_v4 = vpop.eup %1840  ;;  %vm733_vm4 = vweird.f32 %v1839_v58  ;;  %v2825_v13 = vld [vmem:[#allocation7 + $0x178] sm:$0xff]  ;;  %v2864_v54 = vld [vmem:[#allocation7 + $0xe0] sm:$0xff] }
 0x1c4   :  { %v696_v3 = vsel %vm695_vm0, %v1835_v61, %v692_v62  ;;  %vm734_vm6 = vmor %vm732_vm5, %vm733_vm4  ;;  %v2828_v61 = vld [vmem:[#allocation7 + $0x140] sm:$0xff]  ;;  %v2873_v62 = vld [vmem:[#allocation7 + $0xf8] sm:$0xff] }
 0x1c5   :  { %v701_v5 = vsel %vm698_vm2, %v700_v59, %v696_v3  ;;  %v715_v6 = vsel %vm714_vm1, %v1837_v63, %v711_v55  ;;  %v729_v7 = vsub.f32 1.0, %v728_v1  ;;  %v2837_v63 = vld [vmem:[#allocation7 + $0x158] sm:$0xff]  ;;  %v2876_v59 = vld [vmem:[#allocation7 + $0xc0] sm:$0xff]  ;;  %v2879_v55 = vld [vmem:[#allocation7 + $0xc8] sm:$0xff] }
 0x1c6   :  { %v720_v8 = vsel %vm717_vm3, %v719_v2, %v715_v6  ;;  %v743_v9 = vmul.f32 %v1841_v4, %v701_v5  ;;  %v2882_v1 = vld [vmem:[#allocation7 + $0xd0] sm:$0xff]  ;;  %v2885_v2 = vld [vmem:[#allocation7 + $0xd8] sm:$0xff]  ;;  %v2888_v3 = vld [vmem:[#allocation7 + $0xa0] sm:$0xff] }
 0x1c7   :  { %v742_v10 = vmul.f32 %v720_v8, %v2693_v26  ;;  %v730_v11 = vmul.f32 %v1839_v58, %v729_v7  ;;  %v2768_v26 = vld [vmem:[#allocation7 + $0x1e0] sm:$0xff]  ;;  %3400 = vst [vmem:[#allocation21_spill] sm:$0xff] %v2882_v1  ;;  %v2891_v4 = vld [vmem:[#allocation7 + $0xa8] sm:$0xff]  ;;  %v2894_v5 = vld [vmem:[#allocation7 + $0xb0] sm:$0xff] }
 0x1c8   :  { %3401 = vst [vmem:[#allocation20_spill] sm:$0xff] %v2885_v2  ;;  %v2897_v6 = vld [vmem:[#allocation7 + $0xb8] sm:$0xff]  ;;  %v2900_v7 = vld [vmem:[#allocation7 + $0x80] sm:$0xff]  ;;  %v2903_v8 = vld [vmem:[#allocation7 + $0x88] sm:$0xff] }
 0x1c9   :  { %v2765_v12 = vadd.f32 %v743_v9, %v742_v10  ;;  %v731_v14 = vadd.f32 %v1839_v58, %v730_v11  ;;  %3402 = vst [vmem:[#allocation22_spill] sm:$0xff] %v2888_v3  ;;  %v2906_v9 = vld [vmem:[#allocation7 + $0x90] sm:$0xff]  ;;  %v2909_v10 = vld [vmem:[#allocation7 + $0x98] sm:$0xff]  ;;  %v2912_v11 = vld [vmem:[#allocation7 + $0x60] sm:$0xff] }
 0x1ca   :  { %3403 = vst [vmem:[#allocation23_spill] sm:$0xff] %v2891_v4 }
 0x1cb   :  { %1842 = vtanh.f32 %v2765_v12  ;;  %v735_v17 = vsel %vm734_vm6, %v1839_v58, %v731_v14  ;;  %v2870_v58 = vld [vmem:[#allocation7 + $0xf0] sm:$0xff]  ;;  %3404 = vst [vmem:[#allocation25_spill] sm:$0xff] %v2894_v5  ;;  %v2915_v14 = vld [vmem:[#allocation7 + $0x68] sm:$0xff] }
 0x1cc   :  { %v740_v20 = vsel %vm737_vm7, %v739_v18, %v735_v17  ;;  %3405 = vst [vmem:[#allocation24_spill] sm:$0xff] %v2897_v6  ;;  %v2924_v17 = vld [vmem:[#allocation7 + $0x40] sm:$0xff]  ;;  %v2927_v18 = vld [vmem:[#allocation7 + $0x48] sm:$0xff] }
 0x1cd   :  { %3406 = vst [vmem:[#allocation26_spill] sm:$0xff] %v2900_v7 }
 0x1ce   :  { %3407 = vst [vmem:[#allocation27_spill] sm:$0xff] %v2903_v8 }
 0x1cf   :  { %3408 = vst [vmem:[#allocation29_spill] sm:$0xff] %v2906_v9 }
 0x1d0   :  { %3409 = vst [vmem:[#allocation28_spill] sm:$0xff] %v2909_v10 }
 0x1d1   :  { %v1843_v19 = vpop.eup %1842  ;;  %3410 = vst [vmem:[#allocation30_spill] sm:$0xff] %v2912_v11 }
 0x1d2   :  { %v746_v21 = vmul.f32 %v1843_v19, %v740_v20  ;;  %3411 = vst [vmem:[#allocation31_spill] sm:$0xff] %v2915_v14  ;;  %v2930_v19 = vld [vmem:[#allocation7 + $0x50] sm:$0xff]  ;;  %v2933_v20 = vld [vmem:[#allocation7 + $0x58] sm:$0xff] }
 0x1d3   :  { %3414 = vst [vmem:[#allocation34_spill] sm:$0xff] %v2924_v17 }
 0x1d4   :  { %763 = vmatmul.f32.vlgmr.msrb.gmra.mxu0 %v746_v21  ;;  %783 = vmatmul.f32.vlgmr.msrb.gmra.mxu1 %v746_v21  ;;  %3415 = vst [vmem:[#allocation35_spill] sm:$0xff] %v2927_v18 }
 0x1d5   :  { %803 = vmatmul.f32.vlgmr.msrb.gmra.mxu2 %v746_v21  ;;  %823 = vmatmul.f32.vlgmr.msrb.gmra.mxu3 %v746_v21  ;;  %3416 = vst [vmem:[#allocation37_spill] sm:$0xff] %v2930_v19  ;;  %v2936_v21 = vld [vmem:[#allocation7 + $0x20] sm:$0xff] }
 0x1d6   :  { %1041 = vmatpush.msrb.mxu0 %v2768_v26  ;;  %1061 = vmatpush.msrb.mxu1 %v2771_v29  ;;  %3417 = vst [vmem:[#allocation36_spill] sm:$0xff] %v2933_v20 }
 0x1d7   :  { %1081 = vmatpush.msrb.mxu2 %v2774_v30  ;;  %1101 = vmatpush.msrb.mxu3 %v2777_v31  ;;  %3418 = vst [vmem:[#allocation38_spill] sm:$0xff] %v2936_v21 }
 0x1d8   :  { %1042 = vmatpush.msrb.mxu0 %v2780_v32  ;;  %1062 = vmatpush.msrb.mxu1 %v2783_v33 }
 0x1d9   :  { %1082 = vmatpush.msrb.mxu2 %v2786_v34  ;;  %1102 = vmatpush.msrb.mxu3 %v2789_v35 }
 0x1da   :  { %1043 = vmatpush.msrb.mxu0 %v2792_v36  ;;  %1063 = vmatpush.msrb.mxu1 %v2795_v37 }
 0x1db   :  { %1083 = vmatpush.msrb.mxu2 %v2798_v38  ;;  %1103 = vmatpush.msrb.mxu3 %v2801_v40 }
 0x1dc   :  { %1044 = vmatpush.msrb.mxu0 %v2804_v41  ;;  %1064 = vmatpush.msrb.mxu1 %v2807_v42 }
 0x1dd   :  { %1084 = vmatpush.msrb.mxu2 %v2810_v43  ;;  %1104 = vmatpush.msrb.mxu3 %v2813_v47 }
 0x1de   :  { %1045 = vmatpush.msrb.mxu0 %v2816_v0  ;;  %1065 = vmatpush.msrb.mxu1 %v2819_v46 }
 0x1df   :  { %1085 = vmatpush.msrb.mxu2 %v2822_v60  ;;  %1105 = vmatpush.msrb.mxu3 %v2825_v13 }
 0x1e0   :  { %1046 = vmatpush.msrb.mxu0 %v2828_v61  ;;  %1066 = vmatpush.msrb.mxu1 %v2831_v39 }
 0x1e1   :  { %1086 = vmatpush.msrb.mxu2 %v2834_v50  ;;  %1106 = vmatpush.msrb.mxu3 %v2837_v63 }
 0x1e2   :  { %1047 = vmatpush.msrb.mxu0 %v2840_v49  ;;  %1067 = vmatpush.msrb.mxu1 %v2843_v44 }
 0x1e3   :  { %1087 = vmatpush.msrb.mxu2 %v2846_v45  ;;  %1107 = vmatpush.msrb.mxu3 %v2849_v52 }
 0x1e4   :  { %1048 = vmatpush.msrb.mxu0 %v2852_v51  ;;  %1068 = vmatpush.msrb.mxu1 %v2855_v56 }
 0x1e5   :  { %1088 = vmatpush.msrb.mxu2 %v2858_v53  ;;  %1108 = vmatpush.msrb.mxu3 %v2861_v48 }
 0x1e6   :  { %1049 = vmatpush.msrb.mxu0 %v2864_v54  ;;  %1069 = vmatpush.msrb.mxu1 %v2867_v57 }
 0x1e7   :  { %1089 = vmatpush.msrb.mxu2 %v2870_v58  ;;  %1109 = vmatpush.msrb.mxu3 %v2873_v62 }
 0x1e8   :  { %1050 = vmatpush.msrb.mxu0 %v2876_v59  ;;  %1070 = vmatpush.msrb.mxu1 %v2879_v55 }
 0x1e9   :  { %1090 = vmatpush.msrb.mxu2 %v2882_v1  ;;  %1110 = vmatpush.msrb.mxu3 %v2885_v2 }
 0x1ea   :  { %1051 = vmatpush.msrb.mxu0 %v2888_v3  ;;  %1071 = vmatpush.msrb.mxu1 %v2891_v4 }
 0x1eb   :  { %1091 = vmatpush.msrb.mxu2 %v2894_v5  ;;  %1111 = vmatpush.msrb.mxu3 %v2897_v6 }
 0x1ec   :  { %1052 = vmatpush.msrb.mxu0 %v2900_v7  ;;  %1072 = vmatpush.msrb.mxu1 %v2903_v8 }
 0x1ed   :  { %1092 = vmatpush.msrb.mxu2 %v2906_v9  ;;  %1112 = vmatpush.msrb.mxu3 %v2909_v10 }
 0x1ee   :  { %1053 = vmatpush.msrb.mxu0 %v2912_v11  ;;  %1073 = vmatpush.msrb.mxu1 %v2915_v14 }
 0x1ef   :  { %1093 = vmatpush.msrb.mxu2 %v2918_v15  ;;  %1113 = vmatpush.msrb.mxu3 %v2921_v16  ;;  %v2939_v16 = vld [vmem:[#allocation7 + $0x28] sm:$0xff] }
 0x1f0   :  { %1054 = vmatpush.msrb.mxu0 %v2924_v17  ;;  %1074 = vmatpush.msrb.mxu1 %v2927_v18  ;;  %3419 = vst [vmem:[#allocation39_spill] sm:$0xff] %v2939_v16  ;;  %v3420_v18 = vld [vmem:[#allocation50_spill] sm:$0xff]  ;;  %v3421_v17 = vld [vmem:[#allocation51_spill] sm:$0xff] }
 0x1f1   :  { %1094 = vmatpush.msrb.mxu2 %v2930_v19  ;;  %1114 = vmatpush.msrb.mxu3 %v2933_v20 }
 0x1f2   :  { %1055 = vmatpush.msrb.mxu0 %v2936_v21  ;;  %1075 = vmatpush.msrb.mxu1 %v2939_v16 }
 0x1f3   :  { %1095 = vmatpush.msrb.mxu2 %v3390_v22  ;;  %1115 = vmatpush.msrb.mxu3 %v3391_v23  ;;  %v3422_v23 = vld [vmem:[#allocation53_spill] sm:$0xff] }
 0x1f4   :  { %1056 = vmatpush.msrb.mxu0 %v3392_v24  ;;  %1076 = vmatpush.msrb.mxu1 %v3393_v25 }
 0x1f5   :  { %1096 = vmatpush.msrb.mxu2 %v3394_v27  ;;  %1116 = vmatpush.msrb.mxu3 %v3395_v28 }
 0x251   :  { %v764_v20 = vpop.f32.mrf.mxu0  ;;  %v784_v19 = vpop.f32.mrf.mxu1 }
 0x252   :  { %v827_v21 = vadd.f32 %v764_v20, %v3420_v18  ;;  %v828_v15 = vadd.f32 %v784_v19, %v3421_v17  ;;  %v3423_v17 = vld [vmem:[#allocation52_spill] sm:$0xff] }
 0x254   :  { %v1778_v14 = vmul.f32 -1.442695, %v827_v21  ;;  %v1779_v16 = vmul.f32 -1.442695, %v828_v15 }
 0x256   :  { %1844 = vpow2.f32 %v1778_v14 }
 0x257   :  { %1846 = vpow2.f32 %v1779_v16 }
 0x258   :  { %v824_v22 = vpop.f32.mrf.mxu3  ;;  %v804_v28 = vpop.f32.mrf.mxu2 }
 0x259   :  { %v830_v11 = vadd.f32 %v824_v22, %v3422_v23  ;;  %v829_v19 = vadd.f32 %v804_v28, %v3423_v17 }
 0x25b   :  { %v1780_v24 = vmul.f32 -1.442695, %v830_v11 }
 0x25c   :  { %v1845_v10 = vpop.eup %1844 }
 0x25d   :  { %v1847_v25 = vpop.eup %1846  ;;  %v834_v9 = vadd.f32 1.0, %v1845_v10  ;;  %1848 = vpow2.f32 %v1780_v24 }
 0x25e   :  { %v853_v27 = vadd.f32 1.0, %v1847_v25 }
 0x25f   :  { %1850 = vrcp.f32 %v834_v9  ;;  %v846_v11 = vand.u32 2147483648, %v834_v9  ;;  %v844_v24 = vand.u32 2147483647, %v834_v9  ;;  %vm840_vm10 = vweird.f32 %v834_v9 }
 0x260   :  { %1852 = vrcp.f32 %v853_v27  ;;  %v865_v23 = vand.u32 2147483648, %v853_v27  ;;  %v863_v7 = vand.u32 2147483647, %v853_v27  ;;  %vm859_vm11 = vweird.f32 %v853_v27 }
 0x261   :  { %v847_v28 = vor.u32 1.1754944e-38, %v846_v11  ;;  %vm845_vm14 = vcmp.eq.f32.partialorder %v844_v24, 8.507059e+37 }
 0x262   :  { %vm864_vm15 = vcmp.eq.f32.partialorder %v863_v7, 8.507059e+37 }
 0x263   :  { %v1849_v8 = vpop.eup %1848 }
 0x264   :  { %v873_v18 = vadd.f32 1.0, %v1849_v8 }
 0x265   :  { %v1851_v20 = vpop.eup %1850 }
 0x266   :  { %v1853_v15 = vpop.eup %1852  ;;  %v836_v14 = vmul.f32 %v1851_v20, %v834_v9  ;;  %1854 = vrcp.f32 %v873_v18  ;;  %vm841_vm8 = vweird.f32 %v1851_v20  ;;  %v885_v11 = vand.u32 2147483648, %v873_v18 }
 0x267   :  { %v855_v16 = vmul.f32 %v1853_v15, %v853_v27  ;;  %1856 = vtanh.f32 %v829_v19  ;;  %vm860_vm9 = vweird.f32 %v1853_v15  ;;  %vm842_vm12 = vmor %vm840_vm10, %vm841_vm8  ;;  %vm879_vm1 = vweird.f32 %v873_v18 }
 0x268   :  { %v837_v21 = vsub.f32 1.0, %v836_v14  ;;  %vm861_vm13 = vmor %vm859_vm11, %vm860_vm9  ;;  %v866_v14 = vor.u32 1.1754944e-38, %v865_v23  ;;  %v886_v24 = vor.u32 1.1754944e-38, %v885_v11  ;;  %v3442_v11 = vld [vmem:[#allocation38_spill] sm:$0xff] }
 0x269   :  { %v856_v22 = vsub.f32 1.0, %v855_v16 }
 0x26a   :  { %v838_v10 = vmul.f32 %v1851_v20, %v837_v21 }
 0x26b   :  { %v857_v25 = vmul.f32 %v1853_v15, %v856_v22 }
 0x26c   :  { %v1855_v6 = vpop.eup %1854  ;;  %v839_v8 = vadd.f32 %v1851_v20, %v838_v10 }
 0x26d   :  { %v858_v17 = vadd.f32 %v1853_v15, %v857_v25  ;;  %v875_v5 = vmul.f32 %v1855_v6, %v873_v18  ;;  %v1857_v19 = vpop.eup %1856  ;;  %vm880_vm0 = vweird.f32 %v1855_v6  ;;  %v3431_v25 = vld [vmem:[#allocation27_spill] sm:$0xff] }
 0x26e   :  { %v843_v16 = vsel %vm842_vm12, %v1851_v20, %v839_v8  ;;  %v883_v20 = vand.u32 2147483647, %v873_v18  ;;  %vm881_vm2 = vmor %vm879_vm1, %vm880_vm0  ;;  %v3430_v18 = vld [vmem:[#allocation26_spill] sm:$0xff]  ;;  %v3432_v8 = vld [vmem:[#allocation29_spill] sm:$0xff] }
 0x26f   :  { %v848_v4 = vsel %vm845_vm14, %v847_v28, %v843_v16  ;;  %v862_v21 = vsel %vm861_vm13, %v1853_v15, %v858_v17  ;;  %v876_v3 = vsub.f32 1.0, %v875_v5  ;;  %v3433_v28 = vld [vmem:[#allocation28_spill] sm:$0xff]  ;;  %v3434_v17 = vld [vmem:[#allocation30_spill] sm:$0xff]  ;;  %v3436_v16 = vld [vmem:[#allocation33_spill] sm:$0xff] }
 0x270   :  { %v867_v22 = vsel %vm864_vm15, %v866_v14, %v862_v21  ;;  %v890_v2 = vmul.f32 %v1857_v19, %v848_v4  ;;  %vm884_vm3 = vcmp.eq.f32.partialorder %v883_v20, 8.507059e+37  ;;  %v3428_v4 = vld [vmem:[#allocation25_spill] sm:$0xff]  ;;  %v3435_v14 = vld [vmem:[#allocation31_spill] sm:$0xff]  ;;  %v3437_v19 = vld [vmem:[#allocation32_spill] sm:$0xff] }
 0x271   :  { %v889_v1 = vmul.f32 %v867_v22, %v2765_v12  ;;  %v877_v10 = vmul.f32 %v1855_v6, %v876_v3  ;;  %v3424_v12 = vld [vmem:[#allocation21_spill] sm:$0xff]  ;;  %v3427_v3 = vld [vmem:[#allocation23_spill] sm:$0xff]  ;;  %v3438_v21 = vld [vmem:[#allocation34_spill] sm:$0xff] }
 0x272   :  { %v3439_v22 = vld [vmem:[#allocation35_spill] sm:$0xff] }
 0x273   :  { %v2953_v9 = vadd.f32 %v890_v2, %v889_v1  ;;  %v878_v27 = vadd.f32 %v1855_v6, %v877_v10  ;;  %v3425_v1 = vld [vmem:[#allocation20_spill] sm:$0xff]  ;;  %v3426_v2 = vld [vmem:[#allocation22_spill] sm:$0xff]  ;;  %v3440_v10 = vld [vmem:[#allocation37_spill] sm:$0xff] }
 0x274   :  { %v3443_v20 = vld [vmem:[#allocation39_spill] sm:$0xff] }
 0x275   :  { %1858 = vtanh.f32 %v2953_v9  ;;  %v882_v23 = vsel %vm881_vm2, %v1855_v6, %v878_v27  ;;  %v3429_v6 = vld [vmem:[#allocation24_spill] sm:$0xff] }
 0x276   :  { %v887_v5 = vsel %vm884_vm3, %v886_v24, %v882_v23  ;;  %v3441_v27 = vld [vmem:[#allocation36_spill] sm:$0xff]  ;;  %v3017_v24 = vld [vmem:[#allocation7 + $0x38] sm:$0xff] }
 0x277   :  { %v3014_v23 = vld [vmem:[#allocation7 + $0x30] sm:$0xff]  ;;  %3445 = vst [vmem:[#allocation41_spill] sm:$0xff] %v3017_v24 }
 0x278   :  { %3444 = vst [vmem:[#allocation40_spill] sm:$0xff] %v3014_v23 }
 0x27b   :  { %v1859_v7 = vpop.eup %1858 }
 0x27c   :  { %v893_v15 = vmul.f32 %v1859_v7, %v887_v5  ;;  %v3020_v7 = vld [vmem:[#allocation7] sm:$0xff]  ;;  %v3023_v5 = vld [vmem:[#allocation7 + $0x8] sm:$0xff] }
 0x27d   :  { %3446 = vst [vmem:[#allocation42_spill] sm:$0xff] %v3020_v7 }
 0x27e   :  { %910 = vmatmul.f32.vlgmr.msra.gmra.mxu0 %v893_v15  ;;  %930 = vmatmul.f32.vlgmr.msra.gmra.mxu1 %v893_v15  ;;  %3447 = vst [vmem:[#allocation43_spill] sm:$0xff] %v3023_v5 }
 0x27f   :  { %950 = vmatmul.f32.vlgmr.msra.gmra.mxu2 %v893_v15  ;;  %970 = vmatmul.f32.vlgmr.msra.gmra.mxu3 %v893_v15  ;;  %v3026_v15 = vld [vmem:[#allocation7 + $0x10] sm:$0xff] }
 0x280   :  { %1188 = vmatpush.msra.mxu0 %v2768_v26  ;;  %1208 = vmatpush.msra.mxu1 %v2771_v29  ;;  %3448 = vst [vmem:[#allocation44_spill] sm:$0xff] %v3026_v15 }
 0x281   :  { %1228 = vmatpush.msra.mxu2 %v2774_v30  ;;  %1248 = vmatpush.msra.mxu3 %v2777_v31 }
 0x282   :  { %1189 = vmatpush.msra.mxu0 %v2780_v32  ;;  %1209 = vmatpush.msra.mxu1 %v2783_v33 }
 0x283   :  { %1229 = vmatpush.msra.mxu2 %v2786_v34  ;;  %1249 = vmatpush.msra.mxu3 %v2789_v35 }
 0x284   :  { %1190 = vmatpush.msra.mxu0 %v2792_v36  ;;  %1210 = vmatpush.msra.mxu1 %v2795_v37 }
 0x285   :  { %1230 = vmatpush.msra.mxu2 %v2798_v38  ;;  %1250 = vmatpush.msra.mxu3 %v2801_v40 }
 0x286   :  { %1191 = vmatpush.msra.mxu0 %v2804_v41  ;;  %1211 = vmatpush.msra.mxu1 %v2807_v42 }
 0x287   :  { %1231 = vmatpush.msra.mxu2 %v2810_v43  ;;  %1251 = vmatpush.msra.mxu3 %v2813_v47 }
 0x288   :  { %1192 = vmatpush.msra.mxu0 %v2816_v0  ;;  %1212 = vmatpush.msra.mxu1 %v2819_v46 }
 0x289   :  { %1232 = vmatpush.msra.mxu2 %v2822_v60  ;;  %1252 = vmatpush.msra.mxu3 %v2825_v13 }
 0x28a   :  { %1193 = vmatpush.msra.mxu0 %v2828_v61  ;;  %1213 = vmatpush.msra.mxu1 %v2831_v39 }
 0x28b   :  { %1233 = vmatpush.msra.mxu2 %v2834_v50  ;;  %1253 = vmatpush.msra.mxu3 %v2837_v63 }
 0x28c   :  { %1194 = vmatpush.msra.mxu0 %v2840_v49  ;;  %1214 = vmatpush.msra.mxu1 %v2843_v44 }
 0x28d   :  { %1234 = vmatpush.msra.mxu2 %v2846_v45  ;;  %1254 = vmatpush.msra.mxu3 %v2849_v52 }
 0x28e   :  { %1195 = vmatpush.msra.mxu0 %v2852_v51  ;;  %1215 = vmatpush.msra.mxu1 %v2855_v56 }
 0x28f   :  { %1235 = vmatpush.msra.mxu2 %v2858_v53  ;;  %1255 = vmatpush.msra.mxu3 %v2861_v48 }
 0x290   :  { %1196 = vmatpush.msra.mxu0 %v2864_v54  ;;  %1216 = vmatpush.msra.mxu1 %v2867_v57 }
 0x291   :  { %1236 = vmatpush.msra.mxu2 %v2870_v58  ;;  %1256 = vmatpush.msra.mxu3 %v2873_v62 }
 0x292   :  { %1197 = vmatpush.msra.mxu0 %v2876_v59  ;;  %1217 = vmatpush.msra.mxu1 %v2879_v55 }
 0x293   :  { %1237 = vmatpush.msra.mxu2 %v3424_v12  ;;  %1257 = vmatpush.msra.mxu3 %v3425_v1 }
 0x294   :  { %1198 = vmatpush.msra.mxu0 %v3426_v2  ;;  %1218 = vmatpush.msra.mxu1 %v3427_v3 }
 0x295   :  { %1238 = vmatpush.msra.mxu2 %v3428_v4  ;;  %1258 = vmatpush.msra.mxu3 %v3429_v6 }
 0x296   :  { %1199 = vmatpush.msra.mxu0 %v3430_v18  ;;  %1219 = vmatpush.msra.mxu1 %v3431_v25 }
 0x297   :  { %1239 = vmatpush.msra.mxu2 %v3432_v8  ;;  %1259 = vmatpush.msra.mxu3 %v3433_v28 }
 0x298   :  { %1200 = vmatpush.msra.mxu0 %v3434_v17  ;;  %1220 = vmatpush.msra.mxu1 %v3435_v14 }
 0x299   :  { %1240 = vmatpush.msra.mxu2 %v3436_v16  ;;  %1260 = vmatpush.msra.mxu3 %v3437_v19 }
 0x29a   :  { %1201 = vmatpush.msra.mxu0 %v3438_v21  ;;  %1221 = vmatpush.msra.mxu1 %v3439_v22 }
 0x29b   :  { %1241 = vmatpush.msra.mxu2 %v3440_v10  ;;  %1261 = vmatpush.msra.mxu3 %v3441_v27  ;;  %v3450_v27 = vld [vmem:[#allocation54_spill] sm:$0xff]  ;;  %v3451_v10 = vld [vmem:[#allocation55_spill] sm:$0xff] }
 0x29c   :  { %1202 = vmatpush.msra.mxu0 %v3442_v11  ;;  %1222 = vmatpush.msra.mxu1 %v3443_v20  ;;  %v3029_v20 = vld [vmem:[#allocation7 + $0x18] sm:$0xff] }
 0x29d   :  { %1242 = vmatpush.msra.mxu2 %v3014_v23  ;;  %1262 = vmatpush.msra.mxu3 %v3017_v24  ;;  %3449 = vst [vmem:[#allocation45_spill] sm:$0xff] %v3029_v20 }
 0x29e   :  { %1203 = vmatpush.msra.mxu0 %v3020_v7  ;;  %1223 = vmatpush.msra.mxu1 %v3023_v5  ;;  %v3452_v5 = vld [vmem:[#allocation57_spill] sm:$0xff] }
 0x29f   :  { %1243 = vmatpush.msra.mxu2 %v3026_v15  ;;  %1263 = vmatpush.msra.mxu3 %v3029_v20 }
 0x2fb   :  { %v911_v23 = vpop.f32.mrf.mxu0  ;;  %v931_v11 = vpop.f32.mrf.mxu1 }
 0x2fc   :  { %v974_v24 = vadd.f32 %v911_v23, %v3450_v27  ;;  %v975_v22 = vadd.f32 %v931_v11, %v3451_v10  ;;  %v3453_v10 = vld [vmem:[#allocation56_spill] sm:$0xff] }
 0x2fe   :  { %v1781_v21 = vmul.f32 -1.442695, %v974_v24  ;;  %v1782_v7 = vmul.f32 -1.442695, %v975_v22 }
 0x300   :  { %1860 = vpow2.f32 %v1781_v21 }
 0x301   :  { %1862 = vpow2.f32 %v1782_v7 }
 0x302   :  { %v971_v19 = vpop.f32.mrf.mxu3  ;;  %v951_v20 = vpop.f32.mrf.mxu2 }
 0x303   :  { %v977_v16 = vadd.f32 %v971_v19, %v3452_v5  ;;  %v976_v11 = vadd.f32 %v951_v20, %v3453_v10 }
 0x305   :  { %v1783_v14 = vmul.f32 -1.442695, %v977_v16 }
 0x306   :  { %v1861_v17 = vpop.eup %1860 }
 0x307   :  { %v1863_v15 = vpop.eup %1862  ;;  %v981_v28 = vadd.f32 1.0, %v1861_v17  ;;  %1864 = vpow2.f32 %v1783_v14 }
 0x308   :  { %v1000_v8 = vadd.f32 1.0, %v1863_v15 }
 0x309   :  { %1866 = vrcp.f32 %v981_v28  ;;  %v993_v16 = vand.u32 2147483648, %v981_v28  ;;  %v991_v14 = vand.u32 2147483647, %v981_v28  ;;  %vm987_vm6 = vweird.f32 %v981_v28 }
 0x30a   :  { %1868 = vrcp.f32 %v1000_v8  ;;  %v1012_v5 = vand.u32 2147483648, %v1000_v8  ;;  %v1010_v18 = vand.u32 2147483647, %v1000_v8  ;;  %vm1006_vm7 = vweird.f32 %v1000_v8 }
 0x30b   :  { %v994_v20 = vor.u32 1.1754944e-38, %v993_v16  ;;  %vm992_vm10 = vcmp.eq.f32.partialorder %v991_v14, 8.507059e+37 }
 0x30c   :  { %vm1011_vm11 = vcmp.eq.f32.partialorder %v1010_v18, 8.507059e+37 }
 0x30d   :  { %v1865_v25 = vpop.eup %1864 }
 0x30e   :  { %v1020_v27 = vadd.f32 1.0, %v1865_v25 }
 0x30f   :  { %v1867_v23 = vpop.eup %1866 }
 0x310   :  { %v1869_v22 = vpop.eup %1868  ;;  %v983_v21 = vmul.f32 %v1867_v23, %v981_v28  ;;  %1870 = vrcp.f32 %v1020_v27  ;;  %vm988_vm4 = vweird.f32 %v1867_v23  ;;  %v1032_v16 = vand.u32 2147483648, %v1020_v27 }
 0x311   :  { %v1002_v24 = vmul.f32 %v1869_v22, %v1000_v8  ;;  %1872 = vtanh.f32 %v976_v11  ;;  %vm1007_vm5 = vweird.f32 %v1869_v22  ;;  %vm989_vm8 = vmor %vm987_vm6, %vm988_vm4  ;;  %vm1026_vm13 = vweird.f32 %v1020_v27 }
 0x312   :  { %v984_v7 = vsub.f32 1.0, %v983_v21  ;;  %vm1008_vm9 = vmor %vm1006_vm7, %vm1007_vm5  ;;  %v1013_v21 = vor.u32 1.1754944e-38, %v1012_v5  ;;  %v1033_v14 = vor.u32 1.1754944e-38, %v1032_v16  ;;  %v3472_v16 = vld [vmem:[#allocation38_spill] sm:$0xff] }
 0x313   :  { %v1003_v19 = vsub.f32 1.0, %v1002_v24 }
 0x314   :  { %v985_v17 = vmul.f32 %v1867_v23, %v984_v7 }
 0x315   :  { %v1004_v15 = vmul.f32 %v1869_v22, %v1003_v19 }
 0x316   :  { %v1871_v6 = vpop.eup %1870  ;;  %v986_v25 = vadd.f32 %v1867_v23, %v985_v17 }
 0x317   :  { %v1005_v10 = vadd.f32 %v1869_v22, %v1004_v15  ;;  %v1022_v4 = vmul.f32 %v1871_v6, %v1020_v27  ;;  %v1873_v11 = vpop.eup %1872  ;;  %vm1027_vm12 = vweird.f32 %v1871_v6  ;;  %v3461_v15 = vld [vmem:[#allocation27_spill] sm:$0xff] }
 0x318   :  { %v990_v24 = vsel %vm989_vm8, %v1867_v23, %v986_v25  ;;  %v1030_v23 = vand.u32 2147483647, %v1020_v27  ;;  %vm1028_vm14 = vmor %vm1026_vm13, %vm1027_vm12  ;;  %v3460_v27 = vld [vmem:[#allocation26_spill] sm:$0xff]  ;;  %v3462_v25 = vld [vmem:[#allocation29_spill] sm:$0xff] }
 0x319   :  { %v995_v3 = vsel %vm992_vm10, %v994_v20, %v990_v24  ;;  %v1009_v7 = vsel %vm1008_vm9, %v1869_v22, %v1005_v10  ;;  %v1023_v2 = vsub.f32 1.0, %v1022_v4  ;;  %v3463_v20 = vld [vmem:[#allocation28_spill] sm:$0xff]  ;;  %v3464_v10 = vld [vmem:[#allocation30_spill] sm:$0xff]  ;;  %v3466_v24 = vld [vmem:[#allocation33_spill] sm:$0xff] }
 0x31a   :  { %v1014_v19 = vsel %vm1011_vm11, %v1013_v21, %v1009_v7  ;;  %v1037_v1 = vmul.f32 %v1873_v11, %v995_v3  ;;  %vm1031_vm15 = vcmp.eq.f32.partialorder %v1030_v23, 8.507059e+37  ;;  %v3458_v3 = vld [vmem:[#allocation25_spill] sm:$0xff]  ;;  %v3465_v21 = vld [vmem:[#allocation31_spill] sm:$0xff]  ;;  %v3467_v11 = vld [vmem:[#allocation32_spill] sm:$0xff] }
 0x31b   :  { %v1036_v12 = vmul.f32 %v1014_v19, %v2953_v9  ;;  %v1024_v17 = vmul.f32 %v1871_v6, %v1023_v2  ;;  %v3454_v9 = vld [vmem:[#allocation21_spill] sm:$0xff]  ;;  %v3457_v2 = vld [vmem:[#allocation23_spill] sm:$0xff]  ;;  %v3468_v7 = vld [vmem:[#allocation34_spill] sm:$0xff] }
 0x31c   :  { %v3469_v19 = vld [vmem:[#allocation35_spill] sm:$0xff] }
 0x31d   :  { %v3037_v28 = vadd.f32 %v1037_v1, %v1036_v12  ;;  %v1025_v8 = vadd.f32 %v1871_v6, %v1024_v17  ;;  %v3455_v12 = vld [vmem:[#allocation20_spill] sm:$0xff]  ;;  %v3456_v1 = vld [vmem:[#allocation22_spill] sm:$0xff]  ;;  %v3470_v17 = vld [vmem:[#allocation37_spill] sm:$0xff] }
 0x31e   :  { %v3473_v23 = vld [vmem:[#allocation39_spill] sm:$0xff] }
 0x31f   :  { %1874 = vtanh.f32 %v3037_v28  ;;  %v1029_v5 = vsel %vm1028_vm14, %v1871_v6, %v1025_v8  ;;  %v3459_v6 = vld [vmem:[#allocation24_spill] sm:$0xff] }
 0x320   :  { %v1034_v4 = vsel %vm1031_vm15, %v1033_v14, %v1029_v5  ;;  %v3471_v8 = vld [vmem:[#allocation36_spill] sm:$0xff]  ;;  %v3475_v14 = vld [vmem:[#allocation41_spill] sm:$0xff] }
 0x321   :  { %v3474_v5 = vld [vmem:[#allocation40_spill] sm:$0xff] }
 0x325   :  { %v1875_v18 = vpop.eup %1874 }
 0x326   :  { %v1040_v22 = vmul.f32 %v1875_v18, %v1034_v4  ;;  %v3476_v18 = vld [vmem:[#allocation42_spill] sm:$0xff]  ;;  %v3477_v4 = vld [vmem:[#allocation43_spill] sm:$0xff] }
 0x328   :  { %1057 = vmatmul.f32.vlgmr.msrb.gmra.mxu0 %v1040_v22  ;;  %1077 = vmatmul.f32.vlgmr.msrb.gmra.mxu1 %v1040_v22 }
 0x329   :  { %1097 = vmatmul.f32.vlgmr.msrb.gmra.mxu2 %v1040_v22  ;;  %1117 = vmatmul.f32.vlgmr.msrb.gmra.mxu3 %v1040_v22  ;;  %v3478_v22 = vld [vmem:[#allocation44_spill] sm:$0xff] }
 0x32a   :  { %1335 = vmatpush.msrb.mxu0 %v2768_v26  ;;  %1355 = vmatpush.msrb.mxu1 %v2771_v29 }
 0x32b   :  { %1375 = vmatpush.msrb.mxu2 %v2774_v30  ;;  %1395 = vmatpush.msrb.mxu3 %v2777_v31 }
 0x32c   :  { %1336 = vmatpush.msrb.mxu0 %v2780_v32  ;;  %1356 = vmatpush.msrb.mxu1 %v2783_v33 }
 0x32d   :  { %1376 = vmatpush.msrb.mxu2 %v2786_v34  ;;  %1396 = vmatpush.msrb.mxu3 %v2789_v35 }
 0x32e   :  { %1337 = vmatpush.msrb.mxu0 %v2792_v36  ;;  %1357 = vmatpush.msrb.mxu1 %v2795_v37 }
 0x32f   :  { %1377 = vmatpush.msrb.mxu2 %v2798_v38  ;;  %1397 = vmatpush.msrb.mxu3 %v2801_v40 }
 0x330   :  { %1338 = vmatpush.msrb.mxu0 %v2804_v41  ;;  %1358 = vmatpush.msrb.mxu1 %v2807_v42 }
 0x331   :  { %1378 = vmatpush.msrb.mxu2 %v2810_v43  ;;  %1398 = vmatpush.msrb.mxu3 %v2813_v47 }
 0x332   :  { %1339 = vmatpush.msrb.mxu0 %v2816_v0  ;;  %1359 = vmatpush.msrb.mxu1 %v2819_v46 }
 0x333   :  { %1379 = vmatpush.msrb.mxu2 %v2822_v60  ;;  %1399 = vmatpush.msrb.mxu3 %v2825_v13 }
 0x334   :  { %1340 = vmatpush.msrb.mxu0 %v2828_v61  ;;  %1360 = vmatpush.msrb.mxu1 %v2831_v39 }
 0x335   :  { %1380 = vmatpush.msrb.mxu2 %v2834_v50  ;;  %1400 = vmatpush.msrb.mxu3 %v2837_v63 }
 0x336   :  { %1341 = vmatpush.msrb.mxu0 %v2840_v49  ;;  %1361 = vmatpush.msrb.mxu1 %v2843_v44 }
 0x337   :  { %1381 = vmatpush.msrb.mxu2 %v2846_v45  ;;  %1401 = vmatpush.msrb.mxu3 %v2849_v52 }
 0x338   :  { %1342 = vmatpush.msrb.mxu0 %v2852_v51  ;;  %1362 = vmatpush.msrb.mxu1 %v2855_v56 }
 0x339   :  { %1382 = vmatpush.msrb.mxu2 %v2858_v53  ;;  %1402 = vmatpush.msrb.mxu3 %v2861_v48 }
 0x33a   :  { %1343 = vmatpush.msrb.mxu0 %v2864_v54  ;;  %1363 = vmatpush.msrb.mxu1 %v2867_v57 }
 0x33b   :  { %1383 = vmatpush.msrb.mxu2 %v2870_v58  ;;  %1403 = vmatpush.msrb.mxu3 %v2873_v62 }
 0x33c   :  { %1344 = vmatpush.msrb.mxu0 %v2876_v59  ;;  %1364 = vmatpush.msrb.mxu1 %v2879_v55 }
 0x33d   :  { %1384 = vmatpush.msrb.mxu2 %v3454_v9  ;;  %1404 = vmatpush.msrb.mxu3 %v3455_v12 }
 0x33e   :  { %1345 = vmatpush.msrb.mxu0 %v3456_v1  ;;  %1365 = vmatpush.msrb.mxu1 %v3457_v2 }
 0x33f   :  { %1385 = vmatpush.msrb.mxu2 %v3458_v3  ;;  %1405 = vmatpush.msrb.mxu3 %v3459_v6 }
 0x340   :  { %1346 = vmatpush.msrb.mxu0 %v3460_v27  ;;  %1366 = vmatpush.msrb.mxu1 %v3461_v15 }
 0x341   :  { %1386 = vmatpush.msrb.mxu2 %v3462_v25  ;;  %1406 = vmatpush.msrb.mxu3 %v3463_v20 }
 0x342   :  { %1347 = vmatpush.msrb.mxu0 %v3464_v10  ;;  %1367 = vmatpush.msrb.mxu1 %v3465_v21 }
 0x343   :  { %1387 = vmatpush.msrb.mxu2 %v3466_v24  ;;  %1407 = vmatpush.msrb.mxu3 %v3467_v11  ;;  %v3480_v11 = vld [vmem:[#allocation58_spill] sm:$0xff]  ;;  %v3481_v24 = vld [vmem:[#allocation59_spill] sm:$0xff] }
 0x344   :  { %1348 = vmatpush.msrb.mxu0 %v3468_v7  ;;  %1368 = vmatpush.msrb.mxu1 %v3469_v19  ;;  %v3479_v7 = vld [vmem:[#allocation45_spill] sm:$0xff] }
 0x345   :  { %1388 = vmatpush.msrb.mxu2 %v3470_v17  ;;  %1408 = vmatpush.msrb.mxu3 %v3471_v8 }
 0x346   :  { %1349 = vmatpush.msrb.mxu0 %v3472_v16  ;;  %1369 = vmatpush.msrb.mxu1 %v3473_v23 }
 0x347   :  { %1389 = vmatpush.msrb.mxu2 %v3474_v5  ;;  %1409 = vmatpush.msrb.mxu3 %v3475_v14  ;;  %v3482_v14 = vld [vmem:[#allocation61_spill] sm:$0xff] }
 0x348   :  { %1350 = vmatpush.msrb.mxu0 %v3476_v18  ;;  %1370 = vmatpush.msrb.mxu1 %v3477_v4 }
 0x349   :  { %1390 = vmatpush.msrb.mxu2 %v3478_v22  ;;  %1410 = vmatpush.msrb.mxu3 %v3479_v7 }
 0x3a5   :  { %v1058_v19 = vpop.f32.mrf.mxu0  ;;  %v1078_v17 = vpop.f32.mrf.mxu1 }
 0x3a6   :  { %v1121_v8 = vadd.f32 %v1058_v19, %v3480_v11  ;;  %v1122_v16 = vadd.f32 %v1078_v17, %v3481_v24  ;;  %v3483_v24 = vld [vmem:[#allocation60_spill] sm:$0xff] }
 0x3a8   :  { %v1784_v21 = vmul.f32 -1.442695, %v1121_v8  ;;  %v1785_v23 = vmul.f32 -1.442695, %v1122_v16 }
 0x3aa   :  { %1876 = vpow2.f32 %v1784_v21 }
 0x3ab   :  { %1878 = vpow2.f32 %v1785_v23 }
 0x3ac   :  { %v1118_v5 = vpop.f32.mrf.mxu3  ;;  %v1098_v7 = vpop.f32.mrf.mxu2 }
 0x3ad   :  { %v1124_v10 = vadd.f32 %v1118_v5, %v3482_v14  ;;  %v1123_v17 = vadd.f32 %v1098_v7, %v3483_v24 }
 0x3af   :  { %v1786_v18 = vmul.f32 -1.442695, %v1124_v10 }
 0x3b0   :  { %v1877_v20 = vpop.eup %1876 }
 0x3b1   :  { %v1879_v4 = vpop.eup %1878  ;;  %v1128_v25 = vadd.f32 1.0, %v1877_v20  ;;  %1880 = vpow2.f32 %v1786_v18 }
 0x3b2   :  { %v1147_v22 = vadd.f32 1.0, %v1879_v4 }
 0x3b3   :  { %1882 = vrcp.f32 %v1128_v25  ;;  %v1140_v10 = vand.u32 2147483648, %v1128_v25  ;;  %v1138_v18 = vand.u32 2147483647, %v1128_v25  ;;  %vm1134_vm2 = vweird.f32 %v1128_v25 }
 0x3b4   :  { %1884 = vrcp.f32 %v1147_v22  ;;  %v1159_v14 = vand.u32 2147483648, %v1147_v22  ;;  %v1157_v27 = vand.u32 2147483647, %v1147_v22  ;;  %vm1153_vm3 = vweird.f32 %v1147_v22 }
 0x3b5   :  { %v1141_v7 = vor.u32 1.1754944e-38, %v1140_v10  ;;  %vm1139_vm6 = vcmp.eq.f32.partialorder %v1138_v18, 8.507059e+37 }
 0x3b6   :  { %vm1158_vm7 = vcmp.eq.f32.partialorder %v1157_v27, 8.507059e+37 }
 0x3b7   :  { %v1881_v15 = vpop.eup %1880 }
 0x3b8   :  { %v1167_v11 = vadd.f32 1.0, %v1881_v15 }
 0x3b9   :  { %v1883_v19 = vpop.eup %1882 }
 0x3ba   :  { %v1885_v8 = vpop.eup %1884  ;;  %v1130_v21 = vmul.f32 %v1883_v19, %v1128_v25  ;;  %1886 = vrcp.f32 %v1167_v11  ;;  %vm1135_vm0 = vweird.f32 %v1883_v19  ;;  %v1179_v10 = vand.u32 2147483648, %v1167_v11 }
 0x3bb   :  { %v1149_v16 = vmul.f32 %v1885_v8, %v1147_v22  ;;  %1888 = vtanh.f32 %v1123_v17  ;;  %vm1154_vm1 = vweird.f32 %v1885_v8  ;;  %vm1136_vm4 = vmor %vm1134_vm2, %vm1135_vm0  ;;  %vm1173_vm9 = vweird.f32 %v1167_v11 }
 0x3bc   :  { %v1131_v23 = vsub.f32 1.0, %v1130_v21  ;;  %vm1155_vm5 = vmor %vm1153_vm3, %vm1154_vm1  ;;  %v1160_v21 = vor.u32 1.1754944e-38, %v1159_v14  ;;  %v1180_v18 = vor.u32 1.1754944e-38, %v1179_v10 }
 0x3bd   :  { %v1150_v5 = vsub.f32 1.0, %v1149_v16 }
 0x3be   :  { %v1132_v20 = vmul.f32 %v1883_v19, %v1131_v23 }
 0x3bf   :  { %v1151_v4 = vmul.f32 %v1885_v8, %v1150_v5 }
 0x3c0   :  { %v1887_v6 = vpop.eup %1886  ;;  %v1133_v15 = vadd.f32 %v1883_v19, %v1132_v20 }
 0x3c1   :  { %v1152_v24 = vadd.f32 %v1885_v8, %v1151_v4  ;;  %v1169_v3 = vmul.f32 %v1887_v6, %v1167_v11  ;;  %v1889_v17 = vpop.eup %1888  ;;  %vm1174_vm8 = vweird.f32 %v1887_v6 }
 0x3c2   :  { %v1137_v16 = vsel %vm1136_vm4, %v1883_v19, %v1133_v15  ;;  %v1177_v19 = vand.u32 2147483647, %v1167_v11  ;;  %vm1175_vm10 = vmor %vm1173_vm9, %vm1174_vm8  ;;  %v3513_v15 = vld [vmem:[#allocation64_spill] sm:$0xff] }
 0x3c3   :  { %v1142_v2 = vsel %vm1139_vm6, %v1141_v7, %v1137_v16  ;;  %v1156_v23 = vsel %vm1155_vm5, %v1885_v8, %v1152_v24  ;;  %v1170_v1 = vsub.f32 1.0, %v1169_v3 }
 0x3c4   :  { %v1161_v5 = vsel %vm1158_vm7, %v1160_v21, %v1156_v23  ;;  %v1184_v12 = vmul.f32 %v1889_v17, %v1142_v2  ;;  %vm1178_vm11 = vcmp.eq.f32.partialorder %v1177_v19, 8.507059e+37 }
 0x3c5   :  { %v1183_v9 = vmul.f32 %v1161_v5, %v3037_v28  ;;  %v1171_v20 = vmul.f32 %v1887_v6, %v1170_v1 }
 0x3c7   :  { %v3109_v25 = vadd.f32 %v1184_v12, %v1183_v9  ;;  %v1172_v22 = vadd.f32 %v1887_v6, %v1171_v20 }
 0x3c9   :  { %1890 = vtanh.f32 %v3109_v25  ;;  %v1176_v14 = vsel %vm1175_vm10, %v1887_v6, %v1172_v22 }
 0x3ca   :  { %v1181_v3 = vsel %vm1178_vm11, %v1180_v18, %v1176_v14 }
 0x3cf   :  { %v1891_v27 = vpop.eup %1890 }
 0x3d0   :  { %v1187_v8 = vmul.f32 %v1891_v27, %v1181_v3 }
 0x3d2   :  { %1204 = vmatmul.f32.vlgmr.msra.gmra.mxu0 %v1187_v8  ;;  %1224 = vmatmul.f32.vlgmr.msra.gmra.mxu1 %v1187_v8 }
 0x3d3   :  { %1244 = vmatmul.f32.vlgmr.msra.gmra.mxu2 %v1187_v8  ;;  %1264 = vmatmul.f32.vlgmr.msra.gmra.mxu3 %v1187_v8 }
 0x3d4   :  { %1482 = vmatpush.msra.mxu0 %v2768_v26  ;;  %1502 = vmatpush.msra.mxu1 %v2771_v29  ;;  %v3484_v26 = vld [vmem:[#allocation21_spill] sm:$0xff]  ;;  %v3485_v29 = vld [vmem:[#allocation20_spill] sm:$0xff] }
 0x3d5   :  { %1522 = vmatpush.msra.mxu2 %v2774_v30  ;;  %1542 = vmatpush.msra.mxu3 %v2777_v31  ;;  %v3486_v30 = vld [vmem:[#allocation22_spill] sm:$0xff]  ;;  %v3487_v31 = vld [vmem:[#allocation23_spill] sm:$0xff] }
 0x3d6   :  { %1483 = vmatpush.msra.mxu0 %v2780_v32  ;;  %1503 = vmatpush.msra.mxu1 %v2783_v33  ;;  %v3488_v32 = vld [vmem:[#allocation25_spill] sm:$0xff]  ;;  %v3489_v33 = vld [vmem:[#allocation24_spill] sm:$0xff] }
 0x3d7   :  { %1523 = vmatpush.msra.mxu2 %v2786_v34  ;;  %1543 = vmatpush.msra.mxu3 %v2789_v35  ;;  %v3490_v34 = vld [vmem:[#allocation26_spill] sm:$0xff]  ;;  %v3491_v35 = vld [vmem:[#allocation27_spill] sm:$0xff] }
 0x3d8   :  { %1484 = vmatpush.msra.mxu0 %v2792_v36  ;;  %1504 = vmatpush.msra.mxu1 %v2795_v37  ;;  %v3492_v36 = vld [vmem:[#allocation29_spill] sm:$0xff]  ;;  %v3493_v37 = vld [vmem:[#allocation28_spill] sm:$0xff] }
 0x3d9   :  { %1524 = vmatpush.msra.mxu2 %v2798_v38  ;;  %1544 = vmatpush.msra.mxu3 %v2801_v40  ;;  %v3494_v38 = vld [vmem:[#allocation30_spill] sm:$0xff]  ;;  %v3495_v40 = vld [vmem:[#allocation31_spill] sm:$0xff] }
 0x3da   :  { %1485 = vmatpush.msra.mxu0 %v2804_v41  ;;  %1505 = vmatpush.msra.mxu1 %v2807_v42  ;;  %v3496_v41 = vld [vmem:[#allocation33_spill] sm:$0xff]  ;;  %v3497_v42 = vld [vmem:[#allocation32_spill] sm:$0xff] }
 0x3db   :  { %1525 = vmatpush.msra.mxu2 %v2810_v43  ;;  %1545 = vmatpush.msra.mxu3 %v2813_v47  ;;  %v3498_v43 = vld [vmem:[#allocation34_spill] sm:$0xff]  ;;  %v3499_v47 = vld [vmem:[#allocation35_spill] sm:$0xff] }
 0x3dc   :  { %1486 = vmatpush.msra.mxu0 %v2816_v0  ;;  %1506 = vmatpush.msra.mxu1 %v2819_v46  ;;  %v3500_v0 = vld [vmem:[#allocation37_spill] sm:$0xff]  ;;  %v3501_v46 = vld [vmem:[#allocation36_spill] sm:$0xff] }
 0x3dd   :  { %1526 = vmatpush.msra.mxu2 %v2822_v60  ;;  %1546 = vmatpush.msra.mxu3 %v2825_v13  ;;  %v3502_v60 = vld [vmem:[#allocation38_spill] sm:$0xff]  ;;  %v3503_v13 = vld [vmem:[#allocation39_spill] sm:$0xff] }
 0x3de   :  { %1487 = vmatpush.msra.mxu0 %v2828_v61  ;;  %1507 = vmatpush.msra.mxu1 %v2831_v39  ;;  %v3504_v61 = vld [vmem:[#allocation40_spill] sm:$0xff]  ;;  %v3505_v39 = vld [vmem:[#allocation41_spill] sm:$0xff] }
 0x3df   :  { %1527 = vmatpush.msra.mxu2 %v2834_v50  ;;  %1547 = vmatpush.msra.mxu3 %v2837_v63  ;;  %v3506_v50 = vld [vmem:[#allocation42_spill] sm:$0xff]  ;;  %v3507_v63 = vld [vmem:[#allocation43_spill] sm:$0xff] }
 0x3e0   :  { %1488 = vmatpush.msra.mxu0 %v2840_v49  ;;  %1508 = vmatpush.msra.mxu1 %v2843_v44  ;;  %v3508_v49 = vld [vmem:[#allocation44_spill] sm:$0xff]  ;;  %v3509_v44 = vld [vmem:[#allocation45_spill] sm:$0xff] }
 0x3e1   :  { %1528 = vmatpush.msra.mxu2 %v2846_v45  ;;  %1548 = vmatpush.msra.mxu3 %v2849_v52 }
 0x3e2   :  { %1489 = vmatpush.msra.mxu0 %v2852_v51  ;;  %1509 = vmatpush.msra.mxu1 %v2855_v56  ;;  %v3510_v51 = vld [vmem:[#allocation62_spill] sm:$0xff] }
 0x3e3   :  { %1529 = vmatpush.msra.mxu2 %v2858_v53  ;;  %1549 = vmatpush.msra.mxu3 %v2861_v48  ;;  %v3511_v53 = vld [vmem:[#allocation63_spill] sm:$0xff] }
 0x3e4   :  { %1490 = vmatpush.msra.mxu0 %v2864_v54  ;;  %1510 = vmatpush.msra.mxu1 %v2867_v57 }
 0x3e5   :  { %1530 = vmatpush.msra.mxu2 %v2870_v58  ;;  %1550 = vmatpush.msra.mxu3 %v2873_v62  ;;  %v3512_v62 = vld [vmem:[#allocation65_spill] sm:$0xff] }
 0x3e6   :  { %1491 = vmatpush.msra.mxu0 %v2876_v59  ;;  %1511 = vmatpush.msra.mxu1 %v2879_v55 }
 0x3e7   :  { %1531 = vmatpush.msra.mxu2 %v3484_v26  ;;  %1551 = vmatpush.msra.mxu3 %v3485_v29 }
 0x3e8   :  { %1492 = vmatpush.msra.mxu0 %v3486_v30  ;;  %1512 = vmatpush.msra.mxu1 %v3487_v31 }
 0x3e9   :  { %1532 = vmatpush.msra.mxu2 %v3488_v32  ;;  %1552 = vmatpush.msra.mxu3 %v3489_v33 }
 0x3ea   :  { %1493 = vmatpush.msra.mxu0 %v3490_v34  ;;  %1513 = vmatpush.msra.mxu1 %v3491_v35 }
 0x3eb   :  { %1533 = vmatpush.msra.mxu2 %v3492_v36  ;;  %1553 = vmatpush.msra.mxu3 %v3493_v37 }
 0x3ec   :  { %1494 = vmatpush.msra.mxu0 %v3494_v38  ;;  %1514 = vmatpush.msra.mxu1 %v3495_v40 }
 0x3ed   :  { %1534 = vmatpush.msra.mxu2 %v3496_v41  ;;  %1554 = vmatpush.msra.mxu3 %v3497_v42 }
 0x3ee   :  { %1495 = vmatpush.msra.mxu0 %v3498_v43  ;;  %1515 = vmatpush.msra.mxu1 %v3499_v47 }
 0x3ef   :  { %1535 = vmatpush.msra.mxu2 %v3500_v0  ;;  %1555 = vmatpush.msra.mxu3 %v3501_v46 }
 0x3f0   :  { %1496 = vmatpush.msra.mxu0 %v3502_v60  ;;  %1516 = vmatpush.msra.mxu1 %v3503_v13 }
 0x3f1   :  { %1536 = vmatpush.msra.mxu2 %v3504_v61  ;;  %1556 = vmatpush.msra.mxu3 %v3505_v39  ;;  %v3514_v39 = vld [vmem:[#allocation66_spill] sm:$0xff] }
 0x3f2   :  { %1497 = vmatpush.msra.mxu0 %v3506_v50  ;;  %1517 = vmatpush.msra.mxu1 %v3507_v63  ;;  %v3515_v63 = vld [vmem:[#allocation67_spill] sm:$0xff] }
 0x3f3   :  { %1537 = vmatpush.msra.mxu2 %v3508_v49  ;;  %1557 = vmatpush.msra.mxu3 %v3509_v44 }
 0x44f   :  { %v1205_v45 = vpop.f32.mrf.mxu0  ;;  %v1225_v52 = vpop.f32.mrf.mxu1 }
 0x450   :  { %v1268_v56 = vadd.f32 %v1205_v45, %v3510_v51  ;;  %v1269_v48 = vadd.f32 %v1225_v52, %v3511_v53  ;;  %v3516_v51 = vld [vmem:[#allocation69_spill] sm:$0xff] }
 0x452   :  { %v1787_v54 = vmul.f32 -1.442695, %v1268_v56  ;;  %v1788_v57 = vmul.f32 -1.442695, %v1269_v48 }
 0x454   :  { %1892 = vpow2.f32 %v1787_v54 }
 0x455   :  { %1894 = vpow2.f32 %v1788_v57 }
 0x456   :  { %v1265_v58 = vpop.f32.mrf.mxu3  ;;  %v1245_v2 = vpop.f32.mrf.mxu2 }
 0x457   :  { %v1271_v59 = vadd.f32 %v1265_v58, %v3512_v62  ;;  %v1270_v7 = vadd.f32 %v1245_v2, %v3513_v15 }
 0x459   :  { %v1789_v55 = vmul.f32 -1.442695, %v1271_v59 }
 0x45a   :  { %v1893_v28 = vpop.eup %1892 }
 0x45b   :  { %v1895_v9 = vpop.eup %1894  ;;  %v1275_v12 = vadd.f32 1.0, %v1893_v28  ;;  %1896 = vpow2.f32 %v1789_v55 }
 0x45c   :  { %v1294_v1 = vadd.f32 1.0, %v1895_v9  ;;  %v3517_v9 = vld [vmem:[#allocation68_spill] sm:$0xff] }
 0x45d   :  { %1898 = vrcp.f32 %v1275_v12  ;;  %v1287_v5 = vand.u32 2147483648, %v1275_v12  ;;  %v1285_v10 = vand.u32 2147483647, %v1275_v12  ;;  %vm1281_vm14 = vweird.f32 %v1275_v12 }
 0x45e   :  { %1900 = vrcp.f32 %v1294_v1  ;;  %v1306_v20 = vand.u32 2147483648, %v1294_v1  ;;  %v1304_v14 = vand.u32 2147483647, %v1294_v1  ;;  %vm1300_vm15 = vweird.f32 %v1294_v1 }
 0x45f   :  { %v1288_v3 = vor.u32 1.1754944e-38, %v1287_v5  ;;  %vm1286_vm2 = vcmp.eq.f32.partialorder %v1285_v10, 8.507059e+37 }
 0x460   :  { %v1307_v29 = vor.u32 1.1754944e-38, %v1306_v20  ;;  %vm1305_vm3 = vcmp.eq.f32.partialorder %v1304_v14, 8.507059e+37 }
 0x461   :  { %v1897_v6 = vpop.eup %1896 }
 0x462   :  { %v1314_v11 = vadd.f32 1.0, %v1897_v6 }
 0x463   :  { %v1899_v4 = vpop.eup %1898 }
 0x464   :  { %v1901_v24 = vpop.eup %1900  ;;  %v1277_v21 = vmul.f32 %v1899_v4, %v1275_v12  ;;  %1902 = vrcp.f32 %v1314_v11  ;;  %vm1282_vm12 = vweird.f32 %v1899_v4  ;;  %v1326_v42 = vand.u32 2147483648, %v1314_v11 }
 0x465   :  { %v1296_v16 = vmul.f32 %v1901_v24, %v1294_v1  ;;  %1904 = vtanh.f32 %v1270_v7  ;;  %vm1301_vm13 = vweird.f32 %v1901_v24  ;;  %vm1283_vm0 = vmor %vm1281_vm14, %vm1282_vm12  ;;  %vm1320_vm5 = vweird.f32 %v1314_v11 }
 0x466   :  { %v1278_v17 = vsub.f32 1.0, %v1277_v21  ;;  %vm1302_vm1 = vmor %vm1300_vm15, %vm1301_vm13  ;;  %v1324_v43 = vand.u32 2147483647, %v1314_v11  ;;  %v1327_v0 = vor.u32 1.1754944e-38, %v1326_v42 }
 0x467   :  { %v1297_v23 = vsub.f32 1.0, %v1296_v16 }
 0x468   :  { %v1279_v22 = vmul.f32 %v1899_v4, %v1278_v17  ;;  %vm1325_vm7 = vcmp.eq.f32.partialorder %v1324_v43, 8.507059e+37  ;;  %v1643_v43 = vld [vmem:[#allocation10 + $0x70] sm:$0xff] }
 0x469   :  { %v1298_v19 = vmul.f32 %v1901_v24, %v1297_v23 }
 0x46a   :  { %v1903_v18 = vpop.eup %1902  ;;  %v1280_v27 = vadd.f32 %v1899_v4, %v1279_v22 }
 0x46b   :  { %v1299_v8 = vadd.f32 %v1901_v24, %v1298_v19  ;;  %v1316_v26 = vmul.f32 %v1903_v18, %v1314_v11  ;;  %v1905_v31 = vpop.eup %1904  ;;  %vm1321_vm4 = vweird.f32 %v1903_v18 }
 0x46c   :  { %v1284_v30 = vsel %vm1283_vm0, %v1899_v4, %v1280_v27  ;;  %vm1322_vm6 = vmor %vm1320_vm5, %vm1321_vm4 }
 0x46d   :  { %v1289_v32 = vsel %vm1286_vm2, %v1288_v3, %v1284_v30  ;;  %v1303_v33 = vsel %vm1302_vm1, %v1901_v24, %v1299_v8  ;;  %v1317_v34 = vsub.f32 1.0, %v1316_v26 }
 0x46e   :  { %v1308_v35 = vsel %vm1305_vm3, %v1307_v29, %v1303_v33  ;;  %v1331_v36 = vmul.f32 %v1905_v31, %v1289_v32 }
 0x46f   :  { %v1330_v37 = vmul.f32 %v1308_v35, %v3109_v25  ;;  %v1318_v38 = vmul.f32 %v1903_v18, %v1317_v34 }
 0x471   :  { %v3181_v40 = vadd.f32 %v1331_v36, %v1330_v37  ;;  %v1319_v41 = vadd.f32 %v1903_v18, %v1318_v38 }
 0x473   :  { %1906 = vtanh.f32 %v3181_v40  ;;  %v1323_v47 = vsel %vm1322_vm6, %v1903_v18, %v1319_v41 }
 0x474   :  { %v1328_v60 = vsel %vm1325_vm7, %v1327_v0, %v1323_v47  ;;  %v1642_v47 = vld [vmem:[#allocation10 + $0x68] sm:$0xff]  ;;  %v1641_v0 = vld [vmem:[#allocation10 + $0x60] sm:$0xff] }
 0x479   :  { %v1907_v46 = vpop.eup %1906 }
 0x47a   :  { %v1334_v13 = vmul.f32 %v1907_v46, %v1328_v60  ;;  %v1640_v46 = vld [vmem:[#allocation10 + $0x58] sm:$0xff]  ;;  %v1639_v60 = vld [vmem:[#allocation10 + $0x50] sm:$0xff] }
 0x47c   :  { %1351 = vmatmul.f32.vlgmr.msrb.gmra.mxu0 %v1334_v13  ;;  %1371 = vmatmul.f32.vlgmr.msrb.gmra.mxu1 %v1334_v13 }
 0x47d   :  { %1391 = vmatmul.f32.vlgmr.msrb.gmra.mxu2 %v1334_v13  ;;  %1411 = vmatmul.f32.vlgmr.msrb.gmra.mxu3 %v1334_v13  ;;  %v1638_v13 = vld [vmem:[#allocation10 + $0x48] sm:$0xff] }
 0x4f9   :  { %v1352_v25 = vpop.f32.mrf.mxu0  ;;  %v1372_v61 = vpop.f32.mrf.mxu1 }
 0x4fa   :  { %v1415_v50 = vadd.f32 %v1352_v25, %v3514_v39  ;;  %v1416_v49 = vadd.f32 %v1372_v61, %v3515_v63  ;;  %v1637_v25 = vld [vmem:[#allocation10 + $0x40] sm:$0xff]  ;;  %v1636_v61 = vld [vmem:[#allocation10 + $0x38] sm:$0xff]  ;;  %v1635_v39 = vld [vmem:[#allocation10 + $0x30] sm:$0xff] }
 0x4fc   :  { %v1790_v44 = vmul.f32 -1.442695, %v1415_v50  ;;  %v1791_v45 = vmul.f32 -1.442695, %v1416_v49  ;;  %v3518_v49 = vld [vmem:[#allocation70_spill] sm:$0xff] }
 0x4fe   :  { %1908 = vpow2.f32 %v1790_v44 }
 0x4ff   :  { %1910 = vpow2.f32 %v1791_v45  ;;  %v3519_v45 = vld [vmem:[#allocation71_spill] sm:$0xff] }
 0x500   :  { %v1412_v52 = vpop.f32.mrf.mxu3  ;;  %v1392_v62 = vpop.f32.mrf.mxu2 }
 0x501   :  { %v1418_v56 = vadd.f32 %v1412_v52, %v3516_v51  ;;  %v1417_v12 = vadd.f32 %v1392_v62, %v3517_v9  ;;  %v1634_v51 = vld [vmem:[#allocation10 + $0x28] sm:$0xff] }
 0x502   :  { %v1630_v62 = vld [vmem:[#allocation10 + $0x8] sm:$0xff] }
 0x503   :  { %v1792_v53 = vmul.f32 -1.442695, %v1418_v56 }
 0x504   :  { %v1909_v48 = vpop.eup %1908 }
 0x505   :  { %v1911_v54 = vpop.eup %1910  ;;  %v1422_v57 = vadd.f32 1.0, %v1909_v48  ;;  %1912 = vpow2.f32 %v1792_v53  ;;  %v1633_v48 = vld [vmem:[#allocation10 + $0x20] sm:$0xff] }
 0x506   :  { %v1441_v58 = vadd.f32 1.0, %v1911_v54  ;;  %v1632_v54 = vld [vmem:[#allocation10 + $0x18] sm:$0xff] }
 0x507   :  { %1914 = vrcp.f32 %v1422_v57  ;;  %v1434_v15 = vand.u32 2147483648, %v1422_v57  ;;  %v1432_v21 = vand.u32 2147483647, %v1422_v57  ;;  %vm1428_vm10 = vweird.f32 %v1422_v57 }
 0x508   :  { %1916 = vrcp.f32 %v1441_v58  ;;  %v1453_v7 = vand.u32 2147483648, %v1441_v58  ;;  %v1451_v17 = vand.u32 2147483647, %v1441_v58  ;;  %vm1447_vm11 = vweird.f32 %v1441_v58 }
 0x509   :  { %v1435_v20 = vor.u32 1.1754944e-38, %v1434_v15  ;;  %vm1433_vm14 = vcmp.eq.f32.partialorder %v1432_v21, 8.507059e+37  ;;  %v1683_v15 = vld [vmem:[#allocation11 + $0x68] sm:$0xff] }
 0x50a   :  { %v1454_v19 = vor.u32 1.1754944e-38, %v1453_v7  ;;  %vm1452_vm15 = vcmp.eq.f32.partialorder %v1451_v17, 8.507059e+37  ;;  %v1681_v17 = vld [vmem:[#allocation11 + $0x58] sm:$0xff] }
 0x50b   :  { %v1913_v59 = vpop.eup %1912 }
 0x50c   :  { %v1461_v55 = vadd.f32 1.0, %v1913_v59  ;;  %v3520_v59 = vld [vmem:[#allocation73_spill] sm:$0xff] }
 0x50d   :  { %v1915_v28 = vpop.eup %1914 }
 0x50e   :  { %v1917_v1 = vpop.eup %1916  ;;  %v1424_v2 = vmul.f32 %v1915_v28, %v1422_v57  ;;  %1918 = vrcp.f32 %v1461_v55  ;;  %vm1429_vm8 = vweird.f32 %v1915_v28  ;;  %v1473_v34 = vand.u32 2147483648, %v1461_v55  ;;  %v1631_v57 = vld [vmem:[#allocation10 + $0x10] sm:$0xff] }
 0x50f   :  { %v1443_v6 = vmul.f32 %v1917_v1, %v1441_v58  ;;  %1920 = vtanh.f32 %v1417_v12  ;;  %vm1448_vm9 = vweird.f32 %v1917_v1  ;;  %vm1430_vm12 = vmor %vm1428_vm10, %vm1429_vm8  ;;  %vm1467_vm1 = vweird.f32 %v1461_v55 }
 0x510   :  { %v1425_v11 = vsub.f32 1.0, %v1424_v2  ;;  %vm1449_vm13 = vmor %vm1447_vm11, %vm1448_vm9  ;;  %v1471_v35 = vand.u32 2147483647, %v1461_v55  ;;  %v1474_v37 = vor.u32 1.1754944e-38, %v1473_v34 }
 0x511   :  { %v1444_v4 = vsub.f32 1.0, %v1443_v6 }
 0x512   :  { %v1426_v24 = vmul.f32 %v1915_v28, %v1425_v11  ;;  %vm1472_vm3 = vcmp.eq.f32.partialorder %v1471_v35, 8.507059e+37  ;;  %v1685_v11 = vld [vmem:[#allocation11 + $0x78] sm:$0xff] }
 0x513   :  { %v1445_v16 = vmul.f32 %v1917_v1, %v1444_v4  ;;  %v1684_v4 = vld [vmem:[#allocation11 + $0x70] sm:$0xff]  ;;  %1690 = vmatpush.msrb.mxu1 %v1685_v11  ;;  %v1719_v11 = vld [vmem:[#allocation13 + $0x40] sm:$0xff] }
 0x514   :  { %v1919_v23 = vpop.eup %1918  ;;  %v1427_v5 = vadd.f32 %v1915_v28, %v1426_v24  ;;  %v1682_v24 = vld [vmem:[#allocation11 + $0x60] sm:$0xff] }
 0x515   :  { %v1446_v22 = vadd.f32 %v1917_v1, %v1445_v16  ;;  %v1463_v10 = vmul.f32 %v1919_v23, %v1461_v55  ;;  %v1921_v18 = vpop.eup %1920  ;;  %vm1468_vm0 = vweird.f32 %v1919_v23  ;;  %1691 = vmatpush.msrb.mxu1 %v1684_v4  ;;  %v1718_v4 = vld [vmem:[#allocation13 + $0x38] sm:$0xff] }
 0x516   :  { %v1431_v14 = vsel %vm1430_vm12, %v1915_v28, %v1427_v5  ;;  %vm1469_vm2 = vmor %vm1467_vm1, %vm1468_vm0  ;;  %v1629_v28 = vld [vmem:[#allocation10] sm:$0xff]  ;;  %v3521_v5 = vld [vmem:[#allocation72_spill] sm:$0xff] }
 0x517   :  { %v1436_v27 = vsel %vm1433_vm14, %v1435_v20, %v1431_v14  ;;  %v1450_v3 = vsel %vm1449_vm13, %v1917_v1, %v1446_v22  ;;  %v1464_v8 = vsub.f32 1.0, %v1463_v10  ;;  %1692 = vmatpush.msrb.mxu1 %v1683_v15  ;;  %v1717_v15 = vld [vmem:[#allocation13 + $0x30] sm:$0xff] }
 0x518   :  { %v1455_v26 = vsel %vm1452_vm15, %v1454_v19, %v1450_v3  ;;  %v1478_v29 = vmul.f32 %v1921_v18, %v1436_v27  ;;  %v1680_v19 = vld [vmem:[#allocation11 + $0x50] sm:$0xff]  ;;  %v1679_v27 = vld [vmem:[#allocation11 + $0x48] sm:$0xff] }
 0x519   :  { %v1477_v30 = vmul.f32 %v1455_v26, %v3181_v40  ;;  %v1465_v31 = vmul.f32 %v1919_v23, %v1464_v8  ;;  %v1644_v40 = vld [vmem:[#allocation10 + $0x78] sm:$0xff]  ;;  %1693 = vmatpush.msrb.mxu1 %v1682_v24  ;;  %v1715_v24 = vld [vmem:[#allocation13 + $0x20] sm:$0xff] }
 0x51a   :  { %1649 = vmatpush.msrb.mxu0 %v1644_v40 }
 0x51b   :  { %v3189_v32 = vadd.f32 %v1478_v29, %v1477_v30  ;;  %v1466_v33 = vadd.f32 %v1919_v23, %v1465_v31  ;;  %1694 = vmatpush.msrb.mxu1 %v1681_v17  ;;  %v1678_v31 = vld [vmem:[#allocation11 + $0x40] sm:$0xff] }
 0x51c   :  { %1650 = vmatpush.msrb.mxu0 %v1643_v43 }
 0x51d   :  { %1922 = vtanh.f32 %v3189_v32  ;;  %v1470_v36 = vsel %vm1469_vm2, %v1919_v23, %v1466_v33  ;;  %1695 = vmatpush.msrb.mxu1 %v1680_v19  ;;  %v1810_v19 = vld [vmem:[%s3223_s7] ss:$0 sm:$0xff] }
 0x51e   :  { %v1475_v41 = vsel %vm1472_vm3, %v1474_v37, %v1470_v36  ;;  %1651 = vmatpush.msrb.mxu0 %v1642_v47  ;;  %v1677_v37 = vld [vmem:[#allocation11 + $0x38] sm:$0xff]  ;;  %v1676_v47 = vld [vmem:[#allocation11 + $0x30] sm:$0xff] }
 0x51f   :  { %1696 = vmatpush.msrb.mxu1 %v1679_v27 }
 0x520   :  { %1652 = vmatpush.msrb.mxu0 %v1641_v0 }
 0x521   :  { %1697 = vmatpush.msrb.mxu1 %v1678_v31 }
 0x522   :  { %1653 = vmatpush.msrb.mxu0 %v1640_v46 }
 0x523   :  { %v1923_v38 = vpop.eup %1922  ;;  %1698 = vmatpush.msrb.mxu1 %v1677_v37 }
 0x524   :  { %v1481_v42 = vmul.f32 %v1923_v38, %v1475_v41  ;;  %1654 = vmatpush.msrb.mxu0 %v1639_v60 }
 0x525   :  { %1699 = vmatpush.msrb.mxu1 %v1676_v47 }
 0x526   :  { %1498 = vmatmul.f32.vlgmr.msra.gmra.mxu0 %v1481_v42  ;;  %1518 = vmatmul.f32.vlgmr.msra.gmra.mxu1 %v1481_v42 }
 0x527   :  { %1538 = vmatmul.f32.vlgmr.msra.gmra.mxu2 %v1481_v42  ;;  %1558 = vmatmul.f32.vlgmr.msra.gmra.mxu3 %v1481_v42 }
 0x528   :  { %1655 = vmatpush.msrb.mxu0 %v1638_v13 }
 0x52a   :  { %1656 = vmatpush.msrb.mxu0 %v1637_v25 }
 0x52c   :  { %1657 = vmatpush.msrb.mxu0 %v1636_v61 }
 0x52e   :  { %1658 = vmatpush.msrb.mxu0 %v1635_v39  ;;  %v1675_v39 = vld [vmem:[#allocation11 + $0x28] sm:$0xff] }
 0x52f   :  { %1700 = vmatpush.msrb.mxu1 %v1675_v39 }
 0x530   :  { %1659 = vmatpush.msrb.mxu0 %v1634_v51 }
 0x532   :  { %1660 = vmatpush.msrb.mxu0 %v1633_v48 }
 0x534   :  { %1661 = vmatpush.msrb.mxu0 %v1632_v54 }
 0x536   :  { %1662 = vmatpush.msrb.mxu0 %v1631_v57 }
 0x538   :  { %1663 = vmatpush.msrb.mxu0 %v1630_v62  ;;  %v1671_v62 = vld [vmem:[#allocation11 + $0x8] sm:$0xff] }
 0x53a   :  { %1664 = vmatpush.msrb.mxu0 %v1629_v28  ;;  %v1725_v28 = vld [vmem:[#allocation13 + $0x70] sm:$0xff] }
 0x5a3   :  { %v1499_v50 = vpop.f32.mrf.mxu0  ;;  %v1519_v63 = vpop.f32.mrf.mxu1 }
 0x5a4   :  { %v1562_v44 = vadd.f32 %v1499_v50, %v3518_v49  ;;  %v1563_v52 = vadd.f32 %v1519_v63, %v3519_v45  ;;  %v1674_v49 = vld [vmem:[#allocation11 + $0x20] sm:$0xff] }
 0x5a5   :  { %1701 = vmatpush.msrb.mxu1 %v1674_v49 }
 0x5a6   :  { %v1793_v56 = vmul.f32 -1.442695, %v1562_v44  ;;  %v1794_v53 = vmul.f32 -1.442695, %v1563_v52  ;;  %v1673_v52 = vld [vmem:[#allocation11 + $0x18] sm:$0xff] }
 0x5a7   :  { %1702 = vmatpush.msrb.mxu1 %v1673_v52 }
 0x5a8   :  { %1924 = vpow2.f32 %v1793_v56 }
 0x5a9   :  { %1926 = vpow2.f32 %v1794_v53 }
 0x5aa   :  { %v1559_v58 = vpop.f32.mrf.mxu3  ;;  %v1539_v7 = vpop.f32.mrf.mxu2 }
 0x5ab   :  { %v1565_v55 = vadd.f32 %v1559_v58, %v3520_v59  ;;  %v1564_v20 = vadd.f32 %v1539_v7, %v3521_v5  ;;  %v1672_v58 = vld [vmem:[#allocation11 + $0x10] sm:$0xff]  ;;  %v1670_v59 = vld [vmem:[#allocation11] sm:$0xff]  ;;  %v1716_v7 = vld [vmem:[#allocation13 + $0x28] sm:$0xff] }
 0x5ac   :  { %1703 = vmatpush.msrb.mxu1 %v1672_v58 }
 0x5ad   :  { %v1795_v9 = vmul.f32 -1.442695, %v1565_v55  ;;  %v1726_v55 = vld [vmem:[#allocation13 + $0x78] sm:$0xff] }
 0x5ae   :  { %v1925_v12 = vpop.eup %1924  ;;  %1704 = vmatpush.msrb.mxu1 %v1671_v62  ;;  %1731 = vmatpush.msrb.mxu2 %v1726_v55 }
 0x5af   :  { %v1927_v1 = vpop.eup %1926  ;;  %v1569_v2 = vadd.f32 1.0, %v1925_v12  ;;  %1928 = vpow2.f32 %v1795_v9  ;;  %v1724_v9 = vld [vmem:[#allocation13 + $0x68] sm:$0xff]  ;;  %v1723_v12 = vld [vmem:[#allocation13 + $0x60] sm:$0xff] }
 0x5b0   :  { %v1588_v6 = vadd.f32 1.0, %v1927_v1  ;;  %1705 = vmatpush.msrb.mxu1 %v1670_v59  ;;  %1732 = vmatpush.msrb.mxu2 %v1725_v28  ;;  %v1722_v1 = vld [vmem:[#allocation13 + $0x58] sm:$0xff] }
 0x5b1   :  { %1930 = vrcp.f32 %v1569_v2  ;;  %v1581_v8 = vand.u32 2147483648, %v1569_v2  ;;  %v1579_v30 = vand.u32 2147483647, %v1569_v2  ;;  %vm1575_vm6 = vweird.f32 %v1569_v2 }
 0x5b2   :  { %1932 = vrcp.f32 %v1588_v6  ;;  %v1600_v26 = vand.u32 2147483648, %v1588_v6  ;;  %v1598_v34 = vand.u32 2147483647, %v1588_v6  ;;  %vm1594_vm7 = vweird.f32 %v1588_v6  ;;  %1733 = vmatpush.msrb.mxu2 %v1724_v9 }
 0x5b3   :  { %v1582_v38 = vor.u32 1.1754944e-38, %v1581_v8  ;;  %vm1580_vm10 = vcmp.eq.f32.partialorder %v1579_v30, 8.507059e+37 }
 0x5b4   :  { %v1601_v40 = vor.u32 1.1754944e-38, %v1600_v26  ;;  %vm1599_vm11 = vcmp.eq.f32.partialorder %v1598_v34, 8.507059e+37  ;;  %1734 = vmatpush.msrb.mxu2 %v1723_v12 }
 0x5b5   :  { %v1929_v21 = vpop.eup %1928 }
 0x5b6   :  { %v3195_v16 = vadd.f32 1.0, %v1929_v21  ;;  %1735 = vmatpush.msrb.mxu2 %v1722_v1  ;;  %v1714_v21 = vld [vmem:[#allocation13 + $0x18] sm:$0xff] }
 0x5b7   :  { %v1931_v23 = vpop.eup %1930 }
 0x5b8   :  { %v1933_v22 = vpop.eup %1932  ;;  %v1571_v10 = vmul.f32 %v1931_v23, %v1569_v2  ;;  %1934 = vrcp.f32 %v3195_v16  ;;  %vm1576_vm4 = vweird.f32 %v1931_v23  ;;  %v1620_v51 = vand.u32 2147483648, %v3195_v16  ;;  %v1721_v2 = vld [vmem:[#allocation13 + $0x50] sm:$0xff] }
 0x5b9   :  { %v1590_v14 = vmul.f32 %v1933_v22, %v1588_v6  ;;  %1936 = vtanh.f32 %v1564_v20  ;;  %vm1595_vm5 = vweird.f32 %v1933_v22  ;;  %vm1577_vm8 = vmor %vm1575_vm6, %vm1576_vm4  ;;  %vm1614_vm13 = vweird.f32 %v3195_v16  ;;  %v1720_v6 = vld [vmem:[#allocation13 + $0x48] sm:$0xff]  ;;  %1736 = vmatpush.msrb.mxu2 %v1721_v2  ;;  %v1713_v20 = vld [vmem:[#allocation13 + $0x10] sm:$0xff] }
 0x5ba   :  { %v1572_v18 = vsub.f32 1.0, %v1571_v10  ;;  %vm1596_vm9 = vmor %vm1594_vm7, %vm1595_vm5  ;;  %v1618_v56 = vand.u32 2147483647, %v3195_v16  ;;  %v1711_v10 = vld [vmem:[#allocation13] sm:$0xff] }
 0x5bb   :  { %v1591_v3 = vsub.f32 1.0, %v1590_v14  ;;  %1737 = vmatpush.msrb.mxu2 %v1720_v6 }
 0x5bc   :  { %v1573_v29 = vmul.f32 %v1931_v23, %v1572_v18  ;;  %vm1619_vm15 = vcmp.eq.f32.partialorder %v1618_v56, 8.507059e+37 }
 0x5bd   :  { %v1592_v33 = vmul.f32 %v1933_v22, %v1591_v3  ;;  %1738 = vmatpush.msrb.mxu2 %v1719_v11  ;;  %v1811_v3 = vld [vmem:[%s3225_s9] ss:$0 sm:$0xff] }
 0x5be   :  { %v1935_v35 = vpop.eup %1934  ;;  %v1574_v36 = vadd.f32 %v1931_v23, %v1573_v29 }
 0x5bf   :  { %v1593_v41 = vadd.f32 %v1933_v22, %v1592_v33  ;;  %v1610_v42 = vmul.f32 %v1935_v35, %v3195_v16  ;;  %v1937_v0 = vpop.eup %1936  ;;  %vm1615_vm12 = vweird.f32 %v1935_v35  ;;  %1739 = vmatpush.msrb.mxu2 %v1718_v4  ;;  %v1809_v16 = vld [vmem:[%s3221_s5] ss:$0 sm:$0xff] }
 0x5c0   :  { %v1578_v43 = vsel %vm1577_vm8, %v1931_v23, %v1574_v36  ;;  %vm1616_vm14 = vmor %vm1614_vm13, %vm1615_vm12 }
 0x5c1   :  { %v1583_v46 = vsel %vm1580_vm10, %v1582_v38, %v1578_v43  ;;  %v1597_v60 = vsel %vm1596_vm9, %v1933_v22, %v1593_v41  ;;  %v1611_v13 = vsub.f32 1.0, %v1610_v42  ;;  %1740 = vmatpush.msrb.mxu2 %v1717_v15  ;;  %v1712_v22 = vld [vmem:[#allocation13 + $0x8] sm:$0xff] }
 0x5c2   :  { %v1602_v25 = vsel %vm1599_vm11, %v1601_v40, %v1597_v60  ;;  %v1625_v61 = vmul.f32 %v1937_v0, %v1583_v46 }
 0x5c3   :  { %v1624_v50 = vmul.f32 %v1602_v25, %v3189_v32  ;;  %v1612_v63 = vmul.f32 %v1935_v35, %v1611_v13  ;;  %v1621_v32 = vor.u32 1.1754944e-38, %v1620_v51  ;;  %1741 = vmatpush.msrb.mxu2 %v1716_v7 }
 0x5c5   :  { %v1626_v44 = vadd.f32 %v1625_v61, %v1624_v50  ;;  %v1613_v45 = vadd.f32 %v1935_v35, %v1612_v63  ;;  %1742 = vmatpush.msrb.mxu2 %v1715_v24 }
 0x5c7   :  { %1938 = vtanh.f32 %v1626_v44  ;;  %v1617_v53 = vsel %vm1616_vm14, %v1935_v35, %v1613_v45  ;;  %1743 = vmatpush.msrb.mxu2 %v1714_v21 }
 0x5c8   :  { %v1622_v54 = vsel %vm1619_vm15, %v1621_v32, %v1617_v53 }
 0x5c9   :  { %1744 = vmatpush.msrb.mxu2 %v1713_v20 }
 0x5cb   :  { %1745 = vmatpush.msrb.mxu2 %v1712_v22 }
 0x5cd   :  { %v1939_v48 = vpop.eup %1938  ;;  %1746 = vmatpush.msrb.mxu2 %v1711_v10 }
 0x5ce   :  { %v1628_v57 = vmul.f32 %v1939_v48, %v1622_v54 }
 0x5d0   :  { %1665 = vmatmul.f32.vlgmr.msrb.gmra.mxu0 %v1628_v57 }
 0x64d   :  { %v1666_v17 = vpop.f32.mrf.mxu0 }
 0x64e   :  { %v1667_v23 = vadd.f32 %v1809_v16, %v1666_v17 }
 0x650   :  { %v1669_v5 = vmax.f32 %v1667_v23, 0.0 }
 0x652   :  { %1706 = vmatmul.f32.vlgmr.msrb.gmra.mxu1 %v1669_v5 }
 0x6cf   :  { %v1707_v14 = vpop.f32.mrf.mxu1 }
 0x6d0   :  { %v1708_v18 = vadd.f32 %v1810_v19, %v1707_v14 }
 0x6d2   :  { %v1710_v27 = vmax.f32 %v1708_v18, 0.0 }
 0x6d4   :  { %1747 = vmatmul.f32.vlgmr.msrb.gmra.mxu2 %v1710_v27 }
 0x757   :  { %v1748_v8 = vpop.f32.mrf.mxu2 }
 0x758   :  { %v1749_v26 = vadd.f32 %v1811_v3, %v1748_v8 }
 0x75a   :  { %1751 = vst [vmem:[#allocation14] sm:$0xff] %v1749_v26 }
 0x75b   :  { %1762 = dma.vmem_to_hbm [thread:$0]  %s1758_s29, 128, %s1760_s12, [#allocation4]  }
 0x75c   :  { %2204 = dma.done.wait [#allocation4], 128  }
 0x75d   :  { %2205 = vsyncadd [#allocation4], 4294967168 }
 0x75e   :  { %1767 = vsyncpa [#allocation3], 1 }
 0x75f   :  { %1768 = vsyncpa [#allocation6], 1 }
 0x760   :  { %1769 = vsyncpa [#allocation9], 1 }
 0x761   :  { %1770 = vsyncpa [#allocation12], 1 }
 0x762   :  { %1771 = vsyncpa [#allocation4], 1 }

</bundles_post_ra>
